<compile_context>
chip_gen: v6e
topology: v6e:2x2x1
jax: 0.10.0
libtpu: 0.0.40
codegen_flags: <defaults>
</compile_context>

<pallas_src>
import functools
import math

import jax
import jax.numpy as jnp
from jax.experimental import pallas as pl
from jax.experimental.pallas import tpu as pltpu

D = 512
N_LAYERS = 4
LRELU_ALPHA = 0.2
LRELU_GAIN = math.sqrt(2.0)

LEVEL_CHUNKS = (('coarse', 0, 4), ('medium', 4, 8), ('fine', 8, 18))
N_PAD = 16          # per-level layer count padded to a multiple of 8 (max is 10)


# ---------------------------------------------------------------------------
# Fused Pallas kernel: one level per grid step
# ---------------------------------------------------------------------------
def _levels_mlp_kernel(x_ref, scale_ref, w_ref, b_ref, o_ref, *,
                       final_activation, pixel_norm):
    """x_ref:[M,512]  scale_ref:[M,512]  w_ref:[4,512,512]bf16  b_ref:[4,1,512].

    Computes delta = MLP(x) and stores  o = x + scale * delta.
    """
    x0 = x_ref[...]                                   # residual (w rows)
    x = x0.astype(jnp.float32)
    if pixel_norm:
        x = x * jax.lax.rsqrt(jnp.mean(x * x, axis=-1, keepdims=True) + 1e-8)
    for i in range(N_LAYERS):
        h = jnp.dot(x.astype(jnp.bfloat16), w_ref[i],
                    preferred_element_type=jnp.float32)        # [M,512] f32
        h = h + b_ref[i]                                        # bias [1,512]
        act = 'lrelu' if i < N_LAYERS - 1 else final_activation
        if act == 'lrelu':
            h = jnp.where(h >= 0.0, h, LRELU_ALPHA * h) * LRELU_GAIN
        # 'linear' -> identity
        x = h
    o_ref[...] = (x0.astype(jnp.float32)
                  + scale_ref[...].astype(jnp.float32) * x).astype(o_ref.dtype)


def _fused_levels_apply(x_slab, scale_rows, w_stack, b_stack, *,
                        final_activation, pixel_norm):
    """x_slab:[nL,M,512], scale_rows:[M,512], w_stack:[nL,4,512,512] bf16,
    b_stack:[nL,4,1,512] f32  ->  [nL,M,512] (= x + scale*delta)."""
    n_lvl, M, _ = x_slab.shape
    kern = functools.partial(_levels_mlp_kernel,
                             final_activation=final_activation,
                             pixel_norm=pixel_norm)
    return pl.pallas_call(
        kern,
        out_shape=jax.ShapeDtypeStruct((n_lvl, M, D), x_slab.dtype),
        grid=(n_lvl,),
        in_specs=[
            pl.BlockSpec((None, M, D), lambda l: (l, 0, 0)),          # x rows
            pl.BlockSpec((M, D), lambda l: (0, 0)),                   # scale
            pl.BlockSpec((None, N_LAYERS, D, D), lambda l: (l, 0, 0, 0)),   # W
            pl.BlockSpec((None, N_LAYERS, 1, D), lambda l: (l, 0, 0, 0)),   # b
        ],
        out_specs=pl.BlockSpec((None, M, D), lambda l: (l, 0, 0)),
        input_output_aliases={0: 0},
        compiler_params=pltpu.CompilerParams(
            dimension_semantics=("parallel",)),
    )(x_slab, scale_rows, w_stack, b_stack)


# ---------------------------------------------------------------------------
# Parameter init (matches StyleGAN FullyConnectedLayer semantics)
# ---------------------------------------------------------------------------
def init_dynamic_lerper_params(key, lr_mul):
    """raw_w ~ randn(out,in)/lr_mul, bias=zeros.
    Effective matmul weight = (raw_w * lr_mul/sqrt(in)).T -> [in,out] (bf16)."""
    weight_gain = lr_mul / math.sqrt(D)
    bias_gain = lr_mul
    ws, bs = [], []
    for _ in range(N_LAYERS):
        key, sub = jax.random.split(key)
        raw_w = jax.random.normal(sub, (D, D), dtype=jnp.float32) / lr_mul
        raw_b = jnp.zeros((D,), jnp.float32)
        ws.append(((raw_w * weight_gain).T).astype(jnp.bfloat16))   # [in,out]
        bs.append((raw_b * bias_gain)[None, :])                     # [1,out] f32
    return jnp.stack(ws), jnp.stack(bs)       # [4,512,512] bf16, [4,1,512] f32


# ---------------------------------------------------------------------------
# LevelsDynamicLerper forward
# ---------------------------------------------------------------------------
def levels_dynamic_lerper_forward(params, w, gender, magnitude=1.0, *,
                                  levels=('coarse', 'medium', 'fine'),
                                  final_activation='linear',
                                  mult=0.1,
                                  gendered=True,
                                  pixel_norm=True):
    B, L, Dd = w.shape
    assert (L, Dd) == (18, D)
    assert final_activation in ('linear', 'lrelu'), final_activation

    enabled = [c for c in LEVEL_CHUNKS if c[0] in levels]
    if not enabled:
        return w

    # Per-batch scale = mult * magnitude * (gender*2-1 if gendered).
    if isinstance(magnitude, (int, float)):
        mag = jnp.full((B,), magnitude, dtype=jnp.float32)
    else:
        mag = jnp.reshape(jnp.asarray(magnitude, jnp.float32), (B,))
    scale = mult * mag
    if gendered:
        g = jnp.reshape(jnp.asarray(gender, jnp.float32), (B,))
        scale = scale * (g * 2.0 - 1.0)
    # Lane-dense per-row scale slab [B*N_PAD, 512] (row b*N_PAD+j -> scale[b]).
    scale_rows = jnp.broadcast_to(scale[:, None, None],
                                  (B, N_PAD, D)).reshape(B * N_PAD, D)
    scale_rows = scale_rows.astype(w.dtype)

    # Build the [n_enabled, B*N_PAD, 512] input slab (layer dim zero-padded).
    slabs = []
    for name, lo, hi in enabled:
        n = hi - lo
        xl = w[:, lo:hi, :]                                    # [B, n, 512]
        xl = jnp.pad(xl, ((0, 0), (0, N_PAD - n), (0, 0)))     # [B, N_PAD, 512]
        slabs.append(xl.reshape(B * N_PAD, D))
    x_slab = jnp.stack(slabs, axis=0)                          # [nL, M, 512]

    w_stack = jnp.stack([params[name][0] for name, _, _ in enabled], axis=0)
    b_stack = jnp.stack([params[name][1] for name, _, _ in enabled], axis=0)

    out_slab = _fused_levels_apply(x_slab, scale_rows, w_stack, b_stack,
                                   final_activation=final_activation,
                                   pixel_norm=pixel_norm)      # [nL, M, 512]

    # Re-gather valid rows; disabled levels keep w unchanged.
    parts, ei = [], 0
    for name, lo, hi in LEVEL_CHUNKS:
        n = hi - lo
        if name in levels:
            parts.append(out_slab[ei].reshape(B, N_PAD, D)[:, :n, :])
            ei += 1
        else:
            parts.append(w[:, lo:hi, :])
    return jnp.concatenate(parts, axis=1)


# ---------------------------------------------------------------------------
# Pure-JAX reference (same bf16 weights) for a tolerance check
# ---------------------------------------------------------------------------
def _reference_forward(params, w, gender, magnitude, *, levels,
                       final_activation, mult, gendered, pixel_norm):
    B = w.shape[0]

    def mlp(x, wst, bst):
        x = x.astype(jnp.float32)
        if pixel_norm:
            x = x * jax.lax.rsqrt(jnp.mean(x * x, -1, keepdims=True) + 1e-8)
        for i in range(N_LAYERS):
            h = jnp.dot(x.astype(jnp.bfloat16), wst[i],
                        preferred_element_type=jnp.float32) + bst[i]
            act = 'lrelu' if i < N_LAYERS - 1 else final_activation
            if act == 'lrelu':
                h = jnp.where(h >= 0.0, h, LRELU_ALPHA * h) * LRELU_GAIN
            x = h
        return x

    delta = jnp.zeros_like(w)
    for name, lo, hi in LEVEL_CHUNKS:
        if name in levels:
            n = hi - lo
            x = w[:, lo:hi, :].reshape(B * n, D)
            y = mlp(x, *params[name]).reshape(B, n, D)
            delta = delta.at[:, lo:hi, :].set(y.astype(w.dtype))
    if isinstance(magnitude, (int, float)):
        mag = jnp.full((B, 1, 1), magnitude, jnp.float32)
    else:
        mag = jnp.reshape(magnitude, (B, 1, 1)).astype(jnp.float32)
    delta = delta * mult * mag
    if gendered:
        gm = (jnp.reshape(gender, (B, 1)) * 2.0 - 1.0)[:, None, :]
        delta = delta * gm
    return (w + delta).astype(w.dtype)


# ---------------------------------------------------------------------------
if __name__ == "__main__":
    key = jax.random.PRNGKey(0)
    kw, kg, km, kc, kmid, kf = jax.random.split(key, 6)

    B = 2
    lr_mul = 0.01

    w = jax.random.normal(kw, (B, 18, D), dtype=jnp.float32)
    gender = (jax.random.uniform(kg, (B, 1)) > 0.5).astype(jnp.float32)
    magnitude = jax.random.uniform(km, (B,), dtype=jnp.float32)

    params = {
        'coarse': init_dynamic_lerper_params(kc, lr_mul),
        'medium': init_dynamic_lerper_params(kmid, lr_mul),
        'fine': init_dynamic_lerper_params(kf, lr_mul),
    }

    fwd = jax.jit(functools.partial(
        levels_dynamic_lerper_forward,
        levels=('coarse', 'medium', 'fine'),
        final_activation='linear',
        mult=0.1,
        gendered=True,
        pixel_norm=True))

    out = fwd(params, w, gender, magnitude)
    jax.block_until_ready(out)
    assert out.shape == (B, 18, D)

    ref = _reference_forward(params, w, gender, magnitude,
                             levels=('coarse', 'medium', 'fine'),
                             final_activation='linear',
                             mult=0.1, gendered=True, pixel_norm=True)
    err = float(jnp.max(jnp.abs(out - ref)))
    assert err < 5e-2, f"max abs err {err}"
    print("KERNEL_OK")
</pallas_src>

<mosaic_0001>
module attributes {stable_mosaic.version = 11 : i64} {
  func.func @_levels_mlp_kernel(%arg0: i32, %arg1: memref<1x32x512xf32, #tpu.memory_space<vmem>>, %arg2: memref<32x512xf32, #tpu.memory_space<vmem>>, %arg3: memref<1x4x512x512xbf16, #tpu.memory_space<vmem>>, %arg4: memref<1x4x1x512xf32, #tpu.memory_space<vmem>>, %arg5: memref<1x32x512xf32, #tpu.memory_space<vmem>>) attributes {dimension_semantics = [#tpu.dimension_semantics<parallel>], iteration_bounds = array<i64: 3>, scalar_prefetch = 0 : i64, scratch_operands = 0 : i64, tpu.core_type = #tpu.core_type<tc>, window_params = [{transform_indices = @transform_0, window_bounds = array<i64: 1, 32, 512>}, {pipeline_mode = #tpu.pipeline_mode<synchronous>, transform_indices = @transform_1, window_bounds = array<i64: 32, 512>}, {transform_indices = @transform_2, window_bounds = array<i64: 1, 4, 512, 512>}, {transform_indices = @transform_3, window_bounds = array<i64: 1, 4, 1, 512>}, {transform_indices = @transform_4, window_bounds = array<i64: 1, 32, 512>}]} {
    %c0 = arith.constant 0 : index
    %c0_0 = arith.constant 0 : index
    %c0_1 = arith.constant 0 : index
    %0 = vector.load %arg1[%c0, %c0_0, %c0_1] : memref<1x32x512xf32, #tpu.memory_space<vmem>>, vector<1x32x512xf32>
    %1 = vector.shape_cast %0 : vector<1x32x512xf32> to vector<32x512xf32>
    %2 = arith.mulf %1, %1 : vector<32x512xf32>
    %cst = arith.constant dense<0.000000e+00> : vector<32xf32>
    %3 = vector.multi_reduction <add>, %2, %cst [1] : vector<32x512xf32> to vector<32xf32>
    %4 = vector.shape_cast %3 : vector<32xf32> to vector<32x1xf32>
    %cst_2 = arith.constant 5.120000e+02 : f32
    %5 = vector.broadcast %cst_2 : f32 to vector<32x1xf32>
    %6 = arith.divf %4, %5 : vector<32x1xf32>
    %cst_3 = arith.constant 9.99999993E-9 : f32
    %7 = vector.broadcast %cst_3 : f32 to vector<32x1xf32>
    %8 = arith.addf %6, %7 : vector<32x1xf32>
    %9 = math.rsqrt %8 : vector<32x1xf32>
    %10 = vector.broadcast %9 : vector<32x1xf32> to vector<32x512xf32>
    %11 = arith.mulf %1, %10 : vector<32x512xf32>
    %12 = arith.truncf %11 : vector<32x512xf32> to vector<32x512xbf16>
    %c0_4 = arith.constant 0 : index
    %c0_5 = arith.constant 0 : index
    %c0_6 = arith.constant 0 : index
    %c0_7 = arith.constant 0 : index
    %13 = vector.load %arg3[%c0_4, %c0_5, %c0_6, %c0_7] : memref<1x4x512x512xbf16, #tpu.memory_space<vmem>>, vector<1x1x512x512xbf16>
    %14 = vector.shape_cast %13 : vector<1x1x512x512xbf16> to vector<512x512xbf16>
    %cst_8 = arith.constant dense<0.000000e+00> : vector<32x512xf32>
    %15 = tpu.matmul %12, %14, %cst_8 {dimension_numbers = #tpu.dot_dimension_numbers<[1], [0], [0], [1], [0, 0, 1, 1], [], []>} : vector<32x512xbf16>, vector<512x512xbf16>, vector<32x512xf32> -> vector<32x512xf32>
    %c0_9 = arith.constant 0 : index
    %c0_10 = arith.constant 0 : index
    %c0_11 = arith.constant 0 : index
    %c0_12 = arith.constant 0 : index
    %16 = vector.load %arg4[%c0_9, %c0_10, %c0_11, %c0_12] : memref<1x4x1x512xf32, #tpu.memory_space<vmem>>, vector<1x1x1x512xf32>
    %17 = vector.shape_cast %16 : vector<1x1x1x512xf32> to vector<1x512xf32>
    %18 = vector.broadcast %17 : vector<1x512xf32> to vector<32x512xf32>
    %19 = arith.addf %15, %18 : vector<32x512xf32>
    %cst_13 = arith.constant 0.000000e+00 : f32
    %20 = vector.broadcast %cst_13 : f32 to vector<32x512xf32>
    %21 = arith.cmpf oge, %19, %20 : vector<32x512xf32>
    %cst_14 = arith.constant 2.000000e-01 : f32
    %22 = vector.broadcast %cst_14 : f32 to vector<32x512xf32>
    %23 = arith.mulf %22, %19 : vector<32x512xf32>
    %24 = arith.select %21, %19, %23 : vector<32x512xi1>, vector<32x512xf32>
    %cst_15 = arith.constant 1.41421354 : f32
    %25 = vector.broadcast %cst_15 : f32 to vector<32x512xf32>
    %26 = arith.mulf %24, %25 : vector<32x512xf32>
    %27 = arith.truncf %26 : vector<32x512xf32> to vector<32x512xbf16>
    %c0_16 = arith.constant 0 : index
    %c1 = arith.constant 1 : index
    %c0_17 = arith.constant 0 : index
    %c0_18 = arith.constant 0 : index
    %28 = vector.load %arg3[%c0_16, %c1, %c0_17, %c0_18] : memref<1x4x512x512xbf16, #tpu.memory_space<vmem>>, vector<1x1x512x512xbf16>
    %29 = vector.shape_cast %28 : vector<1x1x512x512xbf16> to vector<512x512xbf16>
    %cst_19 = arith.constant dense<0.000000e+00> : vector<32x512xf32>
    %30 = tpu.matmul %27, %29, %cst_19 {dimension_numbers = #tpu.dot_dimension_numbers<[1], [0], [0], [1], [0, 0, 1, 1], [], []>} : vector<32x512xbf16>, vector<512x512xbf16>, vector<32x512xf32> -> vector<32x512xf32>
    %c0_20 = arith.constant 0 : index
    %c1_21 = arith.constant 1 : index
    %c0_22 = arith.constant 0 : index
    %c0_23 = arith.constant 0 : index
    %31 = vector.load %arg4[%c0_20, %c1_21, %c0_22, %c0_23] : memref<1x4x1x512xf32, #tpu.memory_space<vmem>>, vector<1x1x1x512xf32>
    %32 = vector.shape_cast %31 : vector<1x1x1x512xf32> to vector<1x512xf32>
    %33 = vector.broadcast %32 : vector<1x512xf32> to vector<32x512xf32>
    %34 = arith.addf %30, %33 : vector<32x512xf32>
    %cst_24 = arith.constant 0.000000e+00 : f32
    %35 = vector.broadcast %cst_24 : f32 to vector<32x512xf32>
    %36 = arith.cmpf oge, %34, %35 : vector<32x512xf32>
    %cst_25 = arith.constant 2.000000e-01 : f32
    %37 = vector.broadcast %cst_25 : f32 to vector<32x512xf32>
    %38 = arith.mulf %37, %34 : vector<32x512xf32>
    %39 = arith.select %36, %34, %38 : vector<32x512xi1>, vector<32x512xf32>
    %cst_26 = arith.constant 1.41421354 : f32
    %40 = vector.broadcast %cst_26 : f32 to vector<32x512xf32>
    %41 = arith.mulf %39, %40 : vector<32x512xf32>
    %42 = arith.truncf %41 : vector<32x512xf32> to vector<32x512xbf16>
    %c0_27 = arith.constant 0 : index
    %c2 = arith.constant 2 : index
    %c0_28 = arith.constant 0 : index
    %c0_29 = arith.constant 0 : index
    %43 = vector.load %arg3[%c0_27, %c2, %c0_28, %c0_29] : memref<1x4x512x512xbf16, #tpu.memory_space<vmem>>, vector<1x1x512x512xbf16>
    %44 = vector.shape_cast %43 : vector<1x1x512x512xbf16> to vector<512x512xbf16>
    %cst_30 = arith.constant dense<0.000000e+00> : vector<32x512xf32>
    %45 = tpu.matmul %42, %44, %cst_30 {dimension_numbers = #tpu.dot_dimension_numbers<[1], [0], [0], [1], [0, 0, 1, 1], [], []>} : vector<32x512xbf16>, vector<512x512xbf16>, vector<32x512xf32> -> vector<32x512xf32>
    %c0_31 = arith.constant 0 : index
    %c2_32 = arith.constant 2 : index
    %c0_33 = arith.constant 0 : index
    %c0_34 = arith.constant 0 : index
    %46 = vector.load %arg4[%c0_31, %c2_32, %c0_33, %c0_34] : memref<1x4x1x512xf32, #tpu.memory_space<vmem>>, vector<1x1x1x512xf32>
    %47 = vector.shape_cast %46 : vector<1x1x1x512xf32> to vector<1x512xf32>
    %48 = vector.broadcast %47 : vector<1x512xf32> to vector<32x512xf32>
    %49 = arith.addf %45, %48 : vector<32x512xf32>
    %cst_35 = arith.constant 0.000000e+00 : f32
    %50 = vector.broadcast %cst_35 : f32 to vector<32x512xf32>
    %51 = arith.cmpf oge, %49, %50 : vector<32x512xf32>
    %cst_36 = arith.constant 2.000000e-01 : f32
    %52 = vector.broadcast %cst_36 : f32 to vector<32x512xf32>
    %53 = arith.mulf %52, %49 : vector<32x512xf32>
    %54 = arith.select %51, %49, %53 : vector<32x512xi1>, vector<32x512xf32>
    %cst_37 = arith.constant 1.41421354 : f32
    %55 = vector.broadcast %cst_37 : f32 to vector<32x512xf32>
    %56 = arith.mulf %54, %55 : vector<32x512xf32>
    %57 = arith.truncf %56 : vector<32x512xf32> to vector<32x512xbf16>
    %c0_38 = arith.constant 0 : index
    %c3 = arith.constant 3 : index
    %c0_39 = arith.constant 0 : index
    %c0_40 = arith.constant 0 : index
    %58 = vector.load %arg3[%c0_38, %c3, %c0_39, %c0_40] : memref<1x4x512x512xbf16, #tpu.memory_space<vmem>>, vector<1x1x512x512xbf16>
    %59 = vector.shape_cast %58 : vector<1x1x512x512xbf16> to vector<512x512xbf16>
    %cst_41 = arith.constant dense<0.000000e+00> : vector<32x512xf32>
    %60 = tpu.matmul %57, %59, %cst_41 {dimension_numbers = #tpu.dot_dimension_numbers<[1], [0], [0], [1], [0, 0, 1, 1], [], []>} : vector<32x512xbf16>, vector<512x512xbf16>, vector<32x512xf32> -> vector<32x512xf32>
    %c0_42 = arith.constant 0 : index
    %c3_43 = arith.constant 3 : index
    %c0_44 = arith.constant 0 : index
    %c0_45 = arith.constant 0 : index
    %61 = vector.load %arg4[%c0_42, %c3_43, %c0_44, %c0_45] : memref<1x4x1x512xf32, #tpu.memory_space<vmem>>, vector<1x1x1x512xf32>
    %62 = vector.shape_cast %61 : vector<1x1x1x512xf32> to vector<1x512xf32>
    %63 = vector.broadcast %62 : vector<1x512xf32> to vector<32x512xf32>
    %64 = arith.addf %60, %63 : vector<32x512xf32>
    %c0_46 = arith.constant 0 : index
    %c0_47 = arith.constant 0 : index
    %65 = vector.load %arg2[%c0_46, %c0_47] : memref<32x512xf32, #tpu.memory_space<vmem>>, vector<32x512xf32>
    %66 = arith.mulf %65, %64 : vector<32x512xf32>
    %67 = arith.addf %1, %66 : vector<32x512xf32>
    %c0_48 = arith.constant 0 : index
    %c0_49 = arith.constant 0 : index
    %c0_50 = arith.constant 0 : index
    %68 = vector.load %arg5[%c0_48, %c0_49, %c0_50] : memref<1x32x512xf32, #tpu.memory_space<vmem>>, vector<1x32x512xf32>
    %69 = vector.shape_cast %68 : vector<1x32x512xf32> to vector<32x512xf32>
    %70 = vector.shape_cast %67 : vector<32x512xf32> to vector<1x32x512xf32>
    tpu.vector_store %arg5[%c0_48, %c0_49, %c0_50], %70 {strides = array<i32>} : memref<1x32x512xf32, #tpu.memory_space<vmem>>, vector<1x32x512xf32>,
    return
  }
  func.func @transform_0(%arg0: i32) -> (i32, i32, i32) {
    %c0_i32 = arith.constant 0 : i32
    %c0_i32_0 = arith.constant 0 : i32
    %c0_i32_1 = arith.constant 0 : i32
    return %arg0, %c0_i32, %c0_i32_0 : i32, i32, i32
  }
  func.func @transform_1(%arg0: i32) -> (i32, i32) {
    %c0_i32 = arith.constant 0 : i32
    %c0_i32_0 = arith.constant 0 : i32
    %c0_i32_1 = arith.constant 0 : i32
    return %c0_i32, %c0_i32_0 : i32, i32
  }
  func.func @transform_2(%arg0: i32) -> (i32, i32, i32, i32) {
    %c0_i32 = arith.constant 0 : i32
    %c0_i32_0 = arith.constant 0 : i32
    %c0_i32_1 = arith.constant 0 : i32
    %c0_i32_2 = arith.constant 0 : i32
    return %arg0, %c0_i32, %c0_i32_0, %c0_i32_1 : i32, i32, i32, i32
  }
  func.func @transform_3(%arg0: i32) -> (i32, i32, i32, i32) {
    %c0_i32 = arith.constant 0 : i32
    %c0_i32_0 = arith.constant 0 : i32
    %c0_i32_1 = arith.constant 0 : i32
    %c0_i32_2 = arith.constant 0 : i32
    return %arg0, %c0_i32, %c0_i32_0, %c0_i32_1 : i32, i32, i32, i32
  }
  func.func @transform_4(%arg0: i32) -> (i32, i32, i32) {
    %c0_i32 = arith.constant 0 : i32
    %c0_i32_0 = arith.constant 0 : i32
    %c0_i32_1 = arith.constant 0 : i32
    return %arg0, %c0_i32, %c0_i32_0 : i32, i32, i32
  }
}

</mosaic_0001>

<bundles_post_ra>
// kernel: levels_dynamic_lerper_forward.1
= control target key start
LH: loop header
LB: loop body
LE: loop exit
PB: predicated region body
PF: predicated region fallthrough
CT: control target
= control target key end

     0   :  { %s6447_s15 = smov 0   ;;  %s7307_s0 = inlined_call_operand.vmem [shape: f32[3,32,512], index: 0, kind: input, shape index: {}, may-alias: {0,4}]   ;;  %s7308_s1 = inlined_call_operand.vmem [shape: f32[32,512], index: 1, kind: input, shape index: {}]   ;;  %s7309_s2 = inlined_call_operand.vmem [shape: bf16[3,4,512,512], index: 2, kind: input, shape index: {}]   ;;  %s7310_s3 = inlined_call_operand.vmem [shape: f32[3,4,1,512], index: 3, kind: input, shape index: {}]   ;;  %s7311_s4 = inlined_call_operand.vmem [shape: f32[3,32,512], index: 4, kind: output, shape index: {}, may-alias: {0,4}]  }
   0x1 LB: > { %s4697_s16 = sadd.s32 4294967295, %s6420_s15   ;;  %p4701_p0 = scmp.ge.s32.totalorder %s6420_s15, 1  ;;  %s6420_s15 = sphi %s6447_s15, %s14_s15  }
   0x2   : > { %p181_p1 = scmp.lt.s32.totalorder %s6420_s15, 4 }
   0x4   : > { %p182_p2 = pnand %p4701_p0, %p181_p1 }
   0x5   : > { %p216_p3 = scmp.lt.s32.totalorder (!%p182_p2), %s4697_s16, 2 }
   0x6   : > { %185 = sbr.rel (%p182_p2) target bundleno = 1287 (0x507), region = 36 }
   0xb   : > { %s7313_s16 = smov (!%p216_p3, %s4697_s16), 2 }
   0xc   : > { %s5610_s17 = sshll.u32 %s7313_s16, 7  ;;  %s5611_s21 = sshll.u32 %s7313_s16, 12 }
   0xd   : > { %s6463_s20 = scalar_lea.vmem %s7307_s0, %s5610_s17  ;;  %s6478_s24 = scalar_lea.vmem %s7309_s2, %s5611_s21 }
   0xe   : > { %v235_v0 = vld [vmem:[%s6463_s20] sm:$0xff]  ;;  %v236_v1 = vld [vmem:[%s6463_s20 + $0x8] sm:$0xff]  ;;  %v237_v2 = vld [vmem:[%s6463_s20 + $0x10] sm:$0xff]  ;;  %s4706_s25 = sshll.u32 %s7313_s16, 4  ;;  %s7224_s9 = scalar_lea.vmem %s7311_s4, %s5610_s17 }
   0xf   : > { %v238_v3 = vld [vmem:[%s6463_s20 + $0x18] sm:$0xff]  ;;  %v251_v4 = vmul.f32 %v235_v0, %v235_v0  ;;  %v252_v5 = vmul.f32 %v236_v1, %v236_v1  ;;  %v253_v6 = vmul.f32 %v237_v2, %v237_v2  ;;  %v239_v7 = vld [vmem:[%s6463_s20 + $0x20] sm:$0xff]  ;;  %v240_v8 = vld [vmem:[%s6463_s20 + $0x28] sm:$0xff]  ;;  %s6772_s28 = scalar_lea.vmem %s7310_s3, %s4706_s25 }
  0x10   : > { %v241_v9 = vld [vmem:[%s6463_s20 + $0x30] sm:$0xff]  ;;  %v242_v10 = vld [vmem:[%s6463_s20 + $0x38] sm:$0xff]  ;;  %v255_v11 = vmul.f32 %v239_v7, %v239_v7  ;;  %v256_v12 = vmul.f32 %v240_v8, %v240_v8  ;;  %v243_v13 = vld [vmem:[%s6463_s20 + $0x40] sm:$0xff]  ;;  %v254_v14 = vmul.f32 %v238_v3, %v238_v3 }
  0x11   : > { %v267_v15 = vadd.f32 %v252_v5, %v251_v4  ;;  %v257_v16 = vmul.f32 %v241_v9, %v241_v9  ;;  %v244_v17 = vld [vmem:[%s6463_s20 + $0x48] sm:$0xff]  ;;  %v245_v18 = vld [vmem:[%s6463_s20 + $0x50] sm:$0xff]  ;;  %v246_v19 = vld [vmem:[%s6463_s20 + $0x58] sm:$0xff]  ;;  %v259_v20 = vmul.f32 %v243_v13, %v243_v13  ;;  %v258_v21 = vmul.f32 %v242_v10, %v242_v10 }
  0x12   : > { %v272_v22 = vadd.f32 %v256_v12, %v255_v11  ;;  %v260_v23 = vmul.f32 %v244_v17, %v244_v17  ;;  %v261_v24 = vmul.f32 %v245_v18, %v245_v18  ;;  %v247_v25 = vld [vmem:[%s6463_s20 + $0x60] sm:$0xff]  ;;  %v248_v26 = vld [vmem:[%s6463_s20 + $0x68] sm:$0xff]  ;;  %v249_v27 = vld [vmem:[%s6463_s20 + $0x70] sm:$0xff]  ;;  %v262_v34 = vmul.f32 %v246_v19, %v246_v19 }
  0x13   : > { %v268_v28 = vadd.f32 %v267_v15, %v253_v6  ;;  %v250_v29 = vld [vmem:[%s6463_s20 + $0x78] sm:$0xff]  ;;  %v263_v30 = vmul.f32 %v247_v25, %v247_v25  ;;  %v264_v31 = vmul.f32 %v248_v26, %v248_v26  ;;  %v265_v32 = vmul.f32 %v249_v27, %v249_v27  ;;  %v5621_v36 = vld [vmem:[%s6478_s24 + $0xe4] ss:$16 sps:$4 sm:$0xff]   ;;  %v5625_v40 = vld [vmem:[%s6478_s24 + $0xe0] ss:$16 sps:$4 sm:$0xff]  }
  0x14   : > { %v273_v33 = vadd.f32 %v272_v22, %v257_v16  ;;  %v277_v35 = vadd.f32 %v260_v23, %v259_v20  ;;  %v5623_v39 = vld [vmem:[%s6478_s24 + $0x2e4] ss:$16 sps:$4 sm:$0xff]   ;;  %v5626_v41 = vld [vmem:[%s6478_s24 + $0x2e0] ss:$16 sps:$4 sm:$0xff]   ;;  %v266_v43 = vmul.f32 %v250_v29, %v250_v29  ;;  %1114 = vmatprep.subr.bf16.mxu0 %v5621_v36 }
  0x15   : > { %v269_v37 = vadd.f32 %v268_v28, %v254_v14  ;;  %v282_v38 = vadd.f32 %v264_v31, %v263_v30  ;;  %v5627_v44 = vld [vmem:[%s6478_s24 + $0xc4] ss:$16 sps:$4 sm:$0xff]   ;;  %1167 = vmatprep.subr.bf16.mxu1 %v5623_v39  ;;  %1115 = vmatpush1.bf16.msra.mxu0 %v5625_v40  ;;  %v5631_v49 = vld [vmem:[%s6478_s24 + $0xc0] ss:$16 sps:$4 sm:$0xff]  }
  0x16   : > { %v278_v42 = vadd.f32 %v277_v35, %v261_v24  ;;  %v274_v45 = vadd.f32 %v273_v33, %v258_v21  ;;  %v5629_v47 = vld [vmem:[%s6478_s24 + $0x2c4] ss:$16 sps:$4 sm:$0xff]   ;;  %1168 = vmatpush1.bf16.msra.mxu1 %v5626_v41  ;;  %v5632_v50 = vld [vmem:[%s6478_s24 + $0x2c0] ss:$16 sps:$4 sm:$0xff]   ;;  %1116 = vmatprep.subr.bf16.mxu0 %v5627_v44  ;;  %v5719_v44 = vld [vmem:[%s6478_s24 + $0xec] ss:$16 sps:$4 sm:$0xff]  }
  0x17   : > { %270 = vadd.xlane.f32.xlu0 %v269_v37  ;;  %v283_v46 = vadd.f32 %v282_v38, %v265_v32  ;;  %1169 = vmatprep.subr.bf16.mxu1 %v5629_v47  ;;  %v5633_v51 = vld [vmem:[%s6478_s24 + $0xa4] ss:$16 sps:$4 sm:$0xff]   ;;  %v5637_v54 = vld [vmem:[%s6478_s24 + $0xa0] ss:$16 sps:$4 sm:$0xff]  }
  0x18   : > { %v279_v48 = vadd.f32 %v278_v42, %v262_v34  ;;  %v5635_v53 = vld [vmem:[%s6478_s24 + $0x2a4] ss:$16 sps:$4 sm:$0xff]   ;;  %v5638_v55 = vld [vmem:[%s6478_s24 + $0x2a0] ss:$16 sps:$4 sm:$0xff]  }
  0x19   : > { %v284_v52 = vadd.f32 %v283_v46, %v266_v43  ;;  %1117 = vmatpush1.bf16.msra.mxu0 %v5631_v49  ;;  %v5639_v56 = vld [vmem:[%s6478_s24 + $0x84] ss:$16 sps:$4 sm:$0xff]   ;;  %v5643_v58 = vld [vmem:[%s6478_s24 + $0x80] ss:$16 sps:$4 sm:$0xff]  }
  0x1a   : > { %280 = vadd.xlane.f32.xlu1 %v279_v48  ;;  %1170 = vmatpush1.bf16.msra.mxu1 %v5632_v50  ;;  %v5641_v57 = vld [vmem:[%s6478_s24 + $0x284] ss:$16 sps:$4 sm:$0xff]   ;;  %v5644_v59 = vld [vmem:[%s6478_s24 + $0x280] ss:$16 sps:$4 sm:$0xff]  }
  0x1b   : > { %275 = vadd.xlane.f32.xlu0 %v274_v45  ;;  %1118 = vmatprep.subr.bf16.mxu0 %v5633_v51  ;;  %v5645_v60 = vld [vmem:[%s6478_s24 + $0x64] ss:$16 sps:$4 sm:$0xff]   ;;  %v5649_v62 = vld [vmem:[%s6478_s24 + $0x60] ss:$16 sps:$4 sm:$0xff]   ;;  %v5722_v45 = vld [vmem:[%s6478_s24 + $0x2ec] ss:$16 sps:$4 sm:$0xff]  }
  0x1c   : > { %1171 = vmatprep.subr.bf16.mxu1 %v5635_v53  ;;  %v5647_v61 = vld [vmem:[%s6478_s24 + $0x264] ss:$16 sps:$4 sm:$0xff]   ;;  %v5650_v63 = vld [vmem:[%s6478_s24 + $0x260] ss:$16 sps:$4 sm:$0xff]  }
  0x1d   : > { %1119 = vmatpush1.bf16.msra.mxu0 %v5637_v54  ;;  %v5651_v0 = vld [vmem:[%s6478_s24 + $0x44] ss:$16 sps:$4 sm:$0xff]   ;;  %v5655_v2 = vld [vmem:[%s6478_s24 + $0x40] ss:$16 sps:$4 sm:$0xff]  }
  0x1e   : > { %285 = vadd.xlane.f32.xlu1 %v284_v52  ;;  %1172 = vmatpush1.bf16.msra.mxu1 %v5638_v55  ;;  %v5653_v1 = vld [vmem:[%s6478_s24 + $0x244] ss:$16 sps:$4 sm:$0xff]   ;;  %v5656_v3 = vld [vmem:[%s6478_s24 + $0x240] ss:$16 sps:$4 sm:$0xff]  }
  0x1f   : > { %1120 = vmatprep.subr.bf16.mxu0 %v5639_v56  ;;  %1173 = vmatprep.subr.bf16.mxu1 %v5641_v57  ;;  %v5657_v4 = vld [vmem:[%s6478_s24 + $0x24] ss:$16 sps:$4 sm:$0xff]   ;;  %v5661_v6 = vld [vmem:[%s6478_s24 + $0x20] ss:$16 sps:$4 sm:$0xff]  }
  0x20   : > { %v5659_v5 = vld [vmem:[%s6478_s24 + $0x224] ss:$16 sps:$4 sm:$0xff]   ;;  %v5662_v7 = vld [vmem:[%s6478_s24 + $0x220] ss:$16 sps:$4 sm:$0xff]  }
  0x21   : > { %1121 = vmatpush1.bf16.msra.mxu0 %v5643_v58  ;;  %v5663_v8 = vld [vmem:[%s6478_s24 + $0x4] ss:$16 sps:$4 sm:$0xff]   ;;  %v5667_v10 = vld [vmem:[%s6478_s24] ss:$16 sps:$4 sm:$0xff]  }
  0x22   : > { %1174 = vmatpush1.bf16.msra.mxu1 %v5644_v59  ;;  %1122 = vmatprep.subr.bf16.mxu0 %v5645_v60  ;;  %v5665_v9 = vld [vmem:[%s6478_s24 + $0x204] ss:$16 sps:$4 sm:$0xff]   ;;  %v5668_v11 = vld [vmem:[%s6478_s24 + $0x200] ss:$16 sps:$4 sm:$0xff]  }
  0x23   : > { %1175 = vmatprep.subr.bf16.mxu1 %v5647_v61  ;;  %v5669_v12 = vld [vmem:[%s6478_s24 + $0x1e4] ss:$16 sps:$4 sm:$0xff]   ;;  %v5673_v14 = vld [vmem:[%s6478_s24 + $0x1e0] ss:$16 sps:$4 sm:$0xff]   ;;  %v6554_v61 = vld [vmem:[%s6463_s20 + $0x8] sm:$0xff] }
  0x24   : > { %v5671_v13 = vld [vmem:[%s6478_s24 + $0x3e4] ss:$16 sps:$4 sm:$0xff]   ;;  %v5674_v15 = vld [vmem:[%s6478_s24 + $0x3e0] ss:$16 sps:$4 sm:$0xff]  }
  0x25   : > { %1123 = vmatpush1.bf16.msra.mxu0 %v5649_v62  ;;  %v5675_v16 = vld [vmem:[%s6478_s24 + $0x1c4] ss:$16 sps:$4 sm:$0xff]   ;;  %v5679_v18 = vld [vmem:[%s6478_s24 + $0x1c0] ss:$16 sps:$4 sm:$0xff]  }
  0x26   : > { %1176 = vmatpush1.bf16.msra.mxu1 %v5650_v63  ;;  %1124 = vmatprep.subr.bf16.mxu0 %v5651_v0  ;;  %v5677_v17 = vld [vmem:[%s6478_s24 + $0x3c4] ss:$16 sps:$4 sm:$0xff]   ;;  %v5680_v19 = vld [vmem:[%s6478_s24 + $0x3c0] ss:$16 sps:$4 sm:$0xff]   ;;  %v6558_v63 = vld [vmem:[%s6463_s20 + $0x18] sm:$0xff] }
  0x27   : > { %1177 = vmatprep.subr.bf16.mxu1 %v5653_v1  ;;  %v5681_v20 = vld [vmem:[%s6478_s24 + $0x1a4] ss:$16 sps:$4 sm:$0xff]   ;;  %v5685_v22 = vld [vmem:[%s6478_s24 + $0x1a0] ss:$16 sps:$4 sm:$0xff]  }
  0x28   : > { %v5683_v21 = vld [vmem:[%s6478_s24 + $0x3a4] ss:$16 sps:$4 sm:$0xff]   ;;  %v5686_v23 = vld [vmem:[%s6478_s24 + $0x3a0] ss:$16 sps:$4 sm:$0xff]  }
  0x29   : > { %1125 = vmatpush1.bf16.msra.mxu0 %v5655_v2  ;;  %v5687_v24 = vld [vmem:[%s6478_s24 + $0x184] ss:$16 sps:$4 sm:$0xff]   ;;  %v5691_v26 = vld [vmem:[%s6478_s24 + $0x180] ss:$16 sps:$4 sm:$0xff]  }
  0x2a   : > { %1178 = vmatpush1.bf16.msra.mxu1 %v5656_v3  ;;  %1126 = vmatprep.subr.bf16.mxu0 %v5657_v4  ;;  %v5689_v25 = vld [vmem:[%s6478_s24 + $0x384] ss:$16 sps:$4 sm:$0xff]   ;;  %v5692_v27 = vld [vmem:[%s6478_s24 + $0x380] ss:$16 sps:$4 sm:$0xff]  }
  0x2b   : > { %1179 = vmatprep.subr.bf16.mxu1 %v5659_v5  ;;  %v5693_v28 = vld [vmem:[%s6478_s24 + $0x164] ss:$16 sps:$4 sm:$0xff]   ;;  %v5697_v30 = vld [vmem:[%s6478_s24 + $0x160] ss:$16 sps:$4 sm:$0xff]   ;;  %v6567_v5 = vld [vmem:[%s6463_s20 + $0x28] sm:$0xff] }
  0x2c   : > { %v5695_v29 = vld [vmem:[%s6478_s24 + $0x364] ss:$16 sps:$4 sm:$0xff]   ;;  %v5698_v31 = vld [vmem:[%s6478_s24 + $0x360] ss:$16 sps:$4 sm:$0xff]  }
  0x2d   : > { %1127 = vmatpush1.bf16.msra.mxu0 %v5661_v6  ;;  %v5699_v32 = vld [vmem:[%s6478_s24 + $0x144] ss:$16 sps:$4 sm:$0xff]   ;;  %v5703_v34 = vld [vmem:[%s6478_s24 + $0x140] ss:$16 sps:$4 sm:$0xff]  }
  0x2e   : > { %1180 = vmatpush1.bf16.msra.mxu1 %v5662_v7  ;;  %1128 = vmatprep.subr.bf16.mxu0 %v5663_v8  ;;  %v5701_v33 = vld [vmem:[%s6478_s24 + $0x344] ss:$16 sps:$4 sm:$0xff]   ;;  %v5704_v35 = vld [vmem:[%s6478_s24 + $0x340] ss:$16 sps:$4 sm:$0xff]   ;;  %v6571_v7 = vld [vmem:[%s6463_s20 + $0x38] sm:$0xff] }
  0x2f   : > { %1181 = vmatprep.subr.bf16.mxu1 %v5665_v9  ;;  %v5705_v36 = vld [vmem:[%s6478_s24 + $0x124] ss:$16 sps:$4 sm:$0xff]   ;;  %v5709_v38 = vld [vmem:[%s6478_s24 + $0x120] ss:$16 sps:$4 sm:$0xff]   ;;  %v5717_v9 = vld [vmem:[%s6478_s24 + $0xe8] ss:$16 sps:$4 sm:$0xff]  }
  0x30   : > { %v5707_v37 = vld [vmem:[%s6478_s24 + $0x324] ss:$16 sps:$4 sm:$0xff]   ;;  %v5710_v39 = vld [vmem:[%s6478_s24 + $0x320] ss:$16 sps:$4 sm:$0xff]  }
  0x31   : > { %1129 = vmatpush1.bf16.msra.mxu0 %v5667_v10  ;;  %v5711_v40 = vld [vmem:[%s6478_s24 + $0x104] ss:$16 sps:$4 sm:$0xff]   ;;  %v5715_v42 = vld [vmem:[%s6478_s24 + $0x100] ss:$16 sps:$4 sm:$0xff]   ;;  %v5720_v10 = vld [vmem:[%s6478_s24 + $0x2e8] ss:$16 sps:$4 sm:$0xff]  }
  0x32   : > { %1182 = vmatpush1.bf16.msra.mxu1 %v5668_v11  ;;  %1130 = vmatprep.subr.bf16.mxu0 %v5669_v12  ;;  %v5713_v41 = vld [vmem:[%s6478_s24 + $0x304] ss:$16 sps:$4 sm:$0xff]   ;;  %v5716_v43 = vld [vmem:[%s6478_s24 + $0x300] ss:$16 sps:$4 sm:$0xff]  }
  0x33   : > { %1183 = vmatprep.subr.bf16.mxu1 %v5671_v13  ;;  %v6399_v1 = vld [vmem:[%s6463_s20] sm:$0xff]  ;;  %v6563_v3 = vld [vmem:[%s6463_s20 + $0x10] sm:$0xff] }
  0x34   : > { %v6577_v11 = vld [vmem:[%s6463_s20 + $0x20] sm:$0xff]  ;;  %v6581_v13 = vld [vmem:[%s6463_s20 + $0x30] sm:$0xff] }
  0x35   : > { %1131 = vmatpush2.bf16.msra.mxu0 %v5673_v14 }
  0x36   : > { %1184 = vmatpush2.bf16.msra.mxu1 %v5674_v15  ;;  %1132 = vmatprep.subr.bf16.mxu0 %v5675_v16  ;;  %v5725_v15 = vld [vmem:[%s6478_s24 + $0xcc] ss:$16 sps:$4 sm:$0xff]  }
  0x37   : > { %1185 = vmatprep.subr.bf16.mxu1 %v5677_v17  ;;  %v5728_v16 = vld [vmem:[%s6478_s24 + $0x2cc] ss:$16 sps:$4 sm:$0xff]  }
  0x38   : > { %v6587_v17 = vld [vmem:[%s6463_s20 + $0x48] sm:$0xff] }
  0x39   : > { %1133 = vmatpush2.bf16.msra.mxu0 %v5679_v18 }
  0x3a   : > { %1186 = vmatpush2.bf16.msra.mxu1 %v5680_v19  ;;  %1134 = vmatprep.subr.bf16.mxu0 %v5681_v20  ;;  %v6591_v19 = vld [vmem:[%s6463_s20 + $0x58] sm:$0xff] }
  0x3b   : > { %1187 = vmatprep.subr.bf16.mxu1 %v5683_v21 }
  0x3d   : > { %1135 = vmatpush2.bf16.msra.mxu0 %v5685_v22 }
  0x3e   : > { %1188 = vmatpush2.bf16.msra.mxu1 %v5686_v23  ;;  %1136 = vmatprep.subr.bf16.mxu0 %v5687_v24 }
  0x3f   : > { %1189 = vmatprep.subr.bf16.mxu1 %v5689_v25 }
  0x41   : > { %1137 = vmatpush2.bf16.msra.mxu0 %v5691_v26  ;;  %v6599_v26 = vld [vmem:[%s6463_s20 + $0x68] sm:$0xff] }
  0x42   : > { %1190 = vmatpush2.bf16.msra.mxu1 %v5692_v27  ;;  %1138 = vmatprep.subr.bf16.mxu0 %v5693_v28  ;;  %v6603_v28 = vld [vmem:[%s6463_s20 + $0x78] sm:$0xff] }
  0x43   : > { %1191 = vmatprep.subr.bf16.mxu1 %v5695_v29 }
  0x45   : > { %1139 = vmatpush2.bf16.msra.mxu0 %v5697_v30  ;;  %v5723_v30 = vld [vmem:[%s6478_s24 + $0xc8] ss:$16 sps:$4 sm:$0xff]  }
  0x46   : > { %1192 = vmatpush2.bf16.msra.mxu1 %v5698_v31  ;;  %1140 = vmatprep.subr.bf16.mxu0 %v5699_v32  ;;  %v5726_v31 = vld [vmem:[%s6478_s24 + $0x2c8] ss:$16 sps:$4 sm:$0xff]   ;;  %v6609_v32 = vld [vmem:[%s6463_s20 + $0x40] sm:$0xff] }
  0x47   : > { %1193 = vmatprep.subr.bf16.mxu1 %v5701_v33 }
  0x49   : > { %1141 = vmatpush2.bf16.msra.mxu0 %v5703_v34  ;;  %v6613_v34 = vld [vmem:[%s6463_s20 + $0x60] sm:$0xff] }
  0x4a   : > { %1194 = vmatpush2.bf16.msra.mxu1 %v5704_v35  ;;  %1142 = vmatprep.subr.bf16.mxu0 %v5705_v36  ;;  %v6617_v36 = vld [vmem:[%s6463_s20 + $0x50] sm:$0xff] }
  0x4b   : > { %1195 = vmatprep.subr.bf16.mxu1 %v5707_v37 }
  0x4d   : > { %1143 = vmatpush2.bf16.msra.mxu0 %v5709_v38 }
  0x4e   : > { %1196 = vmatpush2.bf16.msra.mxu1 %v5710_v39  ;;  %1144 = vmatprep.subr.bf16.mxu0 %v5711_v40  ;;  %v5731_v40 = vld [vmem:[%s6478_s24 + $0xac] ss:$16 sps:$4 sm:$0xff]  }
  0x4f   : > { %1197 = vmatprep.subr.bf16.mxu1 %v5713_v41  ;;  %v5734_v41 = vld [vmem:[%s6478_s24 + $0x2ac] ss:$16 sps:$4 sm:$0xff]  }
  0x51   : > { %1145 = vmatpush2.bf16.msra.mxu0 %v5715_v42  ;;  %v6629_v42 = vld [vmem:[%s6463_s20 + $0x70] sm:$0xff] }
  0x52   : > { %1198 = vmatpush2.bf16.msra.mxu1 %v5716_v43  ;;  %1220 = vmatprep.subr.bf16.mxu0 %v5719_v44  ;;  %v5729_v44 = vld [vmem:[%s6478_s24 + $0xa8] ss:$16 sps:$4 sm:$0xff]  }
  0x53   : > { %1273 = vmatprep.subr.bf16.mxu1 %v5722_v45  ;;  %v5732_v45 = vld [vmem:[%s6478_s24 + $0x2a8] ss:$16 sps:$4 sm:$0xff]  }
  0xa0   : > { %v271_v46 = vpop.xlane.xlu0 %270 }
  0xa1   : > { %v288_v47 = vmul.f32 0.001953125, %v271_v46 }
  0xa3   : > { %v292_v48 = vadd.f32 1e-08, %v288_v47  ;;  %v281_v49 = vpop.xlane.xlu1 %280 }
  0xa4   : > { %v276_v50 = vpop.xlane.xlu0 %275  ;;  %v290_v51 = vmul.f32 0.001953125, %v281_v49  ;;  %v5740_v49 = vld [vmem:[%s6478_s24 + $0x28c] ss:$16 sps:$4 sm:$0xff]  }
  0xa5   : > { %v289_v52 = vmul.f32 0.001953125, %v276_v50  ;;  %6389 = vrsqrt.f32 %v292_v48  ;;  %v5737_v48 = vld [vmem:[%s6478_s24 + $0x8c] ss:$16 sps:$4 sm:$0xff]   ;;  %v5735_v50 = vld [vmem:[%s6478_s24 + $0x88] ss:$16 sps:$4 sm:$0xff]  }
  0xa6   : > { %v294_v53 = vadd.f32 1e-08, %v290_v51  ;;  %v5738_v51 = vld [vmem:[%s6478_s24 + $0x288] ss:$16 sps:$4 sm:$0xff]  }
  0xa7   : > { %v293_v54 = vadd.f32 1e-08, %v289_v52  ;;  %v286_v55 = vpop.xlane.xlu1 %285  ;;  %v5743_v52 = vld [vmem:[%s6478_s24 + $0x6c] ss:$16 sps:$4 sm:$0xff]  }
  0xa8   : > { %6391 = vrsqrt.f32 %v294_v53  ;;  %v291_v56 = vmul.f32 0.001953125, %v286_v55  ;;  %v5746_v53 = vld [vmem:[%s6478_s24 + $0x26c] ss:$16 sps:$4 sm:$0xff]   ;;  %v5744_v55 = vld [vmem:[%s6478_s24 + $0x268] ss:$16 sps:$4 sm:$0xff]  }
  0xa9   : > { %6393 = vrsqrt.f32 %v293_v54  ;;  %v5741_v54 = vld [vmem:[%s6478_s24 + $0x68] ss:$16 sps:$4 sm:$0xff]  }
  0xaa   : > { %v295_v57 = vadd.f32 1e-08, %v291_v56  ;;  %v5749_v56 = vld [vmem:[%s6478_s24 + $0x4c] ss:$16 sps:$4 sm:$0xff]  }
  0xac   : > { %6395 = vrsqrt.f32 %v295_v57  ;;  %v5752_v57 = vld [vmem:[%s6478_s24 + $0x24c] ss:$16 sps:$4 sm:$0xff]  }
  0xb2   : > { %v6390_v58 = vpop.eup %6389 }
  0xb3   : > { %v301_v62 = vmul.f32 %v6554_v61, %v6390_v58  ;;  %v303_v0 = vmul.f32 %v6558_v63, %v6390_v58  ;;  %v300_v2 = vmul.f32 %v6399_v1, %v6390_v58  ;;  %v302_v4 = vmul.f32 %v6563_v3, %v6390_v58  ;;  %v5747_v58 = vld [vmem:[%s6478_s24 + $0x48] ss:$16 sps:$4 sm:$0xff]  }
  0xb4   : > { %v5756_v1 = vld [vmem:[%s6478_s24 + $0x228] ss:$16 sps:$4 sm:$0xff]  }
  0xb5   : > { %v6392_v59 = vpop.eup %6391 }
  0xb6   : > { %v6394_v60 = vpop.eup %6393  ;;  %v309_v18 = vmul.f32 %v6587_v17, %v6392_v59  ;;  %v311_v20 = vmul.f32 %v6591_v19, %v6392_v59  ;;  %v308_v33 = vmul.f32 %v6609_v32, %v6392_v59  ;;  %v310_v37 = vmul.f32 %v6617_v36, %v6392_v59  ;;  %v5750_v59 = vld [vmem:[%s6478_s24 + $0x248] ss:$16 sps:$4 sm:$0xff]  }
  0xb7   : > { %v305_v6 = vmul.f32 %v6567_v5, %v6394_v60  ;;  %v307_v8 = vmul.f32 %v6571_v7, %v6394_v60  ;;  %v304_v12 = vmul.f32 %v6577_v11, %v6394_v60  ;;  %v306_v14 = vmul.f32 %v6581_v13, %v6394_v60  ;;  %v5755_v60 = vld [vmem:[%s6478_s24 + $0x2c] ss:$16 sps:$4 sm:$0xff]  }
  0xb9   : > { %v6396_v21 = vpop.eup %6395  ;;  %v317_v22 = vpack.c.bf16 %v305_v6, %v301_v62  ;;  %v319_v23 = vpack.c.bf16 %v307_v8, %v303_v0  ;;  %v6594_v24 = vpack.c.bf16 %v304_v12, %v300_v2  ;;  %v6596_v25 = vpack.c.bf16 %v306_v14, %v302_v4  ;;  %v5758_v62 = vld [vmem:[%s6478_s24 + $0x22c] ss:$16 sps:$4 sm:$0xff]   ;;  %v5753_v0 = vld [vmem:[%s6478_s24 + $0x28] ss:$16 sps:$4 sm:$0xff]  }
  0xba   : > { %v313_v27 = vmul.f32 %v6599_v26, %v6396_v21  ;;  %v315_v29 = vmul.f32 %v6603_v28, %v6396_v21  ;;  %v312_v35 = vmul.f32 %v6613_v34, %v6396_v21  ;;  %v314_v43 = vmul.f32 %v6629_v42, %v6396_v21  ;;  %v5761_v2 = vld [vmem:[%s6478_s24 + $0xc] ss:$16 sps:$4 sm:$0xff]   ;;  %v5759_v6 = vld [vmem:[%s6478_s24 + $0x8] ss:$16 sps:$4 sm:$0xff]  }
  0xbb   : > { %1146 = vmatprep.mubr.bf16.mxu0 %v317_v22  ;;  %1199 = vmatprep.mubr.bf16.mxu1 %v319_v23  ;;  %v5764_v4 = vld [vmem:[%s6478_s24 + $0x20c] ss:$16 sps:$4 sm:$0xff]   ;;  %v5762_v8 = vld [vmem:[%s6478_s24 + $0x208] ss:$16 sps:$4 sm:$0xff]  }
  0xbc   : > { %1147 = vmatmul.mubr.bf16.vlgmr.msra.gmra.mxu0 %v6594_v24  ;;  %1200 = vmatmul.mubr.bf16.vlgmr.msra.gmra.mxu1 %v6596_v25  ;;  %v6622_v38 = vpack.c.bf16 %v313_v27, %v309_v18  ;;  %v6624_v39 = vpack.c.bf16 %v315_v29, %v311_v20  ;;  %v6636_v46 = vpack.c.bf16 %v312_v35, %v308_v33  ;;  %v5765_v12 = vld [vmem:[%s6478_s24 + $0x1e8] ss:$16 sps:$4 sm:$0xff]   ;;  %v5779_v21 = vld [vmem:[%s6478_s24 + $0x1ac] ss:$16 sps:$4 sm:$0xff]  }
  0xbd   : > { %1221 = vmatpush1.bf16.msra.mxu0 %v5717_v9  ;;  %1274 = vmatpush1.bf16.msra.mxu1 %v5720_v10  ;;  %v6638_v47 = vpack.c.bf16 %v314_v43, %v310_v37  ;;  %v5767_v9 = vld [vmem:[%s6478_s24 + $0x1ec] ss:$16 sps:$4 sm:$0xff]   ;;  %v5768_v14 = vld [vmem:[%s6478_s24 + $0x3e8] ss:$16 sps:$4 sm:$0xff]  }
  0xbe   : > { %1222 = vmatprep.subr.bf16.mxu0 %v5725_v15  ;;  %1275 = vmatprep.subr.bf16.mxu1 %v5728_v16  ;;  %v5770_v10 = vld [vmem:[%s6478_s24 + $0x3ec] ss:$16 sps:$4 sm:$0xff]   ;;  %v5771_v18 = vld [vmem:[%s6478_s24 + $0x1c8] ss:$16 sps:$4 sm:$0xff]  }
  0xbf   : > { %1156 = vmatprep.mubr.bf16.mxu0 %v6622_v38  ;;  %1209 = vmatprep.mubr.bf16.mxu1 %v6624_v39  ;;  %v5773_v15 = vld [vmem:[%s6478_s24 + $0x1cc] ss:$16 sps:$4 sm:$0xff]   ;;  %v5774_v20 = vld [vmem:[%s6478_s24 + $0x3c8] ss:$16 sps:$4 sm:$0xff]  }
  0xc0   : > { %v5776_v16 = vld [vmem:[%s6478_s24 + $0x3cc] ss:$16 sps:$4 sm:$0xff]   ;;  %v5780_v27 = vld [vmem:[%s6478_s24 + $0x3a8] ss:$16 sps:$4 sm:$0xff]  }
  0xc1   : > { %1223 = vmatpush1.bf16.msra.mxu0 %v5723_v30  ;;  %1276 = vmatpush1.bf16.msra.mxu1 %v5726_v31  ;;  %v5785_v29 = vld [vmem:[%s6478_s24 + $0x18c] ss:$16 sps:$4 sm:$0xff]   ;;  %v5783_v31 = vld [vmem:[%s6478_s24 + $0x188] ss:$16 sps:$4 sm:$0xff]  }
  0xc2   : > { %1224 = vmatprep.subr.bf16.mxu0 %v5731_v40  ;;  %1277 = vmatprep.subr.bf16.mxu1 %v5734_v41  ;;  %v5788_v30 = vld [vmem:[%s6478_s24 + $0x38c] ss:$16 sps:$4 sm:$0xff]   ;;  %v5786_v33 = vld [vmem:[%s6478_s24 + $0x388] ss:$16 sps:$4 sm:$0xff]  }
  0xc3   : > { %v5791_v35 = vld [vmem:[%s6478_s24 + $0x16c] ss:$16 sps:$4 sm:$0xff]   ;;  %v5789_v40 = vld [vmem:[%s6478_s24 + $0x168] ss:$16 sps:$4 sm:$0xff]  }
  0xc4   : > { %1157 = vmatmul.mubr.bf16.gmra.mxu0 %v6636_v46  ;;  %1210 = vmatmul.mubr.bf16.gmra.mxu1 %v6638_v47  ;;  %v5794_v37 = vld [vmem:[%s6478_s24 + $0x36c] ss:$16 sps:$4 sm:$0xff]   ;;  %v5792_v41 = vld [vmem:[%s6478_s24 + $0x368] ss:$16 sps:$4 sm:$0xff]  }
  0xc5   : > { %1225 = vmatpush1.bf16.msra.mxu0 %v5729_v44  ;;  %1278 = vmatpush1.bf16.msra.mxu1 %v5732_v45  ;;  %v5797_v43 = vld [vmem:[%s6478_s24 + $0x14c] ss:$16 sps:$4 sm:$0xff]   ;;  %v5795_v45 = vld [vmem:[%s6478_s24 + $0x148] ss:$16 sps:$4 sm:$0xff]  }
  0xc6   : > { %1252 = vmatprep.mubr.bf16.mxu0 %v317_v22  ;;  %1305 = vmatprep.mubr.bf16.mxu1 %v319_v23  ;;  %v5782_v22 = vld [vmem:[%s6478_s24 + $0x3ac] ss:$16 sps:$4 sm:$0xff]   ;;  %v5777_v23 = vld [vmem:[%s6478_s24 + $0x1a8] ss:$16 sps:$4 sm:$0xff]  }
  0xc7   : > { %1226 = vmatprep.subr.bf16.mxu0 %v5737_v48  ;;  %1279 = vmatprep.subr.bf16.mxu1 %v5740_v49  ;;  %v5800_v44 = vld [vmem:[%s6478_s24 + $0x34c] ss:$16 sps:$4 sm:$0xff]   ;;  %v5798_v48 = vld [vmem:[%s6478_s24 + $0x348] ss:$16 sps:$4 sm:$0xff]  }
  0xc8   : > { %v5803_v49 = vld [vmem:[%s6478_s24 + $0x12c] ss:$16 sps:$4 sm:$0xff]  }
  0xc9   : > { %1227 = vmatpush1.bf16.msra.mxu0 %v5735_v50  ;;  %1280 = vmatpush1.bf16.msra.mxu1 %v5738_v51  ;;  %v5806_v50 = vld [vmem:[%s6478_s24 + $0x32c] ss:$16 sps:$4 sm:$0xff]   ;;  %v5801_v51 = vld [vmem:[%s6478_s24 + $0x128] ss:$16 sps:$4 sm:$0xff]  }
  0xca   : > { %1228 = vmatprep.subr.bf16.mxu0 %v5743_v52  ;;  %1281 = vmatprep.subr.bf16.mxu1 %v5746_v53  ;;  %v5804_v52 = vld [vmem:[%s6478_s24 + $0x328] ss:$16 sps:$4 sm:$0xff]   ;;  %v5809_v53 = vld [vmem:[%s6478_s24 + $0x10c] ss:$16 sps:$4 sm:$0xff]  }
  0xcd   : > { %1229 = vmatpush1.bf16.msra.mxu0 %v5741_v54  ;;  %1282 = vmatpush1.bf16.msra.mxu1 %v5744_v55  ;;  %v5812_v54 = vld [vmem:[%s6478_s24 + $0x30c] ss:$16 sps:$4 sm:$0xff]   ;;  %v5807_v55 = vld [vmem:[%s6478_s24 + $0x108] ss:$16 sps:$4 sm:$0xff]  }
  0xce   : > { %1230 = vmatprep.subr.bf16.mxu0 %v5749_v56  ;;  %1283 = vmatprep.subr.bf16.mxu1 %v5752_v57  ;;  %v5810_v56 = vld [vmem:[%s6478_s24 + $0x308] ss:$16 sps:$4 sm:$0xff]   ;;  %v5815_v57 = vld [vmem:[%s6478_s24 + $0x4e4] ss:$16 sps:$4 sm:$0xff]  }
  0xd1   : > { %1231 = vmatpush1.bf16.msra.mxu0 %v5747_v58  ;;  %1284 = vmatpush1.bf16.msra.mxu1 %v5750_v59  ;;  %v5813_v58 = vld [vmem:[%s6478_s24 + $0x4e0] ss:$16 sps:$4 sm:$0xff]   ;;  %v5818_v59 = vld [vmem:[%s6478_s24 + $0x4c4] ss:$16 sps:$4 sm:$0xff]  }
  0xd2   : > { %1232 = vmatprep.subr.bf16.mxu0 %v5755_v60  ;;  %1285 = vmatprep.subr.bf16.mxu1 %v5758_v62  ;;  %v5816_v60 = vld [vmem:[%s6478_s24 + $0x4c0] ss:$16 sps:$4 sm:$0xff]   ;;  %v5821_v62 = vld [vmem:[%s6478_s24 + $0x4a4] ss:$16 sps:$4 sm:$0xff]  }
  0xd5   : > { %1233 = vmatpush1.bf16.msra.mxu0 %v5753_v0  ;;  %1286 = vmatpush1.bf16.msra.mxu1 %v5756_v1  ;;  %v5819_v0 = vld [vmem:[%s6478_s24 + $0x4a0] ss:$16 sps:$4 sm:$0xff]   ;;  %v5830_v1 = vld [vmem:[%s6478_s24 + $0x444] ss:$16 sps:$4 sm:$0xff]  }
  0xd6   : > { %1234 = vmatprep.subr.bf16.mxu0 %v5761_v2  ;;  %1287 = vmatprep.subr.bf16.mxu1 %v5764_v4  ;;  %v5863_v2 = vld [vmem:[%s6478_s24 + $0x6e4] ss:$16 sps:$4 sm:$0xff]   ;;  %v5861_v4 = vld [vmem:[%s6478_s24 + $0x6e0] ss:$16 sps:$4 sm:$0xff]  }
  0xd9   : > { %1235 = vmatpush1.bf16.msra.mxu0 %v5759_v6  ;;  %1288 = vmatpush1.bf16.msra.mxu1 %v5762_v8  ;;  %v5869_v6 = vld [vmem:[%s6478_s24 + $0x6c4] ss:$16 sps:$4 sm:$0xff]   ;;  %v5831_v8 = vld [vmem:[%s6478_s24 + $0x420] ss:$16 sps:$4 sm:$0xff]  }
  0xda   : > { %1236 = vmatprep.subr.bf16.mxu0 %v5767_v9  ;;  %1289 = vmatprep.subr.bf16.mxu1 %v5770_v10  ;;  %v5867_v9 = vld [vmem:[%s6478_s24 + $0x6c0] ss:$16 sps:$4 sm:$0xff]   ;;  %v5836_v10 = vld [vmem:[%s6478_s24 + $0x404] ss:$16 sps:$4 sm:$0xff]  }
  0xdd   : > { %1237 = vmatpush2.bf16.msra.mxu0 %v5765_v12  ;;  %1290 = vmatpush2.bf16.msra.mxu1 %v5768_v14  ;;  %v5873_v12 = vld [vmem:[%s6478_s24 + $0x6a0] ss:$16 sps:$4 sm:$0xff]   ;;  %v5875_v14 = vld [vmem:[%s6478_s24 + $0x6a4] ss:$16 sps:$4 sm:$0xff]  }
  0xde   : > { %1238 = vmatprep.subr.bf16.mxu0 %v5773_v15  ;;  %1291 = vmatprep.subr.bf16.mxu1 %v5776_v16  ;;  %v5834_v15 = vld [vmem:[%s6478_s24 + $0x400] ss:$16 sps:$4 sm:$0xff]   ;;  %v5839_v16 = vld [vmem:[%s6478_s24 + $0x5e4] ss:$16 sps:$4 sm:$0xff]  }
  0xe1   : > { %1239 = vmatpush2.bf16.msra.mxu0 %v5771_v18  ;;  %1292 = vmatpush2.bf16.msra.mxu1 %v5774_v20  ;;  %v5879_v18 = vld [vmem:[%s6478_s24 + $0x680] ss:$16 sps:$4 sm:$0xff]   ;;  %v5881_v20 = vld [vmem:[%s6478_s24 + $0x684] ss:$16 sps:$4 sm:$0xff]  }
  0xe2   : > { %1240 = vmatprep.subr.bf16.mxu0 %v5779_v21  ;;  %1293 = vmatprep.subr.bf16.mxu1 %v5782_v22  ;;  %v5837_v21 = vld [vmem:[%s6478_s24 + $0x5e0] ss:$16 sps:$4 sm:$0xff]   ;;  %v5842_v22 = vld [vmem:[%s6478_s24 + $0x5c4] ss:$16 sps:$4 sm:$0xff]  }
  0xe5   : > { %1241 = vmatpush2.bf16.msra.mxu0 %v5777_v23  ;;  %1294 = vmatpush2.bf16.msra.mxu1 %v5780_v27  ;;  %v5885_v23 = vld [vmem:[%s6478_s24 + $0x660] ss:$16 sps:$4 sm:$0xff]   ;;  %v5887_v27 = vld [vmem:[%s6478_s24 + $0x664] ss:$16 sps:$4 sm:$0xff]  }
  0xe6   : > { %1242 = vmatprep.subr.bf16.mxu0 %v5785_v29  ;;  %1295 = vmatprep.subr.bf16.mxu1 %v5788_v30  ;;  %v5840_v29 = vld [vmem:[%s6478_s24 + $0x5c0] ss:$16 sps:$4 sm:$0xff]   ;;  %v5845_v30 = vld [vmem:[%s6478_s24 + $0x5a4] ss:$16 sps:$4 sm:$0xff]  }
  0xe9   : > { %1243 = vmatpush2.bf16.msra.mxu0 %v5783_v31  ;;  %1296 = vmatpush2.bf16.msra.mxu1 %v5786_v33  ;;  %v5891_v31 = vld [vmem:[%s6478_s24 + $0x640] ss:$16 sps:$4 sm:$0xff]   ;;  %v5893_v33 = vld [vmem:[%s6478_s24 + $0x644] ss:$16 sps:$4 sm:$0xff]  }
  0xea   : > { %1244 = vmatprep.subr.bf16.mxu0 %v5791_v35  ;;  %1297 = vmatprep.subr.bf16.mxu1 %v5794_v37  ;;  %v5843_v35 = vld [vmem:[%s6478_s24 + $0x5a0] ss:$16 sps:$4 sm:$0xff]   ;;  %v5848_v37 = vld [vmem:[%s6478_s24 + $0x584] ss:$16 sps:$4 sm:$0xff]  }
  0xed   : > { %1245 = vmatpush2.bf16.msra.mxu0 %v5789_v40  ;;  %1298 = vmatpush2.bf16.msra.mxu1 %v5792_v41  ;;  %v5897_v40 = vld [vmem:[%s6478_s24 + $0x620] ss:$16 sps:$4 sm:$0xff]   ;;  %v5899_v41 = vld [vmem:[%s6478_s24 + $0x624] ss:$16 sps:$4 sm:$0xff]  }
  0xee   : > { %1246 = vmatprep.subr.bf16.mxu0 %v5797_v43  ;;  %1299 = vmatprep.subr.bf16.mxu1 %v5800_v44  ;;  %v5846_v43 = vld [vmem:[%s6478_s24 + $0x580] ss:$16 sps:$4 sm:$0xff]   ;;  %v5851_v44 = vld [vmem:[%s6478_s24 + $0x564] ss:$16 sps:$4 sm:$0xff]  }
  0xf1   : > { %1247 = vmatpush2.bf16.msra.mxu0 %v5795_v45  ;;  %1300 = vmatpush2.bf16.msra.mxu1 %v5798_v48  ;;  %v5903_v45 = vld [vmem:[%s6478_s24 + $0x600] ss:$16 sps:$4 sm:$0xff]   ;;  %v5905_v48 = vld [vmem:[%s6478_s24 + $0x604] ss:$16 sps:$4 sm:$0xff]  }
  0xf2   : > { %1248 = vmatprep.subr.bf16.mxu0 %v5803_v49  ;;  %1301 = vmatprep.subr.bf16.mxu1 %v5806_v50  ;;  %v5849_v49 = vld [vmem:[%s6478_s24 + $0x560] ss:$16 sps:$4 sm:$0xff]   ;;  %v5854_v50 = vld [vmem:[%s6478_s24 + $0x544] ss:$16 sps:$4 sm:$0xff]  }
  0xf5   : > { %1249 = vmatpush2.bf16.msra.mxu0 %v5801_v51  ;;  %1302 = vmatpush2.bf16.msra.mxu1 %v5804_v52  ;;  %v5909_v51 = vld [vmem:[%s6478_s24 + $0x7e0] ss:$16 sps:$4 sm:$0xff]   ;;  %v5911_v52 = vld [vmem:[%s6478_s24 + $0x7e4] ss:$16 sps:$4 sm:$0xff]  }
  0xf6   : > { %1250 = vmatprep.subr.bf16.mxu0 %v5809_v53  ;;  %1303 = vmatprep.subr.bf16.mxu1 %v5812_v54  ;;  %v5852_v53 = vld [vmem:[%s6478_s24 + $0x540] ss:$16 sps:$4 sm:$0xff]   ;;  %v5857_v54 = vld [vmem:[%s6478_s24 + $0x524] ss:$16 sps:$4 sm:$0xff]  }
  0xf9   : > { %1251 = vmatpush2.bf16.msra.mxu0 %v5807_v55  ;;  %1304 = vmatpush2.bf16.msra.mxu1 %v5810_v56  ;;  %v5915_v55 = vld [vmem:[%s6478_s24 + $0x7c0] ss:$16 sps:$4 sm:$0xff]   ;;  %v5917_v56 = vld [vmem:[%s6478_s24 + $0x7c4] ss:$16 sps:$4 sm:$0xff]  }
  0xfa   : > { %2190 = vmatprep.subr.bf16.mxu0 %v5815_v57  ;;  %2243 = vmatprep.subr.bf16.mxu1 %v5863_v2  ;;  %v5855_v57 = vld [vmem:[%s6478_s24 + $0x520] ss:$16 sps:$4 sm:$0xff]  }
  0xfb   : > { %v5939_v2 = vld [vmem:[%s6478_s24 + $0x740] ss:$16 sps:$4 sm:$0xff]  }
  0xfc   : > { %1253 = vmatmul.mubr.bf16.vlgmr.msra.gmra.mxu0 %v6594_v24  ;;  %1306 = vmatmul.mubr.bf16.vlgmr.msra.gmra.mxu1 %v6596_v25  ;;  %v5824_v24 = vld [vmem:[%s6478_s24 + $0x484] ss:$16 sps:$4 sm:$0xff]   ;;  %v5822_v25 = vld [vmem:[%s6478_s24 + $0x480] ss:$16 sps:$4 sm:$0xff]  }
  0xfd   : > { %1262 = vmatprep.mubr.bf16.mxu0 %v6622_v38  ;;  %1315 = vmatprep.mubr.bf16.mxu1 %v6624_v39  ;;  %v5827_v38 = vld [vmem:[%s6478_s24 + $0x464] ss:$16 sps:$4 sm:$0xff]   ;;  %v5825_v39 = vld [vmem:[%s6478_s24 + $0x460] ss:$16 sps:$4 sm:$0xff]  }
  0xfe   : > { %2191 = vmatpush1.bf16.msra.mxu0 %v5813_v58  ;;  %2244 = vmatpush1.bf16.msra.mxu1 %v5861_v4  ;;  %v5860_v58 = vld [vmem:[%s6478_s24 + $0x504] ss:$16 sps:$4 sm:$0xff]  }
  0xff   : > { %2192 = vmatprep.subr.bf16.mxu0 %v5818_v59  ;;  %2245 = vmatprep.subr.bf16.mxu1 %v5869_v6  ;;  %v5921_v59 = vld [vmem:[%s6478_s24 + $0x7a0] ss:$16 sps:$4 sm:$0xff]   ;;  %v5947_v4 = vld [vmem:[%s6478_s24 + $0x724] ss:$16 sps:$4 sm:$0xff]  }
 0x100   : > { %v5951_v6 = vld [vmem:[%s6478_s24 + $0x700] ss:$16 sps:$4 sm:$0xff]  }
 0x102   : > { %2193 = vmatpush1.bf16.msra.mxu0 %v5816_v60  ;;  %2246 = vmatpush1.bf16.msra.mxu1 %v5867_v9  ;;  %v5923_v60 = vld [vmem:[%s6478_s24 + $0x7a4] ss:$16 sps:$4 sm:$0xff]   ;;  %v454_v9 = vlaneseq }
 0x103   : > { %2194 = vmatprep.subr.bf16.mxu0 %v5821_v62  ;;  %2247 = vmatprep.subr.bf16.mxu1 %v5875_v14  ;;  %v5858_v62 = vld [vmem:[%s6478_s24 + $0x500] ss:$16 sps:$4 sm:$0xff]  }
 0x104   : > { %1263 = vmatmul.mubr.bf16.gmra.mxu0 %v6636_v46  ;;  %1316 = vmatmul.mubr.bf16.gmra.mxu1 %v6638_v47  ;;  %v5828_v46 = vld [vmem:[%s6478_s24 + $0x440] ss:$16 sps:$4 sm:$0xff]   ;;  %v5833_v47 = vld [vmem:[%s6478_s24 + $0x424] ss:$16 sps:$4 sm:$0xff]  }
 0x105   : > { %v6778_v14 = vld [vmem:[%s6772_s28] sm:$0xf] }
 0x106   : > { %2195 = vmatpush1.bf16.msra.mxu0 %v5819_v0  ;;  %2248 = vmatpush1.bf16.msra.mxu1 %v5873_v12  ;;  %v5866_v0 = vld [vmem:[%s6478_s24 + $0x4ec] ss:$16 sps:$4 sm:$0xff]  }
 0x107   : > { %2196 = vmatprep.subr.bf16.mxu0 %v5824_v24  ;;  %2249 = vmatprep.subr.bf16.mxu1 %v5881_v20  ;;  %v5927_v24 = vld [vmem:[%s6478_s24 + $0x780] ss:$16 sps:$4 sm:$0xff]  }
 0x10a   : > { %2197 = vmatpush1.bf16.msra.mxu0 %v5822_v25  ;;  %2250 = vmatpush1.bf16.msra.mxu1 %v5879_v18  ;;  %v5929_v25 = vld [vmem:[%s6478_s24 + $0x784] ss:$16 sps:$4 sm:$0xff]  }
 0x10b   : > { %2198 = vmatprep.subr.bf16.mxu0 %v5827_v38  ;;  %2251 = vmatprep.subr.bf16.mxu1 %v5887_v27  ;;  %v5935_v38 = vld [vmem:[%s6478_s24 + $0x764] ss:$16 sps:$4 sm:$0xff]  }
 0x10e   : > { %2199 = vmatpush1.bf16.msra.mxu0 %v5825_v39  ;;  %2252 = vmatpush1.bf16.msra.mxu1 %v5885_v23  ;;  %v5933_v39 = vld [vmem:[%s6478_s24 + $0x760] ss:$16 sps:$4 sm:$0xff]  }
 0x10f   : > { %2200 = vmatprep.subr.bf16.mxu0 %v5830_v1  ;;  %2253 = vmatprep.subr.bf16.mxu1 %v5893_v33  ;;  %v5941_v1 = vld [vmem:[%s6478_s24 + $0x744] ss:$16 sps:$4 sm:$0xff]  }
 0x112   : > { %2201 = vmatpush1.bf16.msra.mxu0 %v5828_v46  ;;  %2254 = vmatpush1.bf16.msra.mxu1 %v5891_v31  ;;  %v5945_v46 = vld [vmem:[%s6478_s24 + $0x720] ss:$16 sps:$4 sm:$0xff]  }
 0x113   : > { %2202 = vmatprep.subr.bf16.mxu0 %v5833_v47  ;;  %2255 = vmatprep.subr.bf16.mxu1 %v5899_v41  ;;  %v5953_v47 = vld [vmem:[%s6478_s24 + $0x704] ss:$16 sps:$4 sm:$0xff]  }
 0x116   : > { %2203 = vmatpush1.bf16.msra.mxu0 %v5831_v8  ;;  %2256 = vmatpush1.bf16.msra.mxu1 %v5897_v40  ;;  %v5959_v8 = vld [vmem:[%s6478_s24 + $0x6ec] ss:$16 sps:$4 sm:$0xff]  }
 0x117   : > { %2204 = vmatprep.subr.bf16.mxu0 %v5836_v10  ;;  %2257 = vmatprep.subr.bf16.mxu1 %v5905_v48  ;;  %v6767_v10 = vshrl.u32 %v454_v9, 7 }
 0x119   : > { %v6775_v12 = vsub.s32 0, %v6767_v10 }
 0x11a   : > { %2205 = vmatpush1.bf16.msra.mxu0 %v5834_v15  ;;  %2258 = vmatpush1.bf16.msra.mxu1 %v5903_v45  ;;  %v6781_v15 = vsub.s32 1, %v6767_v10 }
 0x11b   : > { %2206 = vmatprep.subr.bf16.mxu0 %v5839_v16  ;;  %2259 = vmatprep.subr.bf16.mxu1 %v5911_v52  ;;  %v457_v16 = vrot.slane %v6778_v14, %v6775_v12 }
 0x11c   : > { %v461_v18 = vrot.slane %v6778_v14, %v6781_v15 }
 0x11e   : > { %2207 = vmatpush2.bf16.msra.mxu0 %v5837_v21  ;;  %2260 = vmatpush2.bf16.msra.mxu1 %v5909_v51 }
 0x11f   : > { %2208 = vmatprep.subr.bf16.mxu0 %v5842_v22  ;;  %2261 = vmatprep.subr.bf16.mxu1 %v5917_v56 }
 0x122   : > { %2209 = vmatpush2.bf16.msra.mxu0 %v5840_v29  ;;  %2262 = vmatpush2.bf16.msra.mxu1 %v5915_v55 }
 0x123   : > { %2210 = vmatprep.subr.bf16.mxu0 %v5845_v30  ;;  %2263 = vmatprep.subr.bf16.mxu1 %v5923_v60 }
 0x126   : > { %2211 = vmatpush2.bf16.msra.mxu0 %v5843_v35  ;;  %2264 = vmatpush2.bf16.msra.mxu1 %v5921_v59 }
 0x127   : > { %2212 = vmatprep.subr.bf16.mxu0 %v5848_v37  ;;  %2265 = vmatprep.subr.bf16.mxu1 %v5929_v25 }
 0x12a   : > { %2213 = vmatpush2.bf16.msra.mxu0 %v5846_v43  ;;  %2266 = vmatpush2.bf16.msra.mxu1 %v5927_v24 }
 0x12b   : > { %2214 = vmatprep.subr.bf16.mxu0 %v5851_v44  ;;  %2267 = vmatprep.subr.bf16.mxu1 %v5935_v38 }
 0x12e   : > { %2215 = vmatpush2.bf16.msra.mxu0 %v5849_v49  ;;  %2268 = vmatpush2.bf16.msra.mxu1 %v5933_v39 }
 0x12f   : > { %2216 = vmatprep.subr.bf16.mxu0 %v5854_v50  ;;  %2269 = vmatprep.subr.bf16.mxu1 %v5941_v1 }
 0x132   : > { %2217 = vmatpush2.bf16.msra.mxu0 %v5852_v53  ;;  %2270 = vmatpush2.bf16.msra.mxu1 %v5939_v2 }
 0x133   : > { %2218 = vmatprep.subr.bf16.mxu0 %v5857_v54  ;;  %2271 = vmatprep.subr.bf16.mxu1 %v5947_v4 }
 0x136   : > { %2219 = vmatpush2.bf16.msra.mxu0 %v5855_v57  ;;  %2272 = vmatpush2.bf16.msra.mxu1 %v5945_v46 }
 0x137   : > { %2220 = vmatprep.subr.bf16.mxu0 %v5860_v58  ;;  %2273 = vmatprep.subr.bf16.mxu1 %v5953_v47 }
 0x13a   : > { %2221 = vmatpush2.bf16.msra.mxu0 %v5858_v62  ;;  %2274 = vmatpush2.bf16.msra.mxu1 %v5951_v6 }
 0x13b   : > { %2296 = vmatprep.subr.bf16.mxu0 %v5866_v0  ;;  %2349 = vmatprep.subr.bf16.mxu1 %v5959_v8 }
 0x17c   : > { %v1148_v20 = vpop.f32.mrf.mxu0  ;;  %v1201_v21 = vpop.f32.mrf.mxu1 }
 0x17d   : > { %v1149_v22 = vadd.f32 %v1148_v20, %v457_v16 }
 0x17e   : > { %v1150_v23 = vpop.f32.mrf.mxu0  ;;  %v1203_v27 = vpop.f32.mrf.mxu1 }
 0x17f   : > { %v1202_v29 = vadd.f32 %v1201_v21, %v1149_v22  ;;  %v1151_v30 = vadd.f32 %v1150_v23, %v461_v18 }
 0x180   : > { %v1152_v31 = vpop.f32.mrf.mxu0  ;;  %v1205_v33 = vpop.f32.mrf.mxu1 }
 0x181   : > { %v1204_v35 = vadd.f32 %v1203_v27, %v1151_v30  ;;  %v1153_v37 = vadd.f32 %v1152_v31, %v457_v16  ;;  %v1342_v40 = vmul.f32 0.2, %v1202_v29  ;;  %vm1326_vm0 = vcmp.ge.f32.partialorder %v1202_v29, 0.0 }
 0x182   : > { %v1154_v41 = vpop.f32.mrf.mxu0  ;;  %v1207_v43 = vpop.f32.mrf.mxu1 }
 0x183   : > { %v1343_v44 = vmul.f32 0.2, %v1204_v35  ;;  %v1206_v45 = vadd.f32 %v1205_v33, %v1153_v37  ;;  %vm1327_vm1 = vcmp.ge.f32.partialorder %v1204_v35, 0.0  ;;  %v1155_v48 = vadd.f32 %v1154_v41, %v461_v18  ;;  %v5872_v33 = vld [vmem:[%s6478_s24 + $0x4cc] ss:$16 sps:$4 sm:$0xff]  }
 0x184   : > { %v1158_v49 = vpop.f32.mrf.mxu0  ;;  %v1211_v50 = vpop.f32.mrf.mxu1  ;;  %v1358_v53 = vsel %vm1326_vm0, %v1202_v29, %v1342_v40 }
 0x185   : > { %vm1330_vm2 = vcmp.ge.f32.partialorder %v1206_v45, 0.0  ;;  %v1346_v51 = vmul.f32 0.2, %v1206_v45  ;;  %v1159_v52 = vadd.f32 %v1158_v49, %v457_v16  ;;  %v1208_v54 = vadd.f32 %v1207_v43, %v1155_v48  ;;  %v5870_v43 = vld [vmem:[%s6478_s24 + $0x4c8] ss:$16 sps:$4 sm:$0xff]  }
 0x186   : > { %v1160_v55 = vpop.f32.mrf.mxu0  ;;  %v1213_v56 = vpop.f32.mrf.mxu1  ;;  %v1359_v57 = vsel %vm1327_vm1, %v1204_v35, %v1343_v44  ;;  %v1374_v2 = vmul.f32 1.4142135, %v1358_v53  ;;  %v5882_v53 = vld [vmem:[%s6478_s24 + $0x488] ss:$16 sps:$4 sm:$0xff]  }
 0x187   : > { %v1362_v58 = vsel %vm1330_vm2, %v1206_v45, %v1346_v51  ;;  %v1161_v59 = vadd.f32 %v1160_v55, %v461_v18  ;;  %v1212_v60 = vadd.f32 %v1211_v50, %v1159_v52  ;;  %vm1331_vm3 = vcmp.ge.f32.partialorder %v1208_v54, 0.0  ;;  %v5878_v45 = vld [vmem:[%s6478_s24 + $0x4ac] ss:$16 sps:$4 sm:$0xff]   ;;  %v5876_v51 = vld [vmem:[%s6478_s24 + $0x4a8] ss:$16 sps:$4 sm:$0xff]  }
 0x188   : > { %v1347_v62 = vmul.f32 0.2, %v1208_v54  ;;  %v1162_v0 = vpop.f32.mrf.mxu0  ;;  %v1215_v24 = vpop.f32.mrf.mxu1  ;;  %v1378_v25 = vmul.f32 1.4142135, %v1362_v58  ;;  %v1375_v4 = vmul.f32 1.4142135, %v1359_v57 }
 0x189   : > { %v1350_v38 = vmul.f32 0.2, %v1212_v60  ;;  %v1163_v39 = vadd.f32 %v1162_v0, %v457_v16  ;;  %v1214_v1 = vadd.f32 %v1213_v56, %v1161_v59  ;;  %vm1334_vm4 = vcmp.ge.f32.partialorder %v1212_v60, 0.0  ;;  %v5864_v16 = vld [vmem:[%s6478_s24 + $0x4e8] ss:$16 sps:$4 sm:$0xff]  }
 0x18a   : > { %v1363_v46 = vsel %vm1331_vm3, %v1208_v54, %v1347_v62  ;;  %v1164_v47 = vpop.f32.mrf.mxu0  ;;  %v1217_v9 = vpop.f32.mrf.mxu1  ;;  %v6787_v22 = vpack.c.bf16 %v1378_v25, %v1374_v2  ;;  %v5884_v52 = vld [vmem:[%s6478_s24 + $0x48c] ss:$16 sps:$4 sm:$0xff]   ;;  %v5888_v55 = vld [vmem:[%s6478_s24 + $0x468] ss:$16 sps:$4 sm:$0xff]   ;;  %v6818_v2 = vsub.s32 2, %v6767_v10 }
 0x18b   : > { %v1379_v6 = vmul.f32 1.4142135, %v1363_v46  ;;  %vm1335_vm5 = vcmp.ge.f32.partialorder %v1214_v1, 0.0  ;;  %v1351_v8 = vmul.f32 0.2, %v1214_v1  ;;  %v1165_v20 = vadd.f32 %v1164_v47, %v461_v18 }
 0x18c   : > { %v1216_v21 = vadd.f32 %v1215_v24, %v1163_v39  ;;  %v1366_v23 = vsel %vm1334_vm4, %v1212_v60, %v1350_v38  ;;  %v5890_v54 = vld [vmem:[%s6478_s24 + $0x46c] ss:$16 sps:$4 sm:$0xff]   ;;  %v5894_v57 = vld [vmem:[%s6478_s24 + $0x448] ss:$16 sps:$4 sm:$0xff]   ;;  %v6822_v46 = vsub.s32 3, %v6767_v10 }
 0x18d   : > { %v1391_v27 = vpack.c.bf16 %v1379_v6, %v1375_v4  ;;  %v1367_v29 = vsel %vm1335_vm5, %v1214_v1, %v1351_v8  ;;  %v1218_v31 = vadd.f32 %v1217_v9, %v1165_v20  ;;  %v1382_v35 = vmul.f32 1.4142135, %v1366_v23  ;;  %v5896_v56 = vld [vmem:[%s6478_s24 + $0x44c] ss:$16 sps:$4 sm:$0xff]   ;;  %v5900_v59 = vld [vmem:[%s6478_s24 + $0x428] ss:$16 sps:$4 sm:$0xff]  }
 0x18e   : > { %vm1338_vm6 = vcmp.ge.f32.partialorder %v1216_v21, 0.0  ;;  %v1354_v30 = vmul.f32 0.2, %v1216_v21  ;;  %v1383_v40 = vmul.f32 1.4142135, %v1367_v29  ;;  %v465_v6 = vrot.slane %v6778_v14, %v6818_v2 }
 0x18f   : > { %2222 = vmatprep.mubr.bf16.mxu0 %v1391_v27  ;;  %vm1339_vm7 = vcmp.ge.f32.partialorder %v1218_v31, 0.0  ;;  %v1355_v18 = vmul.f32 0.2, %v1218_v31  ;;  %v5902_v58 = vld [vmem:[%s6478_s24 + $0x42c] ss:$16 sps:$4 sm:$0xff]   ;;  %v469_v9 = vrot.slane %v6778_v14, %v6822_v46 }
 0x190   : > { %v1370_v37 = vsel %vm1338_vm6, %v1216_v21, %v1354_v30  ;;  %2223 = vmatmul.mubr.bf16.vlgmr.msra.gmra.mxu0 %v6787_v22  ;;  %v5908_v60 = vld [vmem:[%s6478_s24 + $0x40c] ss:$16 sps:$4 sm:$0xff]   ;;  %v5906_v62 = vld [vmem:[%s6478_s24 + $0x408] ss:$16 sps:$4 sm:$0xff]  }
 0x191   : > { %v1386_v41 = vmul.f32 1.4142135, %v1370_v37  ;;  %2297 = vmatpush1.bf16.msra.mxu0 %v5864_v16  ;;  %v1371_v44 = vsel %vm1339_vm7, %v1218_v31, %v1355_v18  ;;  %v5914_v0 = vld [vmem:[%s6478_s24 + $0x5ec] ss:$16 sps:$4 sm:$0xff]   ;;  %v5912_v24 = vld [vmem:[%s6478_s24 + $0x5e8] ss:$16 sps:$4 sm:$0xff]  }
 0x192   : > { %2298 = vmatprep.subr.bf16.mxu0 %v5872_v33  ;;  %v1387_v48 = vmul.f32 1.4142135, %v1371_v44  ;;  %v5920_v25 = vld [vmem:[%s6478_s24 + $0x5cc] ss:$16 sps:$4 sm:$0xff]   ;;  %v5918_v38 = vld [vmem:[%s6478_s24 + $0x5c8] ss:$16 sps:$4 sm:$0xff]  }
 0x193   : > { %v6794_v49 = vpack.c.bf16 %v1386_v41, %v1382_v35  ;;  %v5926_v39 = vld [vmem:[%s6478_s24 + $0x5ac] ss:$16 sps:$4 sm:$0xff]   ;;  %v5924_v1 = vld [vmem:[%s6478_s24 + $0x5a8] ss:$16 sps:$4 sm:$0xff]  }
 0x194   : > { %v6796_v50 = vpack.c.bf16 %v1387_v48, %v1383_v40  ;;  %v5932_v4 = vld [vmem:[%s6478_s24 + $0x58c] ss:$16 sps:$4 sm:$0xff]   ;;  %v5930_v47 = vld [vmem:[%s6478_s24 + $0x588] ss:$16 sps:$4 sm:$0xff]  }
 0x195   : > { %2299 = vmatpush1.bf16.msra.mxu0 %v5870_v43  ;;  %v5938_v8 = vld [vmem:[%s6478_s24 + $0x56c] ss:$16 sps:$4 sm:$0xff]   ;;  %v5942_v40 = vld [vmem:[%s6478_s24 + $0x548] ss:$16 sps:$4 sm:$0xff]  }
 0x196   : > { %2300 = vmatprep.subr.bf16.mxu0 %v5878_v45  ;;  %2232 = vmatprep.mubr.bf16.mxu0 %v6796_v50  ;;  %v5944_v29 = vld [vmem:[%s6478_s24 + $0x54c] ss:$16 sps:$4 sm:$0xff]  }
 0x197   : > { %v5950_v43 = vld [vmem:[%s6478_s24 + $0x52c] ss:$16 sps:$4 sm:$0xff]  }
 0x198   : > { %2233 = vmatmul.mubr.bf16.gmra.mxu0 %v6794_v49 }
 0x199   : > { %2301 = vmatpush1.bf16.msra.mxu0 %v5876_v51  ;;  %2328 = vmatprep.mubr.bf16.mxu0 %v1391_v27  ;;  %v5936_v27 = vld [vmem:[%s6478_s24 + $0x568] ss:$16 sps:$4 sm:$0xff]  }
 0x19a   : > { %2302 = vmatprep.subr.bf16.mxu0 %v5884_v52 }
 0x19d   : > { %2303 = vmatpush1.bf16.msra.mxu0 %v5882_v53 }
 0x19e   : > { %2304 = vmatprep.subr.bf16.mxu0 %v5890_v54 }
 0x1a1   : > { %2305 = vmatpush1.bf16.msra.mxu0 %v5888_v55 }
 0x1a2   : > { %2306 = vmatprep.subr.bf16.mxu0 %v5896_v56  ;;  %v5948_v56 = vld [vmem:[%s6478_s24 + $0x528] ss:$16 sps:$4 sm:$0xff]  }
 0x1a5   : > { %2307 = vmatpush1.bf16.msra.mxu0 %v5894_v57 }
 0x1a6   : > { %2308 = vmatprep.subr.bf16.mxu0 %v5902_v58 }
 0x1a9   : > { %2309 = vmatpush1.bf16.msra.mxu0 %v5900_v59 }
 0x1aa   : > { %2310 = vmatprep.subr.bf16.mxu0 %v5908_v60  ;;  %v5956_v60 = vld [vmem:[%s6478_s24 + $0x50c] ss:$16 sps:$4 sm:$0xff]  }
 0x1ad   : > { %2311 = vmatpush1.bf16.msra.mxu0 %v5906_v62 }
 0x1ae   : > { %2312 = vmatprep.subr.bf16.mxu0 %v5914_v0 }
 0x1b1   : > { %2313 = vmatpush2.bf16.msra.mxu0 %v5912_v24 }
 0x1b2   : > { %2314 = vmatprep.subr.bf16.mxu0 %v5920_v25 }
 0x1b5   : > { %2315 = vmatpush2.bf16.msra.mxu0 %v5918_v38 }
 0x1b6   : > { %2316 = vmatprep.subr.bf16.mxu0 %v5926_v39 }
 0x1b9   : > { %2317 = vmatpush2.bf16.msra.mxu0 %v5924_v1 }
 0x1ba   : > { %2318 = vmatprep.subr.bf16.mxu0 %v5932_v4 }
 0x1bc   : > { %v1254_v20 = vpop.f32.mrf.mxu0  ;;  %v1307_v21 = vpop.f32.mrf.mxu1 }
 0x1bd   : > { %v1255_v23 = vadd.f32 %v1254_v20, %v465_v6  ;;  %2319 = vmatpush2.bf16.msra.mxu0 %v5930_v47  ;;  %v5954_v20 = vld [vmem:[%s6478_s24 + $0x508] ss:$16 sps:$4 sm:$0xff]  }
 0x1be   : > { %v1256_v16 = vpop.f32.mrf.mxu0  ;;  %v1309_v10 = vpop.f32.mrf.mxu1  ;;  %2320 = vmatprep.subr.bf16.mxu0 %v5938_v8 }
 0x1bf   : > { %v1257_v30 = vadd.f32 %v1256_v16, %v469_v9  ;;  %v1308_v31 = vadd.f32 %v1307_v21, %v1255_v23 }
 0x1c0   : > { %v1258_v33 = vpop.f32.mrf.mxu0  ;;  %v1311_v35 = vpop.f32.mrf.mxu1 }
 0x1c1   : > { %v1310_v37 = vadd.f32 %v1309_v10, %v1257_v30  ;;  %v1259_v18 = vadd.f32 %v1258_v33, %v465_v6  ;;  %2321 = vmatpush2.bf16.msra.mxu0 %v5936_v27  ;;  %v1344_v45 = vmul.f32 0.2, %v1308_v31  ;;  %vm1328_vm10 = vcmp.ge.f32.partialorder %v1308_v31, 0.0 }
 0x1c2   : > { %v1260_v14 = vpop.f32.mrf.mxu0  ;;  %v1313_v41 = vpop.f32.mrf.mxu1  ;;  %2322 = vmatprep.subr.bf16.mxu0 %v5944_v29 }
 0x1c3   : > { %v1312_v44 = vadd.f32 %v1311_v35, %v1259_v18  ;;  %v1345_v48 = vmul.f32 0.2, %v1310_v37  ;;  %v1261_v51 = vadd.f32 %v1260_v14, %v469_v9  ;;  %vm1329_vm8 = vcmp.ge.f32.partialorder %v1310_v37, 0.0  ;;  %v5957_v18 = vld [vmem:[%s6478_s24 + $0x6e8] ss:$16 sps:$4 sm:$0xff]  }
 0x1c4   : > { %v1264_v52 = vpop.f32.mrf.mxu0  ;;  %v1317_v53 = vpop.f32.mrf.mxu1  ;;  %v1360_v39 = vsel %vm1328_vm10, %v1308_v31, %v1344_v45 }
 0x1c5   : > { %vm1332_vm9 = vcmp.ge.f32.partialorder %v1312_v44, 0.0  ;;  %v1348_v54 = vmul.f32 0.2, %v1312_v44  ;;  %v1265_v55 = vadd.f32 %v1264_v52, %v465_v6  ;;  %2323 = vmatpush2.bf16.msra.mxu0 %v5942_v40  ;;  %v1314_v57 = vadd.f32 %v1313_v41, %v1261_v51  ;;  %v5960_v51 = vld [vmem:[%s6478_s24 + $0x6c8] ss:$16 sps:$4 sm:$0xff]  }
 0x1c6   : > { %v1266_v58 = vpop.f32.mrf.mxu0  ;;  %v1319_v59 = vpop.f32.mrf.mxu1  ;;  %2324 = vmatprep.subr.bf16.mxu0 %v5950_v43  ;;  %v1361_v24 = vsel %vm1329_vm8, %v1310_v37, %v1345_v48  ;;  %v1376_v29 = vmul.f32 1.4142135, %v1360_v39  ;;  %v5962_v43 = vld [vmem:[%s6478_s24 + $0x6cc] ss:$16 sps:$4 sm:$0xff]   ;;  %v6013_v39 = vld [vmem:[%s6478_s24 + $0x8a4] ss:$16 sps:$4 sm:$0xff]  }
 0x1c7   : > { %v1364_v62 = vsel %vm1332_vm9, %v1312_v44, %v1348_v54  ;;  %v1267_v0 = vadd.f32 %v1266_v58, %v469_v9  ;;  %vm1333_vm11 = vcmp.ge.f32.partialorder %v1314_v57, 0.0  ;;  %v1349_v25 = vmul.f32 0.2, %v1314_v57  ;;  %v5965_v54 = vld [vmem:[%s6478_s24 + $0x6ac] ss:$16 sps:$4 sm:$0xff]  }
 0x1c8   : > { %v1268_v38 = vpop.f32.mrf.mxu0  ;;  %v1318_v1 = vadd.f32 %v1317_v53, %v1265_v55  ;;  %v1321_v8 = vpop.f32.mrf.mxu1  ;;  %v1380_v21 = vmul.f32 1.4142135, %v1364_v62  ;;  %v1377_v16 = vmul.f32 1.4142135, %v1361_v24  ;;  %v5963_v58 = vld [vmem:[%s6478_s24 + $0x6a8] ss:$16 sps:$4 sm:$0xff]  }
 0x1c9   : > { %v1320_v4 = vadd.f32 %v1319_v59, %v1267_v0  ;;  %v1269_v47 = vadd.f32 %v1268_v38, %v465_v6  ;;  %2325 = vmatpush2.bf16.msra.mxu0 %v5948_v56  ;;  %v1365_v23 = vsel %vm1333_vm11, %v1314_v57, %v1349_v25  ;;  %v5968_v59 = vld [vmem:[%s6478_s24 + $0x68c] ss:$16 sps:$4 sm:$0xff]   ;;  %v6007_v62 = vld [vmem:[%s6478_s24 + $0x8e4] ss:$16 sps:$4 sm:$0xff]   ;;  %v5966_v24 = vld [vmem:[%s6478_s24 + $0x688] ss:$16 sps:$4 sm:$0xff]  }
 0x1ca   : > { %v1270_v27 = vpop.f32.mrf.mxu0  ;;  %2326 = vmatprep.subr.bf16.mxu0 %v5956_v60  ;;  %v1381_v10 = vmul.f32 1.4142135, %v1365_v23  ;;  %vm1336_vm12 = vcmp.ge.f32.partialorder %v1318_v1, 0.0  ;;  %v1352_v31 = vmul.f32 0.2, %v1318_v1  ;;  %v1323_v37 = vpop.f32.mrf.mxu1  ;;  %v6838_v40 = vpack.c.bf16 %v1380_v21, %v1376_v29 }
 0x1cb   : > { %v1353_v30 = vmul.f32 0.2, %v1320_v4  ;;  %v1322_v33 = vadd.f32 %v1321_v8, %v1269_v47  ;;  %v1271_v35 = vadd.f32 %v1270_v27, %v469_v9  ;;  %vm1337_vm13 = vcmp.ge.f32.partialorder %v1320_v4, 0.0  ;;  %v6005_v60 = vld [vmem:[%s6478_s24 + $0x8e0] ss:$16 sps:$4 sm:$0xff]  }
 0x1cc   : > { %v1393_v6 = vpack.c.bf16 %v1381_v10, %v1377_v16  ;;  %v1368_v48 = vsel %vm1336_vm12, %v1318_v1, %v1352_v31  ;;  %v6010_v0 = vld [vmem:[%s6478_s24 + $0x8c4] ss:$16 sps:$4 sm:$0xff]   ;;  %v5971_v25 = vld [vmem:[%s6478_s24 + $0x66c] ss:$16 sps:$4 sm:$0xff]   ;;  %v6008_v38 = vld [vmem:[%s6478_s24 + $0x8c0] ss:$16 sps:$4 sm:$0xff]  }
 0x1cd   : > { %2327 = vmatpush2.bf16.msra.mxu0 %v5954_v20  ;;  %vm1340_vm14 = vcmp.ge.f32.partialorder %v1322_v33, 0.0  ;;  %v1356_v14 = vmul.f32 0.2, %v1322_v33  ;;  %v1324_v41 = vadd.f32 %v1323_v37, %v1271_v35  ;;  %v1369_v44 = vsel %vm1337_vm13, %v1320_v4, %v1353_v30  ;;  %v5969_v1 = vld [vmem:[%s6478_s24 + $0x668] ss:$16 sps:$4 sm:$0xff]  }
 0x1ce   : > { %2275 = vmatprep.mubr.bf16.mxu1 %v1393_v6  ;;  %v1385_v55 = vmul.f32 1.4142135, %v1369_v44  ;;  %v1384_v57 = vmul.f32 1.4142135, %v1368_v48  ;;  %3266 = vmatprep.subr.bf16.mxu0 %v6007_v62  ;;  %v6011_v4 = vld [vmem:[%s6478_s24 + $0x8a0] ss:$16 sps:$4 sm:$0xff]  }
 0x1cf   : > { %v1372_v45 = vsel %vm1340_vm14, %v1322_v33, %v1356_v14  ;;  %vm1341_vm15 = vcmp.ge.f32.partialorder %v1324_v41, 0.0  ;;  %v1357_v9 = vmul.f32 0.2, %v1324_v41  ;;  %2276 = vmatmul.mubr.bf16.vlgmr.msra.gmra.mxu1 %v6838_v40  ;;  %v6016_v47 = vld [vmem:[%s6478_s24 + $0x884] ss:$16 sps:$4 sm:$0xff]  }
 0x1d0   : > { %2329 = vmatmul.mubr.bf16.vlgmr.msra.gmra.mxu0 %v6787_v22  ;;  %2350 = vmatpush1.bf16.msra.mxu1 %v5957_v18  ;;  %v1388_v52 = vmul.f32 1.4142135, %v1372_v45  ;;  %v5972_v8 = vld [vmem:[%s6478_s24 + $0x648] ss:$16 sps:$4 sm:$0xff]   ;;  %v5977_v20 = vld [vmem:[%s6478_s24 + $0x62c] ss:$16 sps:$4 sm:$0xff]  }
 0x1d1   : > { %2338 = vmatprep.mubr.bf16.mxu0 %v6796_v50  ;;  %v1373_v53 = vsel %vm1341_vm15, %v1324_v41, %v1357_v9  ;;  %2351 = vmatprep.subr.bf16.mxu1 %v5962_v43  ;;  %v6014_v21 = vld [vmem:[%s6478_s24 + $0x880] ss:$16 sps:$4 sm:$0xff]   ;;  %v6019_v23 = vld [vmem:[%s6478_s24 + $0x864] ss:$16 sps:$4 sm:$0xff]   ;;  %v5975_v27 = vld [vmem:[%s6478_s24 + $0x628] ss:$16 sps:$4 sm:$0xff]  }
 0x1d2   : > { %v1389_v56 = vmul.f32 1.4142135, %v1373_v53  ;;  %v6850_v50 = vpack.c.bf16 %v1388_v52, %v1384_v57  ;;  %3267 = vmatpush1.bf16.msra.mxu0 %v6005_v60  ;;  %v5980_v16 = vld [vmem:[%s6478_s24 + $0x60c] ss:$16 sps:$4 sm:$0xff]   ;;  %v6017_v10 = vld [vmem:[%s6478_s24 + $0x860] ss:$16 sps:$4 sm:$0xff]  }
 0x1d3   : > { %3268 = vmatprep.subr.bf16.mxu0 %v6010_v0  ;;  %v6022_v29 = vld [vmem:[%s6478_s24 + $0x844] ss:$16 sps:$4 sm:$0xff]   ;;  %v5978_v30 = vld [vmem:[%s6478_s24 + $0x608] ss:$16 sps:$4 sm:$0xff]   ;;  %v5983_v33 = vld [vmem:[%s6478_s24 + $0x7ec] ss:$16 sps:$4 sm:$0xff]  }
 0x1d4   : > { %2352 = vmatpush1.bf16.msra.mxu1 %v5960_v51  ;;  %v6847_v22 = vpack.c.bf16 %v1389_v56, %v1385_v55  ;;  %v6020_v35 = vld [vmem:[%s6478_s24 + $0x840] ss:$16 sps:$4 sm:$0xff]   ;;  %v6025_v31 = vld [vmem:[%s6478_s24 + $0x824] ss:$16 sps:$4 sm:$0xff]   ;;  %v5981_v37 = vld [vmem:[%s6478_s24 + $0x7e8] ss:$16 sps:$4 sm:$0xff]  }
 0x1d5   : > { %2353 = vmatprep.subr.bf16.mxu1 %v5965_v54  ;;  %v6023_v18 = vld [vmem:[%s6478_s24 + $0x820] ss:$16 sps:$4 sm:$0xff]   ;;  %v6028_v14 = vld [vmem:[%s6478_s24 + $0x804] ss:$16 sps:$4 sm:$0xff]   ;;  %v5984_v41 = vld [vmem:[%s6478_s24 + $0x7c8] ss:$16 sps:$4 sm:$0xff]  }
 0x1d6   : > { %2285 = vmatprep.mubr.bf16.mxu1 %v6847_v22  ;;  %3269 = vmatpush1.bf16.msra.mxu0 %v6008_v38  ;;  %v5989_v43 = vld [vmem:[%s6478_s24 + $0x7ac] ss:$16 sps:$4 sm:$0xff]   ;;  %v6026_v44 = vld [vmem:[%s6478_s24 + $0x800] ss:$16 sps:$4 sm:$0xff]   ;;  %v6031_v45 = vld [vmem:[%s6478_s24 + $0x9e4] ss:$16 sps:$4 sm:$0xff]  }
 0x1d7   : > { %2286 = vmatmul.mubr.bf16.gmra.mxu1 %v6850_v50  ;;  %3270 = vmatprep.subr.bf16.mxu0 %v6013_v39  ;;  %v5987_v9 = vld [vmem:[%s6478_s24 + $0x7a8] ss:$16 sps:$4 sm:$0xff]   ;;  %v5992_v48 = vld [vmem:[%s6478_s24 + $0x78c] ss:$16 sps:$4 sm:$0xff]   ;;  %v6029_v51 = vld [vmem:[%s6478_s24 + $0x9e0] ss:$16 sps:$4 sm:$0xff]  }
 0x1d8   : > { %2339 = vmatmul.mubr.bf16.gmra.mxu0 %v6794_v49  ;;  %2354 = vmatpush1.bf16.msra.mxu1 %v5963_v58  ;;  %v5974_v49 = vld [vmem:[%s6478_s24 + $0x64c] ss:$16 sps:$4 sm:$0xff]   ;;  %v6034_v52 = vld [vmem:[%s6478_s24 + $0x9c4] ss:$16 sps:$4 sm:$0xff]   ;;  %v5990_v53 = vld [vmem:[%s6478_s24 + $0x788] ss:$16 sps:$4 sm:$0xff]  }
 0x1d9   : > { %2381 = vmatprep.mubr.bf16.mxu1 %v1393_v6  ;;  %2355 = vmatprep.subr.bf16.mxu1 %v5968_v59  ;;  %v5986_v6 = vld [vmem:[%s6478_s24 + $0x7cc] ss:$16 sps:$4 sm:$0xff]   ;;  %v6032_v55 = vld [vmem:[%s6478_s24 + $0x9c0] ss:$16 sps:$4 sm:$0xff]   ;;  %v6037_v56 = vld [vmem:[%s6478_s24 + $0x9a4] ss:$16 sps:$4 sm:$0xff]  }
 0x1da   : > { %3271 = vmatpush1.bf16.msra.mxu0 %v6011_v4  ;;  %v5995_v54 = vld [vmem:[%s6478_s24 + $0x76c] ss:$16 sps:$4 sm:$0xff]   ;;  %v5993_v57 = vld [vmem:[%s6478_s24 + $0x768] ss:$16 sps:$4 sm:$0xff]   ;;  %v6035_v59 = vld [vmem:[%s6478_s24 + $0x9a0] ss:$16 sps:$4 sm:$0xff]  }
 0x1db   : > { %3272 = vmatprep.subr.bf16.mxu0 %v6016_v47  ;;  %v5998_v58 = vld [vmem:[%s6478_s24 + $0x74c] ss:$16 sps:$4 sm:$0xff]   ;;  %v6040_v60 = vld [vmem:[%s6478_s24 + $0x984] ss:$16 sps:$4 sm:$0xff]   ;;  %v5996_v62 = vld [vmem:[%s6478_s24 + $0x748] ss:$16 sps:$4 sm:$0xff]  }
 0x1dc   : > { %2356 = vmatpush1.bf16.msra.mxu1 %v5966_v24  ;;  %v6001_v0 = vld [vmem:[%s6478_s24 + $0x72c] ss:$16 sps:$4 sm:$0xff]   ;;  %v6038_v24 = vld [vmem:[%s6478_s24 + $0x980] ss:$16 sps:$4 sm:$0xff]   ;;  %v6002_v39 = vld [vmem:[%s6478_s24 + $0x708] ss:$16 sps:$4 sm:$0xff]  }
 0x1dd   : > { %2357 = vmatprep.subr.bf16.mxu1 %v5971_v25  ;;  %v5999_v25 = vld [vmem:[%s6478_s24 + $0x728] ss:$16 sps:$4 sm:$0xff]   ;;  %v6004_v38 = vld [vmem:[%s6478_s24 + $0x70c] ss:$16 sps:$4 sm:$0xff]   ;;  %v6046_v4 = vld [vmem:[%s6478_s24 + $0x944] ss:$16 sps:$4 sm:$0xff]  }
 0x1de   : > { %3273 = vmatpush1.bf16.msra.mxu0 %v6014_v21  ;;  %v6044_v47 = vld [vmem:[%s6478_s24 + $0x940] ss:$16 sps:$4 sm:$0xff]   ;;  %v6055_v21 = vld [vmem:[%s6478_s24 + $0xae4] ss:$16 sps:$4 sm:$0xff]  }
 0x1df   : > { %3274 = vmatprep.subr.bf16.mxu0 %v6019_v23  ;;  %v6053_v23 = vld [vmem:[%s6478_s24 + $0xae0] ss:$16 sps:$4 sm:$0xff]  }
 0x1e0   : > { %2358 = vmatpush1.bf16.msra.mxu1 %v5969_v1  ;;  %v6043_v1 = vld [vmem:[%s6478_s24 + $0x964] ss:$16 sps:$4 sm:$0xff]  }
 0x1e1   : > { %2359 = vmatprep.subr.bf16.mxu1 %v5974_v49  ;;  %v6041_v49 = vld [vmem:[%s6478_s24 + $0x960] ss:$16 sps:$4 sm:$0xff]  }
 0x1e2   : > { %3275 = vmatpush1.bf16.msra.mxu0 %v6017_v10  ;;  %v6065_v10 = vld [vmem:[%s6478_s24 + $0xaa0] ss:$16 sps:$4 sm:$0xff]  }
 0x1e3   : > { %3276 = vmatprep.subr.bf16.mxu0 %v6022_v29  ;;  %v6067_v29 = vld [vmem:[%s6478_s24 + $0xaa4] ss:$16 sps:$4 sm:$0xff]  }
 0x1e4   : > { %2360 = vmatpush1.bf16.msra.mxu1 %v5972_v8  ;;  %v6049_v8 = vld [vmem:[%s6478_s24 + $0x924] ss:$16 sps:$4 sm:$0xff]  }
 0x1e5   : > { %2361 = vmatprep.subr.bf16.mxu1 %v5977_v20  ;;  %v6047_v20 = vld [vmem:[%s6478_s24 + $0x920] ss:$16 sps:$4 sm:$0xff]  }
 0x1e6   : > { %3277 = vmatpush1.bf16.msra.mxu0 %v6020_v35  ;;  %v6077_v35 = vld [vmem:[%s6478_s24 + $0xa60] ss:$16 sps:$4 sm:$0xff]  }
 0x1e7   : > { %3278 = vmatprep.subr.bf16.mxu0 %v6025_v31  ;;  %v6079_v31 = vld [vmem:[%s6478_s24 + $0xa64] ss:$16 sps:$4 sm:$0xff]  }
 0x1e8   : > { %2362 = vmatpush1.bf16.msra.mxu1 %v5975_v27  ;;  %v6058_v27 = vld [vmem:[%s6478_s24 + $0x8ec] ss:$16 sps:$4 sm:$0xff]  }
 0x1e9   : > { %2363 = vmatprep.subr.bf16.mxu1 %v5980_v16  ;;  %v6059_v16 = vld [vmem:[%s6478_s24 + $0xac0] ss:$16 sps:$4 sm:$0xff]  }
 0x1ea   : > { %3279 = vmatpush1.bf16.msra.mxu0 %v6023_v18  ;;  %v6089_v18 = vld [vmem:[%s6478_s24 + $0xa20] ss:$16 sps:$4 sm:$0xff]  }
 0x1eb   : > { %3280 = vmatprep.subr.bf16.mxu0 %v6028_v14  ;;  %v6091_v14 = vld [vmem:[%s6478_s24 + $0xa24] ss:$16 sps:$4 sm:$0xff]  }
 0x1ec   : > { %2364 = vmatpush1.bf16.msra.mxu1 %v5978_v30  ;;  %v6071_v30 = vld [vmem:[%s6478_s24 + $0xa80] ss:$16 sps:$4 sm:$0xff]  }
 0x1ed   : > { %2365 = vmatprep.subr.bf16.mxu1 %v5983_v33  ;;  %v6073_v33 = vld [vmem:[%s6478_s24 + $0xa84] ss:$16 sps:$4 sm:$0xff]  }
 0x1ee   : > { %3281 = vmatpush1.bf16.msra.mxu0 %v6026_v44  ;;  %v6101_v44 = vld [vmem:[%s6478_s24 + $0xbe0] ss:$16 sps:$4 sm:$0xff]  }
 0x1ef   : > { %3282 = vmatprep.subr.bf16.mxu0 %v6031_v45  ;;  %v6103_v45 = vld [vmem:[%s6478_s24 + $0xbe4] ss:$16 sps:$4 sm:$0xff]  }
 0x1f0   : > { %2366 = vmatpush2.bf16.msra.mxu1 %v5981_v37  ;;  %v6083_v37 = vld [vmem:[%s6478_s24 + $0xa40] ss:$16 sps:$4 sm:$0xff]  }
 0x1f1   : > { %2367 = vmatprep.subr.bf16.mxu1 %v5986_v6  ;;  %v6085_v6 = vld [vmem:[%s6478_s24 + $0xa44] ss:$16 sps:$4 sm:$0xff]  }
 0x1f2   : > { %3283 = vmatpush2.bf16.msra.mxu0 %v6029_v51  ;;  %v6113_v51 = vld [vmem:[%s6478_s24 + $0xba0] ss:$16 sps:$4 sm:$0xff]  }
 0x1f3   : > { %3284 = vmatprep.subr.bf16.mxu0 %v6034_v52  ;;  %v6115_v52 = vld [vmem:[%s6478_s24 + $0xba4] ss:$16 sps:$4 sm:$0xff]  }
 0x1f4   : > { %2368 = vmatpush2.bf16.msra.mxu1 %v5984_v41  ;;  %v6095_v41 = vld [vmem:[%s6478_s24 + $0xa00] ss:$16 sps:$4 sm:$0xff]  }
 0x1f5   : > { %2369 = vmatprep.subr.bf16.mxu1 %v5989_v43  ;;  %v6097_v43 = vld [vmem:[%s6478_s24 + $0xa04] ss:$16 sps:$4 sm:$0xff]  }
 0x1f6   : > { %3285 = vmatpush2.bf16.msra.mxu0 %v6032_v55  ;;  %v6127_v55 = vld [vmem:[%s6478_s24 + $0xb64] ss:$16 sps:$4 sm:$0xff]  }
 0x1f7   : > { %3286 = vmatprep.subr.bf16.mxu0 %v6037_v56  ;;  %v6125_v56 = vld [vmem:[%s6478_s24 + $0xb60] ss:$16 sps:$4 sm:$0xff]  }
 0x1f8   : > { %2370 = vmatpush2.bf16.msra.mxu1 %v5987_v9  ;;  %v6107_v9 = vld [vmem:[%s6478_s24 + $0xbc0] ss:$16 sps:$4 sm:$0xff]  }
 0x1f9   : > { %2371 = vmatprep.subr.bf16.mxu1 %v5992_v48  ;;  %v6109_v48 = vld [vmem:[%s6478_s24 + $0xbc4] ss:$16 sps:$4 sm:$0xff]  }
 0x1fa   : > { %3287 = vmatpush2.bf16.msra.mxu0 %v6035_v59  ;;  %v6139_v59 = vld [vmem:[%s6478_s24 + $0xb24] ss:$16 sps:$4 sm:$0xff]  }
 0x1fb   : > { %3288 = vmatprep.subr.bf16.mxu0 %v6040_v60  ;;  %v6137_v60 = vld [vmem:[%s6478_s24 + $0xb20] ss:$16 sps:$4 sm:$0xff]  }
 0x1fc   : > { %2372 = vmatpush2.bf16.msra.mxu1 %v5990_v53  ;;  %v6119_v53 = vld [vmem:[%s6478_s24 + $0xb80] ss:$16 sps:$4 sm:$0xff]  }
 0x1fd   : > { %2373 = vmatprep.subr.bf16.mxu1 %v5995_v54  ;;  %v6121_v54 = vld [vmem:[%s6478_s24 + $0xb84] ss:$16 sps:$4 sm:$0xff]  }
 0x1fe   : > { %3289 = vmatpush2.bf16.msra.mxu0 %v6038_v24  ;;  %v6151_v24 = vld [vmem:[%s6478_s24 + $0xaec] ss:$16 sps:$4 sm:$0xff]  }
 0x1ff   : > { %3290 = vmatprep.subr.bf16.mxu0 %v6043_v1  ;;  %v6951_v1 = vld [vmem:[%s6772_s28 + $0x4] sm:$0xf] }
 0x200   : > { %2374 = vmatpush2.bf16.msra.mxu1 %v5993_v57  ;;  %v6133_v57 = vld [vmem:[%s6478_s24 + $0xb44] ss:$16 sps:$4 sm:$0xff]  }
 0x201   : > { %2375 = vmatprep.subr.bf16.mxu1 %v5998_v58  ;;  %v6131_v58 = vld [vmem:[%s6478_s24 + $0xb40] ss:$16 sps:$4 sm:$0xff]  }
 0x202   : > { %3291 = vmatpush2.bf16.msra.mxu0 %v6041_v49  ;;  %v1533_v49 = vrot.slane %v6951_v1, %v6775_v12 }
 0x203   : > { %3292 = vmatprep.subr.bf16.mxu0 %v6046_v4 }
 0x204   : > { %2376 = vmatpush2.bf16.msra.mxu1 %v5996_v62  ;;  %v6145_v62 = vld [vmem:[%s6478_s24 + $0xb04] ss:$16 sps:$4 sm:$0xff]  }
 0x205   : > { %2377 = vmatprep.subr.bf16.mxu1 %v6001_v0  ;;  %v6143_v0 = vld [vmem:[%s6478_s24 + $0xb00] ss:$16 sps:$4 sm:$0xff]  }
 0x206   : > { %3293 = vmatpush2.bf16.msra.mxu0 %v6044_v47  ;;  %v1537_v47 = vrot.slane %v6951_v1, %v6781_v15 }
 0x207   : > { %3294 = vmatprep.subr.bf16.mxu0 %v6049_v8 }
 0x208   : > { %2378 = vmatpush2.bf16.msra.mxu1 %v5999_v25 }
 0x209   : > { %2379 = vmatprep.subr.bf16.mxu1 %v6004_v38 }
 0x20a   : > { %3295 = vmatpush2.bf16.msra.mxu0 %v6047_v20 }
 0x20c   : > { %2380 = vmatpush2.bf16.msra.mxu1 %v6002_v39 }
 0x20d   : > { %3319 = vmatprep.subr.bf16.mxu1 %v6055_v21 }
 0x20f   : > { %2382 = vmatmul.mubr.bf16.vlgmr.msra.gmra.mxu1 %v6838_v40  ;;  %v6052_v40 = vld [vmem:[%s6478_s24 + $0x904] ss:$16 sps:$4 sm:$0xff]  }
 0x210   : > { %2391 = vmatprep.mubr.bf16.mxu1 %v6847_v22  ;;  %v6050_v22 = vld [vmem:[%s6478_s24 + $0x900] ss:$16 sps:$4 sm:$0xff]   ;;  %3296 = vmatprep.subr.bf16.mxu0 %v6052_v40 }
 0x211   : > { %3297 = vmatpush2.bf16.msra.mxu0 %v6050_v22  ;;  %3320 = vmatpush1.bf16.msra.mxu1 %v6053_v23 }
 0x212   : > { %3372 = vmatprep.subr.bf16.mxu0 %v6058_v27 }
 0x217   : > { %2392 = vmatmul.mubr.bf16.gmra.mxu1 %v6850_v50  ;;  %v6061_v50 = vld [vmem:[%s6478_s24 + $0xac4] ss:$16 sps:$4 sm:$0xff]  }
 0x218   : > { %3321 = vmatprep.subr.bf16.mxu1 %v6061_v50 }
 0x219   : > { %3322 = vmatpush1.bf16.msra.mxu1 %v6059_v16 }
 0x21a   : > { %3323 = vmatprep.subr.bf16.mxu1 %v6067_v29 }
 0x21d   : > { %3324 = vmatpush1.bf16.msra.mxu1 %v6065_v10 }
 0x21e   : > { %3325 = vmatprep.subr.bf16.mxu1 %v6073_v33 }
 0x221   : > { %3326 = vmatpush1.bf16.msra.mxu1 %v6071_v30 }
 0x222   : > { %3327 = vmatprep.subr.bf16.mxu1 %v6079_v31 }
 0x225   : > { %3328 = vmatpush1.bf16.msra.mxu1 %v6077_v35 }
 0x226   : > { %3329 = vmatprep.subr.bf16.mxu1 %v6085_v6 }
 0x229   : > { %3330 = vmatpush1.bf16.msra.mxu1 %v6083_v37 }
 0x22a   : > { %3331 = vmatprep.subr.bf16.mxu1 %v6091_v14 }
 0x22d   : > { %3332 = vmatpush1.bf16.msra.mxu1 %v6089_v18 }
 0x22e   : > { %3333 = vmatprep.subr.bf16.mxu1 %v6097_v43 }
 0x231   : > { %3334 = vmatpush1.bf16.msra.mxu1 %v6095_v41 }
 0x232   : > { %3335 = vmatprep.subr.bf16.mxu1 %v6103_v45 }
 0x235   : > { %3336 = vmatpush2.bf16.msra.mxu1 %v6101_v44 }
 0x236   : > { %3337 = vmatprep.subr.bf16.mxu1 %v6109_v48 }
 0x239   : > { %3338 = vmatpush2.bf16.msra.mxu1 %v6107_v9 }
 0x23a   : > { %3339 = vmatprep.subr.bf16.mxu1 %v6115_v52 }
 0x23d   : > { %3340 = vmatpush2.bf16.msra.mxu1 %v6113_v51 }
 0x23e   : > { %3341 = vmatprep.subr.bf16.mxu1 %v6121_v54 }
 0x241   : > { %3342 = vmatpush2.bf16.msra.mxu1 %v6119_v53 }
 0x242   : > { %3343 = vmatprep.subr.bf16.mxu1 %v6127_v55 }
 0x245   : > { %3344 = vmatpush2.bf16.msra.mxu1 %v6125_v56 }
 0x246   : > { %3345 = vmatprep.subr.bf16.mxu1 %v6133_v57 }
 0x249   : > { %3346 = vmatpush2.bf16.msra.mxu1 %v6131_v58 }
 0x24a   : > { %3347 = vmatprep.subr.bf16.mxu1 %v6139_v59 }
 0x24d   : > { %3348 = vmatpush2.bf16.msra.mxu1 %v6137_v60 }
 0x24e   : > { %3349 = vmatprep.subr.bf16.mxu1 %v6145_v62 }
 0x250   : > { %v2224_v25 = vpop.f32.mrf.mxu0 }
 0x251   : > { %3350 = vmatpush2.bf16.msra.mxu1 %v6143_v0  ;;  %v2225_v20 = vadd.f32 %v2224_v25, %v1533_v49 }
 0x252   : > { %3425 = vmatprep.subr.bf16.mxu1 %v6151_v24  ;;  %v2226_v38 = vpop.f32.mrf.mxu0 }
 0x253   : > { %v2227_v22 = vadd.f32 %v2226_v38, %v1537_v47 }
 0x254   : > { %v2228_v39 = vpop.f32.mrf.mxu0 }
 0x255   : > { %v2229_v50 = vadd.f32 %v2228_v39, %v1533_v49 }
 0x256   : > { %v2230_v4 = vpop.f32.mrf.mxu0 }
 0x257   : > { %v2231_v29 = vadd.f32 %v2230_v4, %v1537_v47 }
 0x258   : > { %v2234_v8 = vpop.f32.mrf.mxu0 }
 0x259   : > { %v2235_v14 = vadd.f32 %v2234_v8, %v1533_v49  ;;  %v6056_v8 = vld [vmem:[%s6478_s24 + $0x8e8] ss:$16 sps:$4 sm:$0xff]  }
 0x25a   : > { %v2236_v21 = vpop.f32.mrf.mxu0 }
 0x25b   : > { %v2237_v41 = vadd.f32 %v2236_v21, %v1537_v47 }
 0x25c   : > { %v2238_v35 = vpop.f32.mrf.mxu0 }
 0x25d   : > { %v2239_v54 = vadd.f32 %v2238_v35, %v1533_v49 }
 0x25e   : > { %v2240_v48 = vpop.f32.mrf.mxu0 }
 0x25f   : > { %v2241_v62 = vadd.f32 %v2240_v48, %v1537_v47  ;;  %v6092_v48 = vld [vmem:[%s6478_s24 + $0x828] ss:$16 sps:$4 sm:$0xff]  }
 0x28f   : > { %v2277_v40 = vpop.f32.mrf.mxu1 }
 0x290   : > { %v2278_v23 = vadd.f32 %v2277_v40, %v2225_v20 }
 0x291   : > { %v2279_v27 = vpop.f32.mrf.mxu1 }
 0x292   : > { %v2280_v16 = vadd.f32 %v2279_v27, %v2227_v22  ;;  %v2418_v31 = vmul.f32 0.2, %v2278_v23  ;;  %vm2402_vm1 = vcmp.ge.f32.partialorder %v2278_v23, 0.0  ;;  %v6064_v22 = vld [vmem:[%s6478_s24 + $0x8cc] ss:$16 sps:$4 sm:$0xff]  }
 0x293   : > { %v2281_v10 = vpop.f32.mrf.mxu1 }
 0x294   : > { %v2419_v30 = vmul.f32 0.2, %v2280_v16  ;;  %v2282_v33 = vadd.f32 %v2281_v10, %v2229_v50  ;;  %vm2403_vm0 = vcmp.ge.f32.partialorder %v2280_v16, 0.0  ;;  %v2434_v51 = vsel %vm2402_vm1, %v2278_v23, %v2418_v31  ;;  %v6062_v50 = vld [vmem:[%s6478_s24 + $0x8c8] ss:$16 sps:$4 sm:$0xff]  }
 0x295   : > { %v2283_v37 = vpop.f32.mrf.mxu1  ;;  %v2450_v0 = vmul.f32 1.4142135, %v2434_v51  ;;  %v6100_v51 = vld [vmem:[%s6478_s24 + $0x80c] ss:$16 sps:$4 sm:$0xff]  }
 0x296   : > { %vm2406_vm2 = vcmp.ge.f32.partialorder %v2282_v33, 0.0  ;;  %v2422_v6 = vmul.f32 0.2, %v2282_v33  ;;  %v2284_v18 = vadd.f32 %v2283_v37, %v2231_v29  ;;  %v2435_v44 = vsel %vm2403_vm0, %v2280_v16, %v2419_v30  ;;  %v6070_v29 = vld [vmem:[%s6478_s24 + $0x8ac] ss:$16 sps:$4 sm:$0xff]  }
 0x297   : > { %v2287_v43 = vpop.f32.mrf.mxu1  ;;  %v2451_v58 = vmul.f32 1.4142135, %v2435_v44  ;;  %v6068_v37 = vld [vmem:[%s6478_s24 + $0x8a8] ss:$16 sps:$4 sm:$0xff]   ;;  %v6088_v44 = vld [vmem:[%s6478_s24 + $0x84c] ss:$16 sps:$4 sm:$0xff]  }
 0x298   : > { %v2438_v45 = vsel %vm2406_vm2, %v2282_v33, %v2422_v6  ;;  %vm2407_vm3 = vcmp.ge.f32.partialorder %v2284_v18, 0.0  ;;  %v2423_v9 = vmul.f32 0.2, %v2284_v18  ;;  %v2288_v52 = vadd.f32 %v2287_v43, %v2235_v14  ;;  %v6074_v14 = vld [vmem:[%s6478_s24 + $0x888] ss:$16 sps:$4 sm:$0xff]  }
 0x299   : > { %v2289_v53 = vpop.f32.mrf.mxu1  ;;  %v2454_v55 = vmul.f32 1.4142135, %v2438_v45  ;;  %v6080_v43 = vld [vmem:[%s6478_s24 + $0x868] ss:$16 sps:$4 sm:$0xff]  }
 0x29a   : > { %v2439_v56 = vsel %vm2407_vm3, %v2284_v18, %v2423_v9  ;;  %v2290_v57 = vadd.f32 %v2289_v53, %v2237_v41  ;;  %vm2410_vm4 = vcmp.ge.f32.partialorder %v2288_v52, 0.0  ;;  %v2426_v38 = vmul.f32 0.2, %v2288_v52  ;;  %v6076_v18 = vld [vmem:[%s6478_s24 + $0x88c] ss:$16 sps:$4 sm:$0xff]  }
 0x29b   : > { %v2455_v59 = vmul.f32 1.4142135, %v2439_v56  ;;  %v2291_v60 = vpop.f32.mrf.mxu1  ;;  %v6958_v49 = vpack.c.bf16 %v2454_v55, %v2450_v0  ;;  %v6082_v41 = vld [vmem:[%s6478_s24 + $0x86c] ss:$16 sps:$4 sm:$0xff]   ;;  %v6086_v45 = vld [vmem:[%s6478_s24 + $0x848] ss:$16 sps:$4 sm:$0xff]  }
 0x29c   : > { %v2427_v24 = vmul.f32 0.2, %v2290_v57  ;;  %v2292_v25 = vadd.f32 %v2291_v60, %v2239_v54  ;;  %vm2411_vm5 = vcmp.ge.f32.partialorder %v2290_v57, 0.0  ;;  %v2442_v27 = vsel %vm2410_vm4, %v2288_v52, %v2426_v38  ;;  %v6094_v9 = vld [vmem:[%s6478_s24 + $0x82c] ss:$16 sps:$4 sm:$0xff]   ;;  %v2330_v54 = vpop.f32.mrf.mxu0 }
 0x29d   : > { %v2293_v39 = vpop.f32.mrf.mxu1  ;;  %v2467_v4 = vpack.c.bf16 %v2455_v59, %v2451_v58  ;;  %v2458_v35 = vmul.f32 1.4142135, %v2442_v27  ;;  %v6098_v52 = vld [vmem:[%s6478_s24 + $0x808] ss:$16 sps:$4 sm:$0xff]   ;;  %v6106_v53 = vld [vmem:[%s6478_s24 + $0x9ec] ss:$16 sps:$4 sm:$0xff]  }
 0x29e   : > { %vm2414_vm6 = vcmp.ge.f32.partialorder %v2292_v25, 0.0  ;;  %v2430_v20 = vmul.f32 0.2, %v2292_v25  ;;  %v2294_v40 = vadd.f32 %v2293_v39, %v2241_v62  ;;  %v2443_v21 = vsel %vm2411_vm5, %v2290_v57, %v2427_v24  ;;  %v6104_v55 = vld [vmem:[%s6478_s24 + $0x9e8] ss:$16 sps:$4 sm:$0xff]   ;;  %v2332_v57 = vpop.f32.mrf.mxu0 }
 0x29f   : > { %3298 = vmatprep.mubr.bf16.mxu0 %v2467_v4  ;;  %v2459_v30 = vmul.f32 1.4142135, %v2443_v21  ;;  %v6112_v56 = vld [vmem:[%s6478_s24 + $0x9cc] ss:$16 sps:$4 sm:$0xff]   ;;  %v6110_v58 = vld [vmem:[%s6478_s24 + $0x9c8] ss:$16 sps:$4 sm:$0xff]   ;;  %v1541_v39 = vrot.slane %v6951_v1, %v6818_v2 }
 0x2a0   : > { %v2446_v47 = vsel %vm2414_vm6, %v2292_v25, %v2430_v20  ;;  %vm2415_vm7 = vcmp.ge.f32.partialorder %v2294_v40, 0.0  ;;  %v2431_v23 = vmul.f32 0.2, %v2294_v40  ;;  %3299 = vmatmul.mubr.bf16.vlgmr.msra.gmra.mxu0 %v6958_v49  ;;  %v6118_v59 = vld [vmem:[%s6478_s24 + $0x9ac] ss:$16 sps:$4 sm:$0xff]   ;;  %v2334_v60 = vpop.f32.mrf.mxu0 }
 0x2a1   : > { %3373 = vmatpush1.bf16.msra.mxu0 %v6056_v8  ;;  %v2462_v16 = vmul.f32 1.4142135, %v2446_v47  ;;  %v6116_v62 = vld [vmem:[%s6478_s24 + $0x9a8] ss:$16 sps:$4 sm:$0xff]   ;;  %v6124_v0 = vld [vmem:[%s6478_s24 + $0x98c] ss:$16 sps:$4 sm:$0xff]  }
 0x2a2   : > { %v2447_v10 = vsel %vm2415_vm7, %v2294_v40, %v2431_v23  ;;  %3374 = vmatprep.subr.bf16.mxu0 %v6064_v22  ;;  %v2336_v24 = vpop.f32.mrf.mxu0  ;;  %v6122_v25 = vld [vmem:[%s6478_s24 + $0x988] ss:$16 sps:$4 sm:$0xff]   ;;  %v6130_v38 = vld [vmem:[%s6478_s24 + $0x96c] ss:$16 sps:$4 sm:$0xff]   ;;  %v2331_v22 = vadd.f32 %v2330_v54, %v1541_v39 }
 0x2a3   : > { %v2463_v33 = vmul.f32 1.4142135, %v2447_v10  ;;  %v6968_v6 = vpack.c.bf16 %v2462_v16, %v2458_v35  ;;  %v6128_v20 = vld [vmem:[%s6478_s24 + $0x968] ss:$16 sps:$4 sm:$0xff]   ;;  %v6136_v40 = vld [vmem:[%s6478_s24 + $0x94c] ss:$16 sps:$4 sm:$0xff]   ;;  %v2335_v10 = vadd.f32 %v2334_v60, %v1541_v39 }
 0x2a4   : > { %v2340_v8 = vpop.f32.mrf.mxu0  ;;  %v6134_v16 = vld [vmem:[%s6478_s24 + $0x948] ss:$16 sps:$4 sm:$0xff]  }
 0x2a5   : > { %3375 = vmatpush1.bf16.msra.mxu0 %v6062_v50  ;;  %v6965_v31 = vpack.c.bf16 %v2463_v33, %v2459_v30  ;;  %v6142_v30 = vld [vmem:[%s6478_s24 + $0x92c] ss:$16 sps:$4 sm:$0xff]   ;;  %v6146_v60 = vld [vmem:[%s6478_s24 + $0x908] ss:$16 sps:$4 sm:$0xff]  }
 0x2a6   : > { %3376 = vmatprep.subr.bf16.mxu0 %v6070_v29  ;;  %v2342_v23 = vpop.f32.mrf.mxu0 }
 0x2a7   : > { %3308 = vmatprep.mubr.bf16.mxu0 %v6965_v31 }
 0x2a8   : > { %3309 = vmatmul.mubr.bf16.gmra.mxu0 %v6968_v6 }
 0x2a9   : > { %3377 = vmatpush1.bf16.msra.mxu0 %v6068_v37  ;;  %3404 = vmatprep.mubr.bf16.mxu0 %v2467_v4  ;;  %v1545_v4 = vrot.slane %v6951_v1, %v6822_v46 }
 0x2aa   : > { %3378 = vmatprep.subr.bf16.mxu0 %v6076_v18  ;;  %v2344_v18 = vpop.f32.mrf.mxu0 }
 0x2ab   : > { %v2333_v47 = vadd.f32 %v2332_v57, %v1545_v4  ;;  %v2337_v33 = vadd.f32 %v2336_v24, %v1545_v4 }
 0x2ad   : > { %3379 = vmatpush1.bf16.msra.mxu0 %v6074_v14 }
 0x2ae   : > { %3380 = vmatprep.subr.bf16.mxu0 %v6082_v41 }
 0x2b1   : > { %3381 = vmatpush1.bf16.msra.mxu0 %v6080_v43  ;;  %v6140_v43 = vld [vmem:[%s6478_s24 + $0x928] ss:$16 sps:$4 sm:$0xff]  }
 0x2b2   : > { %3382 = vmatprep.subr.bf16.mxu0 %v6088_v44 }
 0x2b5   : > { %3383 = vmatpush1.bf16.msra.mxu0 %v6086_v45 }
 0x2b6   : > { %3384 = vmatprep.subr.bf16.mxu0 %v6094_v9  ;;  %v6148_v9 = vld [vmem:[%s6478_s24 + $0x90c] ss:$16 sps:$4 sm:$0xff]  }
 0x2b9   : > { %3385 = vmatpush1.bf16.msra.mxu0 %v6092_v48  ;;  %v2341_v48 = vadd.f32 %v2340_v8, %v1541_v39 }
 0x2ba   : > { %3386 = vmatprep.subr.bf16.mxu0 %v6100_v51  ;;  %v2343_v51 = vadd.f32 %v2342_v23, %v1545_v4 }
 0x2bd   : > { %3387 = vmatpush1.bf16.msra.mxu0 %v6098_v52 }
 0x2be   : > { %3388 = vmatprep.subr.bf16.mxu0 %v6106_v53 }
 0x2c1   : > { %3389 = vmatpush2.bf16.msra.mxu0 %v6104_v55 }
 0x2c2   : > { %3390 = vmatprep.subr.bf16.mxu0 %v6112_v56  ;;  %v2346_v56 = vpop.f32.mrf.mxu0 }
 0x2c5   : > { %3391 = vmatpush2.bf16.msra.mxu0 %v6110_v58 }
 0x2c6   : > { %3392 = vmatprep.subr.bf16.mxu0 %v6118_v59 }
 0x2c9   : > { %3393 = vmatpush2.bf16.msra.mxu0 %v6116_v62  ;;  %v2345_v62 = vadd.f32 %v2344_v18, %v1541_v39  ;;  %v6149_v39 = vld [vmem:[%s6478_s24 + $0xae8] ss:$16 sps:$4 sm:$0xff]  }
 0x2ca   : > { %3394 = vmatprep.subr.bf16.mxu0 %v6124_v0 }
 0x2cd   : > { %3395 = vmatpush2.bf16.msra.mxu0 %v6122_v25 }
 0x2ce   : > { %3396 = vmatprep.subr.bf16.mxu0 %v6130_v38 }
 0x2cf   : > { %v2383_v21 = vpop.f32.mrf.mxu1 }
 0x2d0   : > { %v2384_v27 = vadd.f32 %v2383_v21, %v2331_v22 }
 0x2d1   : > { %v2385_v50 = vpop.f32.mrf.mxu1  ;;  %3397 = vmatpush2.bf16.msra.mxu0 %v6128_v20 }
 0x2d2   : > { %v2386_v29 = vadd.f32 %v2385_v50, %v2333_v47  ;;  %3398 = vmatprep.subr.bf16.mxu0 %v6136_v40  ;;  %v2420_v14 = vmul.f32 0.2, %v2384_v27  ;;  %vm2404_vm9 = vcmp.ge.f32.partialorder %v2384_v27, 0.0  ;;  %v2347_v40 = vadd.f32 %v2346_v56, %v1545_v4  ;;  %v6199_v56 = vld [vmem:[%s6478_s24 + $0xce4] ss:$16 sps:$4 sm:$0xff]  }
 0x2d3   : > { %v2387_v1 = vpop.f32.mrf.mxu1 }
 0x2d4   : > { %v2421_v35 = vmul.f32 0.2, %v2386_v29  ;;  %v2388_v37 = vadd.f32 %v2387_v1, %v2335_v10  ;;  %vm2405_vm8 = vcmp.ge.f32.partialorder %v2386_v29, 0.0  ;;  %v2436_v57 = vsel %vm2404_vm9, %v2384_v27, %v2420_v14 }
 0x2d5   : > { %v2389_v41 = vpop.f32.mrf.mxu1  ;;  %3399 = vmatpush2.bf16.msra.mxu0 %v6134_v16  ;;  %v2452_v22 = vmul.f32 1.4142135, %v2436_v57  ;;  %v6202_v57 = vld [vmem:[%s6478_s24 + $0xcc4] ss:$16 sps:$4 sm:$0xff]  }
 0x2d6   : > { %vm2408_vm10 = vcmp.ge.f32.partialorder %v2388_v37, 0.0  ;;  %v2424_v44 = vmul.f32 0.2, %v2388_v37  ;;  %v2390_v45 = vadd.f32 %v2389_v41, %v2337_v33  ;;  %3400 = vmatprep.subr.bf16.mxu0 %v6142_v30  ;;  %v2437_v53 = vsel %vm2405_vm8, %v2386_v29, %v2421_v35  ;;  %v6154_v30 = vld [vmem:[%s6478_s24 + $0xacc] ss:$16 sps:$4 sm:$0xff]  }
 0x2d7   : > { %v2393_v52 = vpop.f32.mrf.mxu1  ;;  %v2453_v38 = vmul.f32 1.4142135, %v2437_v53  ;;  %v6157_v41 = vld [vmem:[%s6478_s24 + $0xaac] ss:$16 sps:$4 sm:$0xff]   ;;  %v6161_v53 = vld [vmem:[%s6478_s24 + $0xa68] ss:$16 sps:$4 sm:$0xff]  }
 0x2d8   : > { %v2440_v54 = vsel %vm2408_vm10, %v2388_v37, %v2424_v44  ;;  %vm2409_vm11 = vcmp.ge.f32.partialorder %v2390_v45, 0.0  ;;  %v2425_v55 = vmul.f32 0.2, %v2390_v45  ;;  %v2394_v58 = vadd.f32 %v2393_v52, %v2341_v48  ;;  %v6152_v37 = vld [vmem:[%s6478_s24 + $0xac8] ss:$16 sps:$4 sm:$0xff]  }
 0x2d9   : > { %v2395_v59 = vpop.f32.mrf.mxu1  ;;  %3401 = vmatpush2.bf16.msra.mxu0 %v6140_v43  ;;  %v2456_v0 = vmul.f32 1.4142135, %v2440_v54  ;;  %v6160_v48 = vld [vmem:[%s6478_s24 + $0xa8c] ss:$16 sps:$4 sm:$0xff]  }
 0x2da   : > { %v2441_v24 = vsel %vm2409_vm11, %v2390_v45, %v2425_v55  ;;  %v2396_v25 = vadd.f32 %v2395_v59, %v2343_v51  ;;  %3402 = vmatprep.subr.bf16.mxu0 %v6148_v9  ;;  %vm2412_vm12 = vcmp.ge.f32.partialorder %v2394_v58, 0.0  ;;  %v2428_v23 = vmul.f32 0.2, %v2394_v58  ;;  %v6158_v51 = vld [vmem:[%s6478_s24 + $0xa88] ss:$16 sps:$4 sm:$0xff]  }
 0x2db   : > { %v2457_v8 = vmul.f32 1.4142135, %v2441_v24  ;;  %v2397_v20 = vpop.f32.mrf.mxu1  ;;  %v7003_v16 = vpack.c.bf16 %v2456_v0, %v2452_v22  ;;  %v6163_v52 = vld [vmem:[%s6478_s24 + $0xa6c] ss:$16 sps:$4 sm:$0xff]   ;;  %v6197_v55 = vld [vmem:[%s6478_s24 + $0xce0] ss:$16 sps:$4 sm:$0xff]  }
 0x2dc   : > { %v2429_v21 = vmul.f32 0.2, %v2396_v25  ;;  %v2398_v47 = vadd.f32 %v2397_v20, %v2345_v62  ;;  %vm2413_vm13 = vcmp.ge.f32.partialorder %v2396_v25, 0.0  ;;  %v2444_v35 = vsel %vm2412_vm12, %v2394_v58, %v2428_v23  ;;  %v6166_v54 = vld [vmem:[%s6478_s24 + $0xa4c] ss:$16 sps:$4 sm:$0xff]  }
 0x2dd   : > { %v2399_v27 = vpop.f32.mrf.mxu1  ;;  %3403 = vmatpush2.bf16.msra.mxu0 %v6146_v60  ;;  %v2469_v50 = vpack.c.bf16 %v2457_v8, %v2453_v38  ;;  %v2460_v45 = vmul.f32 1.4142135, %v2444_v35  ;;  %v6169_v58 = vld [vmem:[%s6478_s24 + $0xa2c] ss:$16 sps:$4 sm:$0xff]   ;;  %v6200_v59 = vld [vmem:[%s6478_s24 + $0xcc0] ss:$16 sps:$4 sm:$0xff]  }
 0x2de   : > { %vm2416_vm14 = vcmp.ge.f32.partialorder %v2398_v47, 0.0  ;;  %v2432_v10 = vmul.f32 0.2, %v2398_v47  ;;  %v2400_v29 = vadd.f32 %v2399_v27, %v2347_v40  ;;  %v2445_v4 = vsel %vm2413_vm13, %v2396_v25, %v2429_v21  ;;  %4342 = vmatprep.subr.bf16.mxu0 %v6199_v56  ;;  %v6205_v60 = vld [vmem:[%s6478_s24 + $0xca4] ss:$16 sps:$4 sm:$0xff]  }
 0x2df   : > { %3351 = vmatprep.mubr.bf16.mxu1 %v2469_v50  ;;  %v2461_v43 = vmul.f32 1.4142135, %v2445_v4  ;;  %v6167_v62 = vld [vmem:[%s6478_s24 + $0xa28] ss:$16 sps:$4 sm:$0xff]   ;;  %v6172_v0 = vld [vmem:[%s6478_s24 + $0xa0c] ss:$16 sps:$4 sm:$0xff]  }
 0x2e0   : > { %v2448_v1 = vsel %vm2416_vm14, %v2398_v47, %v2432_v10  ;;  %vm2417_vm15 = vcmp.ge.f32.partialorder %v2400_v29, 0.0  ;;  %v2433_v33 = vmul.f32 0.2, %v2400_v29  ;;  %3352 = vmatmul.mubr.bf16.vlgmr.msra.gmra.mxu1 %v7003_v16  ;;  %3405 = vmatmul.mubr.bf16.vlgmr.msra.gmra.mxu0 %v6958_v49  ;;  %v6155_v49 = vld [vmem:[%s6478_s24 + $0xaa8] ss:$16 sps:$4 sm:$0xff]  }
 0x2e1   : > { %3426 = vmatpush1.bf16.msra.mxu1 %v6149_v39  ;;  %3414 = vmatprep.mubr.bf16.mxu0 %v6965_v31  ;;  %v2464_v18 = vmul.f32 1.4142135, %v2448_v1  ;;  %v6203_v24 = vld [vmem:[%s6478_s24 + $0xca0] ss:$16 sps:$4 sm:$0xff]   ;;  %v6208_v25 = vld [vmem:[%s6478_s24 + $0xc84] ss:$16 sps:$4 sm:$0xff]  }
 0x2e2   : > { %v2449_v14 = vsel %vm2417_vm15, %v2400_v29, %v2433_v33  ;;  %3427 = vmatprep.subr.bf16.mxu1 %v6154_v30  ;;  %4343 = vmatpush1.bf16.msra.mxu0 %v6197_v55  ;;  %v6170_v38 = vld [vmem:[%s6478_s24 + $0xa08] ss:$16 sps:$4 sm:$0xff]   ;;  %v6175_v8 = vld [vmem:[%s6478_s24 + $0xbec] ss:$16 sps:$4 sm:$0xff]   ;;  %v6206_v20 = vld [vmem:[%s6478_s24 + $0xc80] ss:$16 sps:$4 sm:$0xff]  }
 0x2e3   : > { %v2465_v44 = vmul.f32 1.4142135, %v2449_v14  ;;  %v7015_v31 = vpack.c.bf16 %v2464_v18, %v2460_v45  ;;  %4344 = vmatprep.subr.bf16.mxu0 %v6202_v57  ;;  %v6211_v40 = vld [vmem:[%s6478_s24 + $0xc64] ss:$16 sps:$4 sm:$0xff]   ;;  %v6173_v22 = vld [vmem:[%s6478_s24 + $0xbe8] ss:$16 sps:$4 sm:$0xff]  }
 0x2e4   : > { %v6178_v21 = vld [vmem:[%s6478_s24 + $0xbcc] ss:$16 sps:$4 sm:$0xff]   ;;  %v6209_v47 = vld [vmem:[%s6478_s24 + $0xc60] ss:$16 sps:$4 sm:$0xff]   ;;  %v6214_v23 = vld [vmem:[%s6478_s24 + $0xc44] ss:$16 sps:$4 sm:$0xff]  }
 0x2e5   : > { %3428 = vmatpush1.bf16.msra.mxu1 %v6152_v37  ;;  %v7012_v9 = vpack.c.bf16 %v2465_v44, %v2461_v43  ;;  %v6176_v27 = vld [vmem:[%s6478_s24 + $0xbc8] ss:$16 sps:$4 sm:$0xff]   ;;  %v6212_v39 = vld [vmem:[%s6478_s24 + $0xc40] ss:$16 sps:$4 sm:$0xff]   ;;  %v6217_v10 = vld [vmem:[%s6478_s24 + $0xc24] ss:$16 sps:$4 sm:$0xff]  }
 0x2e6   : > { %3429 = vmatprep.subr.bf16.mxu1 %v6157_v41  ;;  %4345 = vmatpush1.bf16.msra.mxu0 %v6200_v59  ;;  %v6179_v29 = vld [vmem:[%s6478_s24 + $0xba8] ss:$16 sps:$4 sm:$0xff]   ;;  %v6184_v30 = vld [vmem:[%s6478_s24 + $0xb8c] ss:$16 sps:$4 sm:$0xff]   ;;  %v6215_v4 = vld [vmem:[%s6478_s24 + $0xc20] ss:$16 sps:$4 sm:$0xff]  }
 0x2e7   : > { %3361 = vmatprep.mubr.bf16.mxu1 %v7012_v9  ;;  %4346 = vmatprep.subr.bf16.mxu0 %v6205_v60  ;;  %v6220_v1 = vld [vmem:[%s6478_s24 + $0xc04] ss:$16 sps:$4 sm:$0xff]   ;;  %v6182_v33 = vld [vmem:[%s6478_s24 + $0xb88] ss:$16 sps:$4 sm:$0xff]   ;;  %v6187_v35 = vld [vmem:[%s6478_s24 + $0xb6c] ss:$16 sps:$4 sm:$0xff]  }
 0x2e8   : > { %3362 = vmatmul.mubr.bf16.gmra.mxu1 %v7015_v31  ;;  %3415 = vmatmul.mubr.bf16.gmra.mxu0 %v6968_v6  ;;  %v6164_v6 = vld [vmem:[%s6478_s24 + $0xa48] ss:$16 sps:$4 sm:$0xff]   ;;  %v6218_v37 = vld [vmem:[%s6478_s24 + $0xc00] ss:$16 sps:$4 sm:$0xff]   ;;  %v6223_v18 = vld [vmem:[%s6478_s24 + $0xde4] ss:$16 sps:$4 sm:$0xff]  }
 0x2e9   : > { %3430 = vmatpush1.bf16.msra.mxu1 %v6155_v49  ;;  %3457 = vmatprep.mubr.bf16.mxu1 %v2469_v50  ;;  %v6181_v50 = vld [vmem:[%s6478_s24 + $0xbac] ss:$16 sps:$4 sm:$0xff]   ;;  %v6185_v14 = vld [vmem:[%s6478_s24 + $0xb68] ss:$16 sps:$4 sm:$0xff]   ;;  %v6221_v43 = vld [vmem:[%s6478_s24 + $0xde0] ss:$16 sps:$4 sm:$0xff]  }
 0x2ea   : > { %3431 = vmatprep.subr.bf16.mxu1 %v6160_v48  ;;  %4347 = vmatpush1.bf16.msra.mxu0 %v6203_v24  ;;  %v6190_v41 = vld [vmem:[%s6478_s24 + $0xb4c] ss:$16 sps:$4 sm:$0xff]   ;;  %v6226_v44 = vld [vmem:[%s6478_s24 + $0xdc4] ss:$16 sps:$4 sm:$0xff]   ;;  %v6188_v45 = vld [vmem:[%s6478_s24 + $0xb48] ss:$16 sps:$4 sm:$0xff]  }
 0x2eb   : > { %4348 = vmatprep.subr.bf16.mxu0 %v6208_v25  ;;  %v6193_v49 = vld [vmem:[%s6478_s24 + $0xb2c] ss:$16 sps:$4 sm:$0xff]   ;;  %v6224_v48 = vld [vmem:[%s6478_s24 + $0xdc0] ss:$16 sps:$4 sm:$0xff]   ;;  %v6232_v55 = vld [vmem:[%s6478_s24 + $0xd84] ss:$16 sps:$4 sm:$0xff]  }
 0x2ec   : > { %v6194_v56 = vld [vmem:[%s6478_s24 + $0xb08] ss:$16 sps:$4 sm:$0xff]   ;;  %v6230_v57 = vld [vmem:[%s6478_s24 + $0xd80] ss:$16 sps:$4 sm:$0xff]   ;;  %v6238_v59 = vld [vmem:[%s6478_s24 + $0xd44] ss:$16 sps:$4 sm:$0xff]  }
 0x2ed   : > { %3432 = vmatpush1.bf16.msra.mxu1 %v6158_v51  ;;  %v6229_v51 = vld [vmem:[%s6478_s24 + $0xda4] ss:$16 sps:$4 sm:$0xff]   ;;  %v6236_v60 = vld [vmem:[%s6478_s24 + $0xd40] ss:$16 sps:$4 sm:$0xff]  }
 0x2ee   : > { %3433 = vmatprep.subr.bf16.mxu1 %v6163_v52  ;;  %4349 = vmatpush1.bf16.msra.mxu0 %v6206_v20  ;;  %v6191_v52 = vld [vmem:[%s6478_s24 + $0xb28] ss:$16 sps:$4 sm:$0xff]   ;;  %v6247_v24 = vld [vmem:[%s6478_s24 + $0xee4] ss:$16 sps:$4 sm:$0xff]   ;;  %v6245_v25 = vld [vmem:[%s6478_s24 + $0xee0] ss:$16 sps:$4 sm:$0xff]  }
 0x2ef   : > { %4350 = vmatprep.subr.bf16.mxu0 %v6211_v40  ;;  %v6257_v20 = vld [vmem:[%s6478_s24 + $0xea0] ss:$16 sps:$4 sm:$0xff]   ;;  %v6259_v40 = vld [vmem:[%s6478_s24 + $0xea4] ss:$16 sps:$4 sm:$0xff]  }
 0x2f1   : > { %3434 = vmatpush1.bf16.msra.mxu1 %v6161_v53  ;;  %v6196_v53 = vld [vmem:[%s6478_s24 + $0xb0c] ss:$16 sps:$4 sm:$0xff]  }
 0x2f2   : > { %3435 = vmatprep.subr.bf16.mxu1 %v6166_v54  ;;  %4351 = vmatpush1.bf16.msra.mxu0 %v6209_v47  ;;  %v6227_v54 = vld [vmem:[%s6478_s24 + $0xda0] ss:$16 sps:$4 sm:$0xff]  }
 0x2f3   : > { %4352 = vmatprep.subr.bf16.mxu0 %v6214_v23  ;;  %v6269_v47 = vld [vmem:[%s6478_s24 + $0xe60] ss:$16 sps:$4 sm:$0xff]   ;;  %v6271_v23 = vld [vmem:[%s6478_s24 + $0xe64] ss:$16 sps:$4 sm:$0xff]  }
 0x2f5   : > { %3436 = vmatpush1.bf16.msra.mxu1 %v6164_v6  ;;  %v6235_v6 = vld [vmem:[%s6478_s24 + $0xd64] ss:$16 sps:$4 sm:$0xff]  }
 0x2f6   : > { %3437 = vmatprep.subr.bf16.mxu1 %v6169_v58  ;;  %4353 = vmatpush1.bf16.msra.mxu0 %v6212_v39  ;;  %v6233_v58 = vld [vmem:[%s6478_s24 + $0xd60] ss:$16 sps:$4 sm:$0xff]  }
 0x2f7   : > { %4354 = vmatprep.subr.bf16.mxu0 %v6217_v10  ;;  %v6281_v39 = vld [vmem:[%s6478_s24 + $0xe20] ss:$16 sps:$4 sm:$0xff]   ;;  %v6283_v10 = vld [vmem:[%s6478_s24 + $0xe24] ss:$16 sps:$4 sm:$0xff]  }
 0x2f9   : > { %3438 = vmatpush1.bf16.msra.mxu1 %v6167_v62  ;;  %v6241_v62 = vld [vmem:[%s6478_s24 + $0xd24] ss:$16 sps:$4 sm:$0xff]  }
 0x2fa   : > { %3439 = vmatprep.subr.bf16.mxu1 %v6172_v0  ;;  %4355 = vmatpush1.bf16.msra.mxu0 %v6215_v4  ;;  %v6239_v0 = vld [vmem:[%s6478_s24 + $0xd20] ss:$16 sps:$4 sm:$0xff]  }
 0x2fb   : > { %4356 = vmatprep.subr.bf16.mxu0 %v6220_v1  ;;  %v6293_v4 = vld [vmem:[%s6478_s24 + $0xfe0] ss:$16 sps:$4 sm:$0xff]   ;;  %v6295_v1 = vld [vmem:[%s6478_s24 + $0xfe4] ss:$16 sps:$4 sm:$0xff]  }
 0x2fd   : > { %3440 = vmatpush1.bf16.msra.mxu1 %v6170_v38  ;;  %v6250_v38 = vld [vmem:[%s6478_s24 + $0xcec] ss:$16 sps:$4 sm:$0xff]  }
 0x2fe   : > { %3441 = vmatprep.subr.bf16.mxu1 %v6175_v8  ;;  %4357 = vmatpush1.bf16.msra.mxu0 %v6218_v37  ;;  %v6251_v8 = vld [vmem:[%s6478_s24 + $0xec0] ss:$16 sps:$4 sm:$0xff]  }
 0x2ff   : > { %4358 = vmatprep.subr.bf16.mxu0 %v6223_v18  ;;  %v6305_v37 = vld [vmem:[%s6478_s24 + $0xfa0] ss:$16 sps:$4 sm:$0xff]   ;;  %v6307_v18 = vld [vmem:[%s6478_s24 + $0xfa4] ss:$16 sps:$4 sm:$0xff]  }
 0x301   : > { %3442 = vmatpush2.bf16.msra.mxu1 %v6173_v22  ;;  %v6263_v22 = vld [vmem:[%s6478_s24 + $0xe80] ss:$16 sps:$4 sm:$0xff]  }
 0x302   : > { %3443 = vmatprep.subr.bf16.mxu1 %v6178_v21  ;;  %4359 = vmatpush2.bf16.msra.mxu0 %v6221_v43  ;;  %v6265_v21 = vld [vmem:[%s6478_s24 + $0xe84] ss:$16 sps:$4 sm:$0xff]  }
 0x303   : > { %4360 = vmatprep.subr.bf16.mxu0 %v6226_v44  ;;  %v6319_v43 = vld [vmem:[%s6478_s24 + $0xf64] ss:$16 sps:$4 sm:$0xff]   ;;  %v6317_v44 = vld [vmem:[%s6478_s24 + $0xf60] ss:$16 sps:$4 sm:$0xff]  }
 0x305   : > { %3444 = vmatpush2.bf16.msra.mxu1 %v6176_v27  ;;  %v6275_v27 = vld [vmem:[%s6478_s24 + $0xe40] ss:$16 sps:$4 sm:$0xff]  }
 0x306   : > { %3445 = vmatprep.subr.bf16.mxu1 %v6181_v50  ;;  %4361 = vmatpush2.bf16.msra.mxu0 %v6224_v48  ;;  %v6277_v50 = vld [vmem:[%s6478_s24 + $0xe44] ss:$16 sps:$4 sm:$0xff]  }
 0x307   : > { %4362 = vmatprep.subr.bf16.mxu0 %v6229_v51  ;;  %v6331_v48 = vld [vmem:[%s6478_s24 + $0xf24] ss:$16 sps:$4 sm:$0xff]   ;;  %v6329_v51 = vld [vmem:[%s6478_s24 + $0xf20] ss:$16 sps:$4 sm:$0xff]  }
 0x309   : > { %3446 = vmatpush2.bf16.msra.mxu1 %v6179_v29  ;;  %v6287_v29 = vld [vmem:[%s6478_s24 + $0xe00] ss:$16 sps:$4 sm:$0xff]  }
 0x30a   : > { %3447 = vmatprep.subr.bf16.mxu1 %v6184_v30  ;;  %4363 = vmatpush2.bf16.msra.mxu0 %v6227_v54  ;;  %v6289_v30 = vld [vmem:[%s6478_s24 + $0xe04] ss:$16 sps:$4 sm:$0xff]   ;;  %v6343_v54 = vld [vmem:[%s6478_s24 + $0xeec] ss:$16 sps:$4 sm:$0xff]  }
 0x30b   : > { %4364 = vmatprep.subr.bf16.mxu0 %v6232_v55 }
 0x30d   : > { %3448 = vmatpush2.bf16.msra.mxu1 %v6182_v33  ;;  %v6299_v33 = vld [vmem:[%s6478_s24 + $0xfc0] ss:$16 sps:$4 sm:$0xff]  }
 0x30e   : > { %3449 = vmatprep.subr.bf16.mxu1 %v6187_v35  ;;  %4365 = vmatpush2.bf16.msra.mxu0 %v6230_v57  ;;  %v6301_v35 = vld [vmem:[%s6478_s24 + $0xfc4] ss:$16 sps:$4 sm:$0xff]  }
 0x30f   : > { %4366 = vmatprep.subr.bf16.mxu0 %v6235_v6  ;;  %v7116_v6 = vld [vmem:[%s6772_s28 + $0x8] sm:$0xf] }
 0x311   : > { %3450 = vmatpush2.bf16.msra.mxu1 %v6185_v14  ;;  %v6311_v14 = vld [vmem:[%s6478_s24 + $0xf80] ss:$16 sps:$4 sm:$0xff]  }
 0x312   : > { %3451 = vmatprep.subr.bf16.mxu1 %v6190_v41  ;;  %4367 = vmatpush2.bf16.msra.mxu0 %v6233_v58  ;;  %v6313_v41 = vld [vmem:[%s6478_s24 + $0xf84] ss:$16 sps:$4 sm:$0xff]  }
 0x313   : > { %4368 = vmatprep.subr.bf16.mxu0 %v6238_v59  ;;  %v2609_v59 = vrot.slane %v7116_v6, %v6775_v12 }
 0x315   : > { %3452 = vmatpush2.bf16.msra.mxu1 %v6188_v45  ;;  %v6325_v45 = vld [vmem:[%s6478_s24 + $0xf44] ss:$16 sps:$4 sm:$0xff]  }
 0x316   : > { %3453 = vmatprep.subr.bf16.mxu1 %v6193_v49  ;;  %4369 = vmatpush2.bf16.msra.mxu0 %v6236_v60  ;;  %v6323_v49 = vld [vmem:[%s6478_s24 + $0xf40] ss:$16 sps:$4 sm:$0xff]   ;;  %v2613_v60 = vrot.slane %v7116_v6, %v6781_v15 }
 0x317   : > { %4370 = vmatprep.subr.bf16.mxu0 %v6241_v62 }
 0x319   : > { %3454 = vmatpush2.bf16.msra.mxu1 %v6191_v52  ;;  %v6337_v52 = vld [vmem:[%s6478_s24 + $0xf04] ss:$16 sps:$4 sm:$0xff]  }
 0x31a   : > { %3455 = vmatprep.subr.bf16.mxu1 %v6196_v53  ;;  %4371 = vmatpush2.bf16.msra.mxu0 %v6239_v0  ;;  %v6335_v53 = vld [vmem:[%s6478_s24 + $0xf00] ss:$16 sps:$4 sm:$0xff]  }
 0x31d   : > { %3456 = vmatpush2.bf16.msra.mxu1 %v6194_v56 }
 0x31e   : > { %4395 = vmatprep.subr.bf16.mxu1 %v6247_v24 }
 0x320   : > { %3458 = vmatmul.mubr.bf16.vlgmr.msra.gmra.mxu1 %v7003_v16  ;;  %v6244_v16 = vld [vmem:[%s6478_s24 + $0xd04] ss:$16 sps:$4 sm:$0xff]  }
 0x321   : > { %3467 = vmatprep.mubr.bf16.mxu1 %v7012_v9  ;;  %v6242_v9 = vld [vmem:[%s6478_s24 + $0xd00] ss:$16 sps:$4 sm:$0xff]   ;;  %4372 = vmatprep.subr.bf16.mxu0 %v6244_v16 }
 0x322   : > { %4373 = vmatpush2.bf16.msra.mxu0 %v6242_v9  ;;  %4396 = vmatpush1.bf16.msra.mxu1 %v6245_v25 }
 0x323   : > { %4448 = vmatprep.subr.bf16.mxu0 %v6250_v38 }
 0x328   : > { %3468 = vmatmul.mubr.bf16.gmra.mxu1 %v7015_v31  ;;  %v6253_v31 = vld [vmem:[%s6478_s24 + $0xec4] ss:$16 sps:$4 sm:$0xff]  }
 0x329   : > { %4397 = vmatprep.subr.bf16.mxu1 %v6253_v31 }
 0x32a   : > { %4398 = vmatpush1.bf16.msra.mxu1 %v6251_v8 }
 0x32b   : > { %4399 = vmatprep.subr.bf16.mxu1 %v6259_v40 }
 0x32e   : > { %4400 = vmatpush1.bf16.msra.mxu1 %v6257_v20 }
 0x32f   : > { %4401 = vmatprep.subr.bf16.mxu1 %v6265_v21 }
 0x332   : > { %4402 = vmatpush1.bf16.msra.mxu1 %v6263_v22 }
 0x333   : > { %4403 = vmatprep.subr.bf16.mxu1 %v6271_v23 }
 0x336   : > { %4404 = vmatpush1.bf16.msra.mxu1 %v6269_v47 }
 0x337   : > { %4405 = vmatprep.subr.bf16.mxu1 %v6277_v50 }
 0x33a   : > { %4406 = vmatpush1.bf16.msra.mxu1 %v6275_v27 }
 0x33b   : > { %4407 = vmatprep.subr.bf16.mxu1 %v6283_v10 }
 0x33e   : > { %4408 = vmatpush1.bf16.msra.mxu1 %v6281_v39 }
 0x33f   : > { %4409 = vmatprep.subr.bf16.mxu1 %v6289_v30 }
 0x342   : > { %4410 = vmatpush1.bf16.msra.mxu1 %v6287_v29 }
 0x343   : > { %4411 = vmatprep.subr.bf16.mxu1 %v6295_v1 }
 0x346   : > { %4412 = vmatpush2.bf16.msra.mxu1 %v6293_v4 }
 0x347   : > { %4413 = vmatprep.subr.bf16.mxu1 %v6301_v35 }
 0x34a   : > { %4414 = vmatpush2.bf16.msra.mxu1 %v6299_v33 }
 0x34b   : > { %4415 = vmatprep.subr.bf16.mxu1 %v6307_v18 }
 0x34e   : > { %4416 = vmatpush2.bf16.msra.mxu1 %v6305_v37 }
 0x34f   : > { %4417 = vmatprep.subr.bf16.mxu1 %v6313_v41 }
 0x352   : > { %4418 = vmatpush2.bf16.msra.mxu1 %v6311_v14 }
 0x353   : > { %4419 = vmatprep.subr.bf16.mxu1 %v6319_v43 }
 0x356   : > { %4420 = vmatpush2.bf16.msra.mxu1 %v6317_v44 }
 0x357   : > { %4421 = vmatprep.subr.bf16.mxu1 %v6325_v45 }
 0x35a   : > { %4422 = vmatpush2.bf16.msra.mxu1 %v6323_v49 }
 0x35b   : > { %4423 = vmatprep.subr.bf16.mxu1 %v6331_v48 }
 0x35e   : > { %4424 = vmatpush2.bf16.msra.mxu1 %v6329_v51 }
 0x35f   : > { %4425 = vmatprep.subr.bf16.mxu1 %v6337_v52 }
 0x360   : > { %v3300_v55 = vpop.f32.mrf.mxu0 }
 0x361   : > { %v3301_v0 = vadd.f32 %v3300_v55, %v2609_v59 }
 0x362   : > { %4426 = vmatpush2.bf16.msra.mxu1 %v6335_v53  ;;  %v3302_v56 = vpop.f32.mrf.mxu0 }
 0x363   : > { %4501 = vmatprep.subr.bf16.mxu1 %v6343_v54  ;;  %v3303_v9 = vadd.f32 %v3302_v56, %v2613_v60 }
 0x364   : > { %v3304_v57 = vpop.f32.mrf.mxu0 }
 0x365   : > { %v3305_v31 = vadd.f32 %v3304_v57, %v2609_v59 }
 0x366   : > { %v3306_v58 = vpop.f32.mrf.mxu0 }
 0x367   : > { %v3307_v40 = vadd.f32 %v3306_v58, %v2613_v60 }
 0x368   : > { %v3310_v62 = vpop.f32.mrf.mxu0 }
 0x369   : > { %v3311_v10 = vadd.f32 %v3310_v62, %v2609_v59  ;;  %v6248_v62 = vld [vmem:[%s6478_s24 + $0xce8] ss:$16 sps:$4 sm:$0xff]  }
 0x36a   : > { %v3312_v24 = vpop.f32.mrf.mxu0 }
 0x36b   : > { %v3313_v29 = vadd.f32 %v3312_v24, %v2613_v60 }
 0x36c   : > { %v3314_v47 = vpop.f32.mrf.mxu0 }
 0x36d   : > { %v3315_v41 = vadd.f32 %v3314_v47, %v2609_v59 }
 0x36e   : > { %v3316_v35 = vpop.f32.mrf.mxu0 }
 0x36f   : > { %v3317_v52 = vadd.f32 %v3316_v35, %v2613_v60  ;;  %v6284_v35 = vld [vmem:[%s6478_s24 + $0xc28] ss:$16 sps:$4 sm:$0xff]  }
 0x3a0   : > { %v3353_v16 = vpop.f32.mrf.mxu1 }
 0x3a1   : > { %v3354_v25 = vadd.f32 %v3353_v16, %v3301_v0 }
 0x3a2   : > { %v3355_v38 = vpop.f32.mrf.mxu1 }
 0x3a3   : > { %v3356_v8 = vadd.f32 %v3355_v38, %v3303_v9  ;;  %v3494_v23 = vmul.f32 0.2, %v3354_v25  ;;  %vm3478_vm1 = vcmp.ge.f32.partialorder %v3354_v25, 0.0  ;;  %v6256_v9 = vld [vmem:[%s6478_s24 + $0xccc] ss:$16 sps:$4 sm:$0xff]  }
 0x3a4   : > { %v3357_v20 = vpop.f32.mrf.mxu1 }
 0x3a5   : > { %v3495_v22 = vmul.f32 0.2, %v3356_v8  ;;  %v3358_v21 = vadd.f32 %v3357_v20, %v3305_v31  ;;  %vm3479_vm0 = vcmp.ge.f32.partialorder %v3356_v8, 0.0  ;;  %v3510_v37 = vsel %vm3478_vm1, %v3354_v25, %v3494_v23  ;;  %v6254_v31 = vld [vmem:[%s6478_s24 + $0xcc8] ss:$16 sps:$4 sm:$0xff]  }
 0x3a6   : > { %v3359_v27 = vpop.f32.mrf.mxu1  ;;  %v3526_v53 = vmul.f32 1.4142135, %v3510_v37  ;;  %v6292_v37 = vld [vmem:[%s6478_s24 + $0xc0c] ss:$16 sps:$4 sm:$0xff]  }
 0x3a7   : > { %vm3482_vm2 = vcmp.ge.f32.partialorder %v3358_v21, 0.0  ;;  %v3498_v50 = vmul.f32 0.2, %v3358_v21  ;;  %v3360_v39 = vadd.f32 %v3359_v27, %v3307_v40  ;;  %v3511_v4 = vsel %vm3479_vm0, %v3356_v8, %v3495_v22  ;;  %v6262_v40 = vld [vmem:[%s6478_s24 + $0xcac] ss:$16 sps:$4 sm:$0xff]  }
 0x3a8   : > { %v3363_v30 = vpop.f32.mrf.mxu1  ;;  %v3527_v49 = vmul.f32 1.4142135, %v3511_v4  ;;  %v6260_v27 = vld [vmem:[%s6478_s24 + $0xca8] ss:$16 sps:$4 sm:$0xff]   ;;  %v6280_v4 = vld [vmem:[%s6478_s24 + $0xc4c] ss:$16 sps:$4 sm:$0xff]  }
 0x3a9   : > { %v3514_v1 = vsel %vm3482_vm2, %v3358_v21, %v3498_v50  ;;  %vm3483_vm3 = vcmp.ge.f32.partialorder %v3360_v39, 0.0  ;;  %v3499_v33 = vmul.f32 0.2, %v3360_v39  ;;  %v3364_v18 = vadd.f32 %v3363_v30, %v3311_v10  ;;  %v6266_v10 = vld [vmem:[%s6478_s24 + $0xc88] ss:$16 sps:$4 sm:$0xff]  }
 0x3aa   : > { %v3365_v14 = vpop.f32.mrf.mxu1  ;;  %v3530_v43 = vmul.f32 1.4142135, %v3514_v1  ;;  %v6272_v30 = vld [vmem:[%s6478_s24 + $0xc68] ss:$16 sps:$4 sm:$0xff]  }
 0x3ab   : > { %v3515_v44 = vsel %vm3483_vm3, %v3360_v39, %v3499_v33  ;;  %v3366_v45 = vadd.f32 %v3365_v14, %v3313_v29  ;;  %vm3486_vm4 = vcmp.ge.f32.partialorder %v3364_v18, 0.0  ;;  %v3502_v56 = vmul.f32 0.2, %v3364_v18  ;;  %v6268_v39 = vld [vmem:[%s6478_s24 + $0xc8c] ss:$16 sps:$4 sm:$0xff]  }
 0x3ac   : > { %v3531_v48 = vmul.f32 1.4142135, %v3515_v44  ;;  %v3367_v51 = vpop.f32.mrf.mxu1  ;;  %v7123_v59 = vpack.c.bf16 %v3530_v43, %v3526_v53  ;;  %v6274_v29 = vld [vmem:[%s6478_s24 + $0xc6c] ss:$16 sps:$4 sm:$0xff]   ;;  %v6278_v1 = vld [vmem:[%s6478_s24 + $0xc48] ss:$16 sps:$4 sm:$0xff]  }
 0x3ad   : > { %v3503_v54 = vmul.f32 0.2, %v3366_v45  ;;  %v3368_v55 = vadd.f32 %v3367_v51, %v3315_v41  ;;  %vm3487_vm5 = vcmp.ge.f32.partialorder %v3366_v45, 0.0  ;;  %v3518_v38 = vsel %vm3486_vm4, %v3364_v18, %v3502_v56  ;;  %v6286_v33 = vld [vmem:[%s6478_s24 + $0xc2c] ss:$16 sps:$4 sm:$0xff]   ;;  %v3406_v41 = vpop.f32.mrf.mxu0 }
 0x3ae   : > { %v3369_v57 = vpop.f32.mrf.mxu1  ;;  %v3543_v58 = vpack.c.bf16 %v3531_v48, %v3527_v49  ;;  %v3534_v47 = vmul.f32 1.4142135, %v3518_v38  ;;  %v6290_v18 = vld [vmem:[%s6478_s24 + $0xc08] ss:$16 sps:$4 sm:$0xff]   ;;  %v6298_v14 = vld [vmem:[%s6478_s24 + $0xdec] ss:$16 sps:$4 sm:$0xff]  }
 0x3af   : > { %vm3490_vm6 = vcmp.ge.f32.partialorder %v3368_v55, 0.0  ;;  %v3506_v0 = vmul.f32 0.2, %v3368_v55  ;;  %v3370_v16 = vadd.f32 %v3369_v57, %v3317_v52  ;;  %v3519_v24 = vsel %vm3487_vm5, %v3366_v45, %v3503_v54  ;;  %v6296_v43 = vld [vmem:[%s6478_s24 + $0xde8] ss:$16 sps:$4 sm:$0xff]   ;;  %v3408_v45 = vpop.f32.mrf.mxu0 }
 0x3b0   : > { %4374 = vmatprep.mubr.bf16.mxu0 %v3543_v58  ;;  %v3535_v22 = vmul.f32 1.4142135, %v3519_v24  ;;  %v6304_v44 = vld [vmem:[%s6478_s24 + $0xdcc] ss:$16 sps:$4 sm:$0xff]   ;;  %v6302_v49 = vld [vmem:[%s6478_s24 + $0xdc8] ss:$16 sps:$4 sm:$0xff]   ;;  %v2617_v57 = vrot.slane %v7116_v6, %v6818_v2 }
 0x3b1   : > { %v3522_v60 = vsel %vm3490_vm6, %v3368_v55, %v3506_v0  ;;  %vm3491_vm7 = vcmp.ge.f32.partialorder %v3370_v16, 0.0  ;;  %v3507_v25 = vmul.f32 0.2, %v3370_v16  ;;  %4375 = vmatmul.mubr.bf16.vlgmr.msra.gmra.mxu0 %v7123_v59  ;;  %v6310_v48 = vld [vmem:[%s6478_s24 + $0xdac] ss:$16 sps:$4 sm:$0xff]   ;;  %v3410_v51 = vpop.f32.mrf.mxu0 }
 0x3b2   : > { %4449 = vmatpush1.bf16.msra.mxu0 %v6248_v62  ;;  %v3538_v8 = vmul.f32 1.4142135, %v3522_v60  ;;  %v6308_v52 = vld [vmem:[%s6478_s24 + $0xda8] ss:$16 sps:$4 sm:$0xff]   ;;  %v6316_v53 = vld [vmem:[%s6478_s24 + $0xd8c] ss:$16 sps:$4 sm:$0xff]  }
 0x3b3   : > { %v3523_v20 = vsel %vm3491_vm7, %v3370_v16, %v3507_v25  ;;  %4450 = vmatprep.subr.bf16.mxu0 %v6256_v9  ;;  %v3412_v54 = vpop.f32.mrf.mxu0  ;;  %v6314_v55 = vld [vmem:[%s6478_s24 + $0xd88] ss:$16 sps:$4 sm:$0xff]   ;;  %v6322_v56 = vld [vmem:[%s6478_s24 + $0xd6c] ss:$16 sps:$4 sm:$0xff]   ;;  %v3407_v9 = vadd.f32 %v3406_v41, %v2617_v57 }
 0x3b4   : > { %v3539_v21 = vmul.f32 1.4142135, %v3523_v20  ;;  %v7133_v50 = vpack.c.bf16 %v3538_v8, %v3534_v47  ;;  %v6320_v0 = vld [vmem:[%s6478_s24 + $0xd68] ss:$16 sps:$4 sm:$0xff]   ;;  %v6328_v16 = vld [vmem:[%s6478_s24 + $0xd4c] ss:$16 sps:$4 sm:$0xff]   ;;  %v3411_v20 = vadd.f32 %v3410_v51, %v2617_v57 }
 0x3b5   : > { %v3416_v62 = vpop.f32.mrf.mxu0  ;;  %v6326_v8 = vld [vmem:[%s6478_s24 + $0xd48] ss:$16 sps:$4 sm:$0xff]  }
 0x3b6   : > { %4451 = vmatpush1.bf16.msra.mxu0 %v6254_v31  ;;  %v7130_v23 = vpack.c.bf16 %v3539_v21, %v3535_v22  ;;  %v6334_v22 = vld [vmem:[%s6478_s24 + $0xd2c] ss:$16 sps:$4 sm:$0xff]   ;;  %v6338_v51 = vld [vmem:[%s6478_s24 + $0xd08] ss:$16 sps:$4 sm:$0xff]  }
 0x3b7   : > { %4452 = vmatprep.subr.bf16.mxu0 %v6262_v40  ;;  %v3418_v25 = vpop.f32.mrf.mxu0 }
 0x3b8   : > { %4384 = vmatprep.mubr.bf16.mxu0 %v7130_v23 }
 0x3b9   : > { %4385 = vmatmul.mubr.bf16.gmra.mxu0 %v7133_v50 }
 0x3ba   : > { %4453 = vmatpush1.bf16.msra.mxu0 %v6260_v27  ;;  %4480 = vmatprep.mubr.bf16.mxu0 %v3543_v58  ;;  %v2621_v58 = vrot.slane %v7116_v6, %v6822_v46 }
 0x3bb   : > { %4454 = vmatprep.subr.bf16.mxu0 %v6268_v39  ;;  %v3420_v39 = vpop.f32.mrf.mxu0 }
 0x3bc   : > { %v3409_v60 = vadd.f32 %v3408_v45, %v2621_v58  ;;  %v3413_v21 = vadd.f32 %v3412_v54, %v2621_v58 }
 0x3be   : > { %4455 = vmatpush1.bf16.msra.mxu0 %v6266_v10 }
 0x3bf   : > { %4456 = vmatprep.subr.bf16.mxu0 %v6274_v29 }
 0x3c2   : > { %4457 = vmatpush1.bf16.msra.mxu0 %v6272_v30  ;;  %v6332_v30 = vld [vmem:[%s6478_s24 + $0xd28] ss:$16 sps:$4 sm:$0xff]  }
 0x3c3   : > { %4458 = vmatprep.subr.bf16.mxu0 %v6280_v4 }
 0x3c6   : > { %4459 = vmatpush1.bf16.msra.mxu0 %v6278_v1 }
 0x3c7   : > { %4460 = vmatprep.subr.bf16.mxu0 %v6286_v33  ;;  %v6340_v33 = vld [vmem:[%s6478_s24 + $0xd0c] ss:$16 sps:$4 sm:$0xff]  }
 0x3ca   : > { %4461 = vmatpush1.bf16.msra.mxu0 %v6284_v35  ;;  %v3417_v35 = vadd.f32 %v3416_v62, %v2617_v57 }
 0x3cb   : > { %4462 = vmatprep.subr.bf16.mxu0 %v6292_v37  ;;  %v3419_v37 = vadd.f32 %v3418_v25, %v2621_v58 }
 0x3ce   : > { %4463 = vmatpush1.bf16.msra.mxu0 %v6290_v18 }
 0x3cf   : > { %4464 = vmatprep.subr.bf16.mxu0 %v6298_v14 }
 0x3d2   : > { %4465 = vmatpush2.bf16.msra.mxu0 %v6296_v43 }
 0x3d3   : > { %4466 = vmatprep.subr.bf16.mxu0 %v6304_v44  ;;  %v3422_v44 = vpop.f32.mrf.mxu0 }
 0x3d6   : > { %4467 = vmatpush2.bf16.msra.mxu0 %v6302_v49 }
 0x3d7   : > { %4468 = vmatprep.subr.bf16.mxu0 %v6310_v48 }
 0x3da   : > { %4469 = vmatpush2.bf16.msra.mxu0 %v6308_v52  ;;  %v3421_v52 = vadd.f32 %v3420_v39, %v2617_v57  ;;  %v6341_v57 = vld [vmem:[%s6478_s24 + $0xee8] ss:$16 sps:$4 sm:$0xff]  }
 0x3db   : > { %4470 = vmatprep.subr.bf16.mxu0 %v6316_v53 }
 0x3de   : > { %4471 = vmatpush2.bf16.msra.mxu0 %v6314_v55 }
 0x3df   : > { %4472 = vmatprep.subr.bf16.mxu0 %v6322_v56 }
 0x3e0   : > { %v3459_v24 = vpop.f32.mrf.mxu1 }
 0x3e1   : > { %v3460_v38 = vadd.f32 %v3459_v24, %v3407_v9 }
 0x3e2   : > { %v3461_v31 = vpop.f32.mrf.mxu1  ;;  %4473 = vmatpush2.bf16.msra.mxu0 %v6320_v0 }
 0x3e3   : > { %v3462_v40 = vadd.f32 %v3461_v31, %v3409_v60  ;;  %4474 = vmatprep.subr.bf16.mxu0 %v6328_v16  ;;  %v3496_v10 = vmul.f32 0.2, %v3460_v38  ;;  %vm3480_vm9 = vcmp.ge.f32.partialorder %v3460_v38, 0.0  ;;  %v3423_v16 = vadd.f32 %v3422_v44, %v2621_v58  ;;  %v6361_v44 = vld [vmem:[%s6478_s24 + $0xe2c] ss:$16 sps:$4 sm:$0xff]  }
 0x3e4   : > { %v3463_v6 = vpop.f32.mrf.mxu1 }
 0x3e5   : > { %v3497_v47 = vmul.f32 0.2, %v3462_v40  ;;  %v3464_v27 = vadd.f32 %v3463_v6, %v3411_v20  ;;  %vm3481_vm8 = vcmp.ge.f32.partialorder %v3462_v40, 0.0  ;;  %v3512_v45 = vsel %vm3480_vm9, %v3460_v38, %v3496_v10 }
 0x3e6   : > { %v3465_v29 = vpop.f32.mrf.mxu1  ;;  %4475 = vmatpush2.bf16.msra.mxu0 %v6326_v8  ;;  %v3528_v9 = vmul.f32 1.4142135, %v3512_v45  ;;  %v6364_v45 = vld [vmem:[%s6478_s24 + $0xe0c] ss:$16 sps:$4 sm:$0xff]  }
 0x3e7   : > { %vm3484_vm10 = vcmp.ge.f32.partialorder %v3464_v27, 0.0  ;;  %v3500_v4 = vmul.f32 0.2, %v3464_v27  ;;  %v3466_v1 = vadd.f32 %v3465_v29, %v3413_v21  ;;  %4476 = vmatprep.subr.bf16.mxu0 %v6334_v22  ;;  %v3513_v14 = vsel %vm3481_vm8, %v3462_v40, %v3497_v47  ;;  %v6346_v22 = vld [vmem:[%s6478_s24 + $0xecc] ss:$16 sps:$4 sm:$0xff]  }
 0x3e8   : > { %v3469_v18 = vpop.f32.mrf.mxu1  ;;  %v3529_v56 = vmul.f32 1.4142135, %v3513_v14  ;;  %v6349_v29 = vld [vmem:[%s6478_s24 + $0xeac] ss:$16 sps:$4 sm:$0xff]   ;;  %v6353_v14 = vld [vmem:[%s6478_s24 + $0xe68] ss:$16 sps:$4 sm:$0xff]  }
 0x3e9   : > { %v3516_v41 = vsel %vm3484_vm10, %v3464_v27, %v3500_v4  ;;  %vm3485_vm11 = vcmp.ge.f32.partialorder %v3466_v1, 0.0  ;;  %v3501_v43 = vmul.f32 0.2, %v3466_v1  ;;  %v3470_v49 = vadd.f32 %v3469_v18, %v3417_v35  ;;  %v6344_v27 = vld [vmem:[%s6478_s24 + $0xec8] ss:$16 sps:$4 sm:$0xff]  }
 0x3ea   : > { %v3471_v48 = vpop.f32.mrf.mxu1  ;;  %4477 = vmatpush2.bf16.msra.mxu0 %v6332_v30  ;;  %v3532_v53 = vmul.f32 1.4142135, %v3516_v41  ;;  %v6355_v18 = vld [vmem:[%s6478_s24 + $0xe6c] ss:$16 sps:$4 sm:$0xff]  }
 0x3eb   : > { %v3517_v54 = vsel %vm3485_vm11, %v3466_v1, %v3501_v43  ;;  %v3472_v55 = vadd.f32 %v3471_v48, %v3419_v37  ;;  %4478 = vmatprep.subr.bf16.mxu0 %v6340_v33  ;;  %vm3488_vm12 = vcmp.ge.f32.partialorder %v3470_v49, 0.0  ;;  %v3504_v25 = vmul.f32 0.2, %v3470_v49  ;;  %v6352_v37 = vld [vmem:[%s6478_s24 + $0xe8c] ss:$16 sps:$4 sm:$0xff]  }
 0x3ec   : > { %v3533_v62 = vmul.f32 1.4142135, %v3517_v54  ;;  %v3473_v0 = vpop.f32.mrf.mxu1  ;;  %v7168_v8 = vpack.c.bf16 %v3532_v53, %v3528_v9  ;;  %v6358_v41 = vld [vmem:[%s6478_s24 + $0xe4c] ss:$16 sps:$4 sm:$0xff]   ;;  %v6356_v43 = vld [vmem:[%s6478_s24 + $0xe48] ss:$16 sps:$4 sm:$0xff]  }
 0x3ed   : > { %v3505_v24 = vmul.f32 0.2, %v3472_v55  ;;  %v3474_v60 = vadd.f32 %v3473_v0, %v3421_v52  ;;  %vm3489_vm13 = vcmp.ge.f32.partialorder %v3472_v55, 0.0  ;;  %v3520_v47 = vsel %vm3488_vm12, %v3470_v49, %v3504_v25  ;;  %v6362_v49 = vld [vmem:[%s6478_s24 + $0xe08] ss:$16 sps:$4 sm:$0xff]  }
 0x3ee   : > { %v3475_v38 = vpop.f32.mrf.mxu1  ;;  %4479 = vmatpush2.bf16.msra.mxu0 %v6338_v51  ;;  %v3545_v31 = vpack.c.bf16 %v3533_v62, %v3529_v56  ;;  %v3536_v1 = vmul.f32 1.4142135, %v3520_v47  ;;  %v6367_v48 = vld [vmem:[%s6478_s24 + $0xfec] ss:$16 sps:$4 sm:$0xff]   ;;  %v6365_v51 = vld [vmem:[%s6478_s24 + $0xfe8] ss:$16 sps:$4 sm:$0xff]  }
 0x3ef   : > { %vm3492_vm14 = vcmp.ge.f32.partialorder %v3474_v60, 0.0  ;;  %v3508_v20 = vmul.f32 0.2, %v3474_v60  ;;  %v3476_v40 = vadd.f32 %v3475_v38, %v3423_v16  ;;  %v3521_v58 = vsel %vm3489_vm13, %v3472_v55, %v3505_v24  ;;  %v6370_v52 = vld [vmem:[%s6478_s24 + $0xfcc] ss:$16 sps:$4 sm:$0xff]  }
 0x3f0   : > { %4427 = vmatprep.mubr.bf16.mxu1 %v3545_v31  ;;  %v3537_v30 = vmul.f32 1.4142135, %v3521_v58  ;;  %v6368_v53 = vld [vmem:[%s6478_s24 + $0xfc8] ss:$16 sps:$4 sm:$0xff]   ;;  %v6373_v54 = vld [vmem:[%s6478_s24 + $0xfac] ss:$16 sps:$4 sm:$0xff]  }
 0x3f1   : > { %v3524_v6 = vsel %vm3492_vm14, %v3474_v60, %v3508_v20  ;;  %vm3493_vm15 = vcmp.ge.f32.partialorder %v3476_v40, 0.0  ;;  %v3509_v21 = vmul.f32 0.2, %v3476_v40  ;;  %4428 = vmatmul.mubr.bf16.vlgmr.msra.gmra.mxu1 %v7168_v8  ;;  %4481 = vmatmul.mubr.bf16.vlgmr.msra.gmra.mxu0 %v7123_v59  ;;  %v6347_v59 = vld [vmem:[%s6478_s24 + $0xea8] ss:$16 sps:$4 sm:$0xff]  }
 0x3f2   : > { %4502 = vmatpush1.bf16.msra.mxu1 %v6341_v57  ;;  %4490 = vmatprep.mubr.bf16.mxu0 %v7130_v23  ;;  %v3540_v39 = vmul.f32 1.4142135, %v3524_v6  ;;  %v6350_v23 = vld [vmem:[%s6478_s24 + $0xe88] ss:$16 sps:$4 sm:$0xff]   ;;  %v6376_v56 = vld [vmem:[%s6478_s24 + $0xf8c] ss:$16 sps:$4 sm:$0xff]  }
 0x3f3   : > { %v3525_v10 = vsel %vm3493_vm15, %v3476_v40, %v3509_v21  ;;  %4503 = vmatprep.subr.bf16.mxu1 %v6346_v22  ;;  %v6371_v55 = vld [vmem:[%s6478_s24 + $0xfa8] ss:$16 sps:$4 sm:$0xff]   ;;  %v6379_v0 = vld [vmem:[%s6478_s24 + $0xf6c] ss:$16 sps:$4 sm:$0xff]  }
 0x3f4   : > { %v3541_v4 = vmul.f32 1.4142135, %v3525_v10  ;;  %v3548_v35 = vpack.c.bf16 %v3540_v39, %v3536_v1  ;;  %v6374_v62 = vld [vmem:[%s6478_s24 + $0xf88] ss:$16 sps:$4 sm:$0xff]   ;;  %v6382_v9 = vld [vmem:[%s6478_s24 + $0xf4c] ss:$16 sps:$4 sm:$0xff]  }
 0x3f5   : > { %v6377_v16 = vld [vmem:[%s6478_s24 + $0xf68] ss:$16 sps:$4 sm:$0xff]   ;;  %v6385_v60 = vld [vmem:[%s6478_s24 + $0xf2c] ss:$16 sps:$4 sm:$0xff]  }
 0x3f6   : > { %4504 = vmatpush1.bf16.msra.mxu1 %v6344_v27  ;;  %v3549_v33 = vpack.c.bf16 %v3541_v4, %v3537_v30  ;;  %v6380_v24 = vld [vmem:[%s6478_s24 + $0xf48] ss:$16 sps:$4 sm:$0xff]   ;;  %v6388_v38 = vld [vmem:[%s6478_s24 + $0xf0c] ss:$16 sps:$4 sm:$0xff]  }
 0x3f7   : > { %4505 = vmatprep.subr.bf16.mxu1 %v6349_v29  ;;  %v6383_v25 = vld [vmem:[%s6478_s24 + $0xf28] ss:$16 sps:$4 sm:$0xff]   ;;  %v7207_v22 = vld [vmem:[%s6772_s28 + $0xc] sm:$0xf] }
 0x3f8   : > { %4437 = vmatprep.mubr.bf16.mxu1 %v3549_v33  ;;  %v3685_v6 = vrot.slane %v7207_v22, %v6775_v12  ;;  %v3689_v21 = vrot.slane %v7207_v22, %v6781_v15  ;;  %v4555_v1 = vld [vmem:[%s7308_s1 + $0x8] sm:$0xff] }
 0x3f9   : > { %4438 = vmatmul.mubr.bf16.gmra.mxu1 %v3548_v35  ;;  %4491 = vmatmul.mubr.bf16.gmra.mxu0 %v7133_v50  ;;  %v6359_v50 = vld [vmem:[%s6478_s24 + $0xe28] ss:$16 sps:$4 sm:$0xff]  }
 0x3fa   : > { %4506 = vmatpush1.bf16.msra.mxu1 %v6347_v59  ;;  %4533 = vmatprep.mubr.bf16.mxu1 %v3545_v31  ;;  %v6386_v31 = vld [vmem:[%s6478_s24 + $0xf08] ss:$16 sps:$4 sm:$0xff]  }
 0x3fb   : > { %4507 = vmatprep.subr.bf16.mxu1 %v6352_v37 }
 0x3fe   : > { %4508 = vmatpush1.bf16.msra.mxu1 %v6350_v23  ;;  %v6413_v23 = vld [vmem:[%s6463_s20] sm:$0xff] }
 0x3ff   : > { %4509 = vmatprep.subr.bf16.mxu1 %v6355_v18 }
 0x402   : > { %4510 = vmatpush1.bf16.msra.mxu1 %v6353_v14 }
 0x403   : > { %4511 = vmatprep.subr.bf16.mxu1 %v6358_v41 }
 0x406   : > { %4512 = vmatpush1.bf16.msra.mxu1 %v6356_v43 }
 0x407   : > { %4513 = vmatprep.subr.bf16.mxu1 %v6361_v44 }
 0x40a   : > { %4514 = vmatpush1.bf16.msra.mxu1 %v6359_v50  ;;  %v4559_v50 = vld [vmem:[%s7308_s1 + $0x28] sm:$0xff] }
 0x40b   : > { %4515 = vmatprep.subr.bf16.mxu1 %v6364_v45 }
 0x40e   : > { %4516 = vmatpush1.bf16.msra.mxu1 %v6362_v49 }
 0x40f   : > { %4517 = vmatprep.subr.bf16.mxu1 %v6367_v48 }
 0x412   : > { %4518 = vmatpush2.bf16.msra.mxu1 %v6365_v51 }
 0x413   : > { %4519 = vmatprep.subr.bf16.mxu1 %v6370_v52 }
 0x416   : > { %4520 = vmatpush2.bf16.msra.mxu1 %v6368_v53  ;;  %v4562_v53 = vld [vmem:[%s7308_s1 + $0x40] sm:$0xff] }
 0x417   : > { %4521 = vmatprep.subr.bf16.mxu1 %v6373_v54 }
 0x41a   : > { %4522 = vmatpush2.bf16.msra.mxu1 %v6371_v55 }
 0x41b   : > { %4523 = vmatprep.subr.bf16.mxu1 %v6376_v56 }
 0x41e   : > { %4524 = vmatpush2.bf16.msra.mxu1 %v6374_v62 }
 0x41f   : > { %4525 = vmatprep.subr.bf16.mxu1 %v6379_v0 }
 0x422   : > { %4526 = vmatpush2.bf16.msra.mxu1 %v6377_v16 }
 0x423   : > { %4527 = vmatprep.subr.bf16.mxu1 %v6382_v9 }
 0x426   : > { %4528 = vmatpush2.bf16.msra.mxu1 %v6380_v24 }
 0x427   : > { %4529 = vmatprep.subr.bf16.mxu1 %v6385_v60 }
 0x42a   : > { %4530 = vmatpush2.bf16.msra.mxu1 %v6383_v25 }
 0x42b   : > { %4531 = vmatprep.subr.bf16.mxu1 %v6388_v38 }
 0x42e   : > { %4532 = vmatpush2.bf16.msra.mxu1 %v6386_v31 }
 0x431   : > { %4534 = vmatmul.mubr.bf16.vlgmr.msra.gmra.mxu1 %v7168_v8  ;;  %v4554_v8 = vld [vmem:[%s7308_s1] sm:$0xff] }
 0x432   : > { %4543 = vmatprep.mubr.bf16.mxu1 %v3549_v33 }
 0x439   : > { %4544 = vmatmul.mubr.bf16.gmra.mxu1 %v3548_v35  ;;  %v4558_v35 = vld [vmem:[%s7308_s1 + $0x20] sm:$0xff] }
 0x471   : > { %v4376_v57 = vpop.f32.mrf.mxu0 }
 0x472   : > { %v4377_v27 = vadd.f32 %v4376_v57, %v3685_v6 }
 0x473   : > { %v4378_v20 = vpop.f32.mrf.mxu0 }
 0x474   : > { %v4379_v10 = vadd.f32 %v4378_v20, %v3689_v21 }
 0x475   : > { %v4380_v40 = vpop.f32.mrf.mxu0 }
 0x476   : > { %v4381_v12 = vadd.f32 %v4380_v40, %v3685_v6 }
 0x477   : > { %v4382_v58 = vpop.f32.mrf.mxu0 }
 0x478   : > { %v4383_v37 = vadd.f32 %v4382_v58, %v3689_v21 }
 0x479   : > { %v4386_v47 = vpop.f32.mrf.mxu0 }
 0x47a   : > { %v4387_v45 = vadd.f32 %v4386_v47, %v3685_v6 }
 0x47b   : > { %v4388_v30 = vpop.f32.mrf.mxu0 }
 0x47c   : > { %v4389_v54 = vadd.f32 %v4388_v30, %v3689_v21 }
 0x47d   : > { %v4390_v43 = vpop.f32.mrf.mxu0 }
 0x47e   : > { %v4391_v9 = vadd.f32 %v4390_v43, %v3685_v6 }
 0x47f   : > { %v4392_v0 = vpop.f32.mrf.mxu0 }
 0x480   : > { %v4393_v31 = vadd.f32 %v4392_v0, %v3689_v21 }
 0x4b1   : > { %v4429_v39 = vpop.f32.mrf.mxu1 }
 0x4b2   : > { %v4430_v29 = vadd.f32 %v4429_v39, %v4377_v27 }
 0x4b3   : > { %v4431_v4 = vpop.f32.mrf.mxu1 }
 0x4b4   : > { %v4570_v33 = vmul.f32 %v4554_v8, %v4430_v29  ;;  %v4432_v59 = vadd.f32 %v4431_v4, %v4379_v10  ;;  %v3693_v4 = vrot.slane %v7207_v22, %v6818_v2 }
 0x4b5   : > { %v4433_v15 = vpop.f32.mrf.mxu1 }
 0x4b6   : > { %v4586_v18 = vadd.f32 %v6413_v23, %v4570_v33  ;;  %v4571_v14 = vmul.f32 %v4555_v1, %v4432_v59  ;;  %v4434_v41 = vadd.f32 %v4433_v15, %v4381_v12 }
 0x4b7   : > { %v4435_v44 = vpop.f32.mrf.mxu1 }
 0x4b8   : > { %4602 = vst [vmem:[%s7224_s9] sm:$0xff] %v4586_v18  ;;  %v4587_v49 = vadd.f32 %v6554_v61, %v4571_v14  ;;  %v4574_v48 = vmul.f32 %v4558_v35, %v4434_v41  ;;  %v4436_v51 = vadd.f32 %v4435_v44, %v4383_v37  ;;  %v4563_v61 = vld [vmem:[%s7308_s1 + $0x48] sm:$0xff]  ;;  %v4557_v37 = vld [vmem:[%s7308_s1 + $0x18] sm:$0xff] }
 0x4b9   : > { %v4439_v52 = vpop.f32.mrf.mxu1 }
 0x4ba   : > { %4603 = vst [vmem:[%s7224_s9 + $0x8] sm:$0xff] %v4587_v49  ;;  %v4590_v55 = vadd.f32 %v6577_v11, %v4574_v48  ;;  %v4575_v56 = vmul.f32 %v4559_v50, %v4436_v51  ;;  %v4440_v62 = vadd.f32 %v4439_v52, %v4387_v45  ;;  %v4566_v11 = vld [vmem:[%s7308_s1 + $0x60] sm:$0xff]  ;;  %v4561_v49 = vld [vmem:[%s7308_s1 + $0x38] sm:$0xff] }
 0x4bb   : > { %v4441_v16 = vpop.f32.mrf.mxu1 }
 0x4bc   : > { %4606 = vst [vmem:[%s7224_s9 + $0x20] sm:$0xff] %v4590_v55  ;;  %v4591_v24 = vadd.f32 %v6567_v5, %v4575_v56  ;;  %v4578_v60 = vmul.f32 %v4562_v53, %v4440_v62  ;;  %v4442_v25 = vadd.f32 %v4441_v16, %v4389_v54  ;;  %v4567_v5 = vld [vmem:[%s7308_s1 + $0x68] sm:$0xff] }
 0x4bd   : > { %v4443_v38 = vpop.f32.mrf.mxu1 }
 0x4be   : > { %4607 = vst [vmem:[%s7224_s9 + $0x28] sm:$0xff] %v4591_v24  ;;  %v4594_v57 = vadd.f32 %v6609_v32, %v4578_v60  ;;  %v4579_v20 = vmul.f32 %v4563_v61, %v4442_v25  ;;  %v4444_v40 = vadd.f32 %v4443_v38, %v4391_v9  ;;  %v4482_v32 = vpop.f32.mrf.mxu0 }
 0x4bf   : > { %v4445_v58 = vpop.f32.mrf.mxu1  ;;  %v4483_v12 = vadd.f32 %v4482_v32, %v3693_v4 }
 0x4c0   : > { %4610 = vst [vmem:[%s7224_s9 + $0x40] sm:$0xff] %v4594_v57  ;;  %v4595_v6 = vadd.f32 %v6587_v17, %v4579_v20  ;;  %v4582_v47 = vmul.f32 %v4566_v11, %v4444_v40  ;;  %v4446_v27 = vadd.f32 %v4445_v58, %v4393_v31  ;;  %v4484_v10 = vpop.f32.mrf.mxu0  ;;  %v3697_v17 = vrot.slane %v7207_v22, %v6822_v46  ;;  %v4560_v22 = vld [vmem:[%s7308_s1 + $0x30] sm:$0xff] }
 0x4c2   : > { %4611 = vst [vmem:[%s7224_s9 + $0x48] sm:$0xff] %v4595_v6  ;;  %v4598_v39 = vadd.f32 %v6613_v34, %v4582_v47  ;;  %v4583_v21 = vmul.f32 %v4567_v5, %v4446_v27  ;;  %v4486_v29 = vpop.f32.mrf.mxu0  ;;  %v4556_v34 = vld [vmem:[%s7308_s1 + $0x10] sm:$0xff]  ;;  %v4485_v59 = vadd.f32 %v4484_v10, %v3697_v17 }
 0x4c3   : > { %v4487_v2 = vadd.f32 %v4486_v29, %v3693_v4 }
 0x4c4   : > { %4614 = vst [vmem:[%s7224_s9 + $0x60] sm:$0xff] %v4598_v39  ;;  %v4599_v8 = vadd.f32 %v6599_v26, %v4583_v21  ;;  %v4488_v30 = vpop.f32.mrf.mxu0 }
 0x4c5   : > { %v4489_v14 = vadd.f32 %v4488_v30, %v3697_v17 }
 0x4c6   : > { %4615 = vst [vmem:[%s7224_s9 + $0x68] sm:$0xff] %v4599_v8  ;;  %v4492_v1 = vpop.f32.mrf.mxu0 }
 0x4c7   : > { %v4493_v48 = vadd.f32 %v4492_v1, %v3693_v4 }
 0x4c8   : > { %v4494_v15 = vpop.f32.mrf.mxu0 }
 0x4c9   : > { %v4495_v55 = vadd.f32 %v4494_v15, %v3697_v17 }
 0x4ca   : > { %v4496_v50 = vpop.f32.mrf.mxu0 }
 0x4cb   : > { %v4497_v9 = vadd.f32 %v4496_v50, %v3693_v4 }
 0x4cc   : > { %v4498_v16 = vpop.f32.mrf.mxu0 }
 0x4cd   : > { %v4499_v11 = vadd.f32 %v4498_v16, %v3697_v17 }
 0x4f1   : > { %v4535_v33 = vpop.f32.mrf.mxu1 }
 0x4f2   : > { %v4536_v26 = vadd.f32 %v4535_v33, %v4483_v12 }
 0x4f3   : > { %v4537_v35 = vpop.f32.mrf.mxu1 }
 0x4f4   : > { %v4572_v23 = vmul.f32 %v4556_v34, %v4536_v26  ;;  %v4538_v18 = vadd.f32 %v4537_v35, %v4485_v59 }
 0x4f5   : > { %v4539_v46 = vpop.f32.mrf.mxu1 }
 0x4f6   : > { %v4588_v41 = vadd.f32 %v6563_v3, %v4572_v23  ;;  %v4573_v43 = vmul.f32 %v4557_v37, %v4538_v18  ;;  %v4540_v44 = vadd.f32 %v4539_v46, %v4487_v2  ;;  %v4564_v3 = vld [vmem:[%s7308_s1 + $0x50] sm:$0xff] }
 0x4f7   : > { %v4541_v45 = vpop.f32.mrf.mxu1 }
 0x4f8   : > { %4604 = vst [vmem:[%s7224_s9 + $0x10] sm:$0xff] %v4588_v41  ;;  %v4589_v51 = vadd.f32 %v6558_v63, %v4573_v43  ;;  %v4576_v52 = vmul.f32 %v4560_v22, %v4540_v44  ;;  %v4542_v53 = vadd.f32 %v4541_v45, %v4489_v14  ;;  %v4565_v63 = vld [vmem:[%s7308_s1 + $0x58] sm:$0xff] }
 0x4f9   : > { %v4545_v54 = vpop.f32.mrf.mxu1 }
 0x4fa   : > { %4605 = vst [vmem:[%s7224_s9 + $0x18] sm:$0xff] %v4589_v51  ;;  %v4592_v56 = vadd.f32 %v6581_v13, %v4576_v52  ;;  %v4577_v62 = vmul.f32 %v4561_v49, %v4542_v53  ;;  %v4546_v0 = vadd.f32 %v4545_v54, %v4493_v48  ;;  %v4568_v13 = vld [vmem:[%s7308_s1 + $0x70] sm:$0xff] }
 0x4fb   : > { %v4547_v61 = vpop.f32.mrf.mxu1 }
 0x4fc   : > { %4608 = vst [vmem:[%s7224_s9 + $0x30] sm:$0xff] %v4592_v56  ;;  %v4593_v24 = vadd.f32 %v6571_v7, %v4577_v62  ;;  %v4580_v60 = vmul.f32 %v4564_v3, %v4546_v0  ;;  %v4548_v25 = vadd.f32 %v4547_v61, %v4495_v55  ;;  %v4569_v7 = vld [vmem:[%s7308_s1 + $0x78] sm:$0xff] }
 0x4fd   : > { %v4549_v38 = vpop.f32.mrf.mxu1 }
 0x4fe   : > { %4609 = vst [vmem:[%s7224_s9 + $0x38] sm:$0xff] %v4593_v24  ;;  %v4596_v31 = vadd.f32 %v6617_v36, %v4580_v60  ;;  %v4581_v57 = vmul.f32 %v4565_v63, %v4548_v25  ;;  %v4550_v20 = vadd.f32 %v4549_v38, %v4497_v9 }
 0x4ff   : > { %v4551_v40 = vpop.f32.mrf.mxu1 }
 0x500   : > { %4612 = vst [vmem:[%s7224_s9 + $0x50] sm:$0xff] %v4596_v31  ;;  %v4597_v58 = vadd.f32 %v6591_v19, %v4581_v57  ;;  %v4584_v5 = vmul.f32 %v4568_v13, %v4550_v20  ;;  %v4552_v6 = vadd.f32 %v4551_v40, %v4499_v11 }
 0x502   : > { %4613 = vst [vmem:[%s7224_s9 + $0x58] sm:$0xff] %v4597_v58  ;;  %v4600_v47 = vadd.f32 %v6629_v42, %v4584_v5  ;;  %v4585_v27 = vmul.f32 %v4569_v7, %v4552_v6 }
 0x504   : > { %4616 = vst [vmem:[%s7224_s9 + $0x70] sm:$0xff] %v4600_v47  ;;  %v4601_v39 = vadd.f32 %v6603_v28, %v4585_v27 }
 0x506   : > { %4617 = vst [vmem:[%s7224_s9 + $0x78] sm:$0xff] %v4601_v39 }
 0x507 PF: > { %s14_s15 = sadd.s32 1, %s6420_s15  }
 0x508   : > { %p11_p4 = scmp.ge.s32.totalorder %s14_s15, 5  }
 0x50a   :  { %13 = sbr.rel (!%p11_p4) target bundleno = 1 (0x1), region = 78 }

</bundles_post_ra>
